<compile_context>
chip_gen: v6e
topology: v6e:2x2x1
jax: 0.10.0
libtpu: 0.0.40
codegen_flags: <defaults>
</compile_context>

<pallas_src>
import functools

import jax
import jax.numpy as jnp
from jax.experimental import pallas as pl
from jax.experimental.pallas import tpu as pltpu


# -----------------------------------------------------------------------------
# Helpers
# -----------------------------------------------------------------------------
def _layer_norm(x, w, b, eps=1e-5):
    """LayerNorm over the last dim (biased variance, like torch)."""
    mu = jnp.mean(x, axis=-1, keepdims=True)
    var = jnp.mean((x - mu) ** 2, axis=-1, keepdims=True)
    return (x - mu) * jax.lax.rsqrt(var + eps) * w + b


# -----------------------------------------------------------------------------
# Kernel: one grid step == one encoder layer (embed @ l==0, head @ l==last)
# -----------------------------------------------------------------------------
def bot_request_transformer_kernel(
    x_ref,                      # [B*S, Din]        f32
    embed_w_ref, embed_b_ref,   # [Din, D] f32, [1, D] f32
    wqkv_ref, bqkv_ref,         # [1, D, 3D] bf16, [1, 1, 3D] f32  (layer block)
    wo_ref, bo_ref,             # [1, D, D]  bf16, [1, 1, D]  f32
    w1_ref, b1_ref,             # [1, D, F]  bf16, [1, 1, F]  f32
    w2_ref, b2_ref,             # [1, F, D]  bf16, [1, 1, D]  f32
    ln_ref,                     # [1, 4, D]  f32  (ln1_w, ln1_b, ln2_w, ln2_b)
    cls_w_ref, cls_b_ref,       # [1, D] f32, [1, 1] f32
    out_ref,                    # [B, 1] f32
    h_ref,                      # VMEM scratch [B*S, D] f32 (carried across layers)
    *, nhead, batch, seq, ffn_chunk,
):
    layer = pl.program_id(0)
    n_layers = pl.num_programs(0)

    N = batch * seq
    D = embed_w_ref.shape[1]
    hd = D // nhead
    scale = float(hd) ** -0.5

    # ---- input projection (first grid step only; f32 for parity) ------------
    @pl.when(layer == 0)
    def _embed():
        h_ref[...] = (
            jnp.dot(x_ref[...], embed_w_ref[...],
                    preferred_element_type=jnp.float32)
            + embed_b_ref[...]
        )

    h = h_ref[...]                                              # [N, D] f32

    def split_heads(t):
        # [N, D] -> [B, S, H, hd] -> [B, H, S, hd] -> [B*H, S, hd]
        t = t.reshape(batch, seq, nhead, hd)
        t = jnp.transpose(t, (0, 2, 1, 3))
        return t.reshape(batch * nhead, seq, hd)

    # ---- multi-head self-attention ------------------------------------------
    qkv = (
        jnp.dot(h.astype(jnp.bfloat16), wqkv_ref[0],
                preferred_element_type=jnp.float32)
        + bqkv_ref[0]
    )                                                           # [N, 3D] f32
    q = qkv[:, 0:D] * scale            # fold 1/sqrt(hd) into q
    k = qkv[:, D:2 * D]
    v = qkv[:, 2 * D:3 * D]

    qh, kh, vh = split_heads(q), split_heads(k), split_heads(v)

    # bf16 x bf16 -> f32 accumulate (single-pass MXU)
    s = jnp.einsum('nqd,nkd->nqk',
                   qh.astype(jnp.bfloat16), kh.astype(jnp.bfloat16),
                   preferred_element_type=jnp.float32)          # [B*H, S, S]
    s = s - jnp.max(s, axis=-1, keepdims=True)
    p = jnp.exp(s)
    p = p * pl.reciprocal(jnp.sum(p, axis=-1, keepdims=True), approx=True)
    ctx = jnp.einsum('nqk,nkd->nqd',
                     p.astype(jnp.bfloat16), vh.astype(jnp.bfloat16),
                     preferred_element_type=jnp.float32)        # [B*H, S, hd]

    attn = ctx.reshape(batch, nhead, seq, hd)
    attn = jnp.transpose(attn, (0, 2, 1, 3)).reshape(N, D)      # merge heads
    attn = (
        jnp.dot(attn.astype(jnp.bfloat16), wo_ref[0],
                preferred_element_type=jnp.float32)
        + bo_ref[0]
    )

    ln = ln_ref[0]                                              # [4, D]
    ln1_w, ln1_b = ln[0:1, :], ln[1:2, :]
    ln2_w, ln2_b = ln[2:3, :], ln[3:4, :]

    # residual + LayerNorm 1 (post-norm)
    y = _layer_norm(h + attn, ln1_w, ln1_b)

    # ---- feed-forward (ReLU), chunked over hidden dim -----------------------
    F = w1_ref.shape[2]
    y_bf = y.astype(jnp.bfloat16)
    f = jnp.zeros((N, D), jnp.float32) + b2_ref[0]
    for c0 in range(0, F, ffn_chunk):
        c1 = min(c0 + ffn_chunk, F)
        h1 = jnp.maximum(
            jnp.dot(y_bf, w1_ref[0, :, c0:c1],
                    preferred_element_type=jnp.float32)
            + b1_ref[0, :, c0:c1],
            0.0,
        )                                                       # [N, chunk]
        f = f + jnp.dot(h1.astype(jnp.bfloat16), w2_ref[0, c0:c1, :],
                        preferred_element_type=jnp.float32)

    # residual + LayerNorm 2 -> carry to next grid step
    h_ref[...] = _layer_norm(y + f, ln2_w, ln2_b)

    # ---- last sequence position, cls head, sigmoid (last grid step only) ----
    @pl.when(layer == n_layers - 1)
    def _head():
        h_last = h_ref[...].reshape(batch, seq, D)[:, seq - 1, :]   # [B, D]
        logits = (
            jnp.sum(h_last * cls_w_ref[...], axis=-1, keepdims=True)
            + cls_b_ref[...]
        )                                                           # [B, 1]
        out_ref[...] = 1.0 / (1.0 + jnp.exp(-logits))


# -----------------------------------------------------------------------------
# Wrapper: grid over layers, per-layer weight streaming, activations in scratch
# -----------------------------------------------------------------------------
def bot_request_transformer_forward(x, params, *, nhead, num_layers, ffn_chunk=512):
    """x: [B, S, input_dim] f32  ->  probs: [B, 1] f32"""
    B, S, Din = x.shape
    D = params['embed_w'].shape[1]
    F = params['w1'].shape[2]
    N = B * S
    L = num_layers
    H = nhead

    kernel = functools.partial(
        bot_request_transformer_kernel,
        nhead=nhead, batch=B, seq=S, ffn_chunk=ffn_chunk)

    args = (
        x.reshape(N, Din),
        params['embed_w'], params['embed_b'],
        params['wqkv'], params['bqkv'],
        params['wo'], params['bo'],
        params['w1'], params['b1'],
        params['w2'], params['b2'],
        params['ln'],
        params['cls_w'], params['cls_b'],
    )

    in_specs = [
        pl.BlockSpec((N, Din), lambda l: (0, 0)),            # x         (resident)
        pl.BlockSpec((Din, D), lambda l: (0, 0)),            # embed_w   (resident)
        pl.BlockSpec((1, D), lambda l: (0, 0)),              # embed_b   (resident)
        pl.BlockSpec((1, D, 3 * D), lambda l: (l, 0, 0)),    # wqkv      (per layer)
        pl.BlockSpec((1, 1, 3 * D), lambda l: (l, 0, 0)),    # bqkv
        pl.BlockSpec((1, D, D), lambda l: (l, 0, 0)),        # wo
        pl.BlockSpec((1, 1, D), lambda l: (l, 0, 0)),        # bo
        pl.BlockSpec((1, D, F), lambda l: (l, 0, 0)),        # w1
        pl.BlockSpec((1, 1, F), lambda l: (l, 0, 0)),        # b1
        pl.BlockSpec((1, F, D), lambda l: (l, 0, 0)),        # w2
        pl.BlockSpec((1, 1, D), lambda l: (l, 0, 0)),        # b2
        pl.BlockSpec((1, 4, D), lambda l: (l, 0, 0)),        # ln
        pl.BlockSpec((1, D), lambda l: (0, 0)),              # cls_w     (resident)
        pl.BlockSpec((1, 1), lambda l: (0, 0)),              # cls_b     (resident)
    ]
    out_spec = pl.BlockSpec((B, 1), lambda l: (0, 0))

    # Advisory cost estimate (helps XLA schedule around the custom call).
    attn_flops = 2 * 2 * (B * H) * S * S * (D // H)          # QK^T + PV
    layer_flops = (2 * N * D * 3 * D) + attn_flops + (2 * N * D * D) + (4 * N * D * F)
    flops = 2 * N * Din * D + L * layer_flops + 2 * B * D
    transcendentals = L * (B * H * S * S) + B                # softmax exp + sigmoid
    bytes_accessed = sum(int(a.size) * a.dtype.itemsize for a in args) + B * 4
    cost = pl.CostEstimate(flops=int(flops),
                           transcendentals=int(transcendentals),
                           bytes_accessed=int(bytes_accessed))

    return pl.pallas_call(
        kernel,
        out_shape=jax.ShapeDtypeStruct((B, 1), jnp.float32),
        grid_spec=pltpu.PrefetchScalarGridSpec(
            num_scalar_prefetch=0,
            grid=(L,),
            in_specs=in_specs,
            out_specs=out_spec,
            scratch_shapes=[pltpu.VMEM((N, D), jnp.float32)],
        ),
        compiler_params=pltpu.CompilerParams(
            dimension_semantics=("arbitrary",)),
        cost_estimate=cost,
    )(*args)


# -----------------------------------------------------------------------------
# Deterministic synthetic parameters (bf16 matmul weights, f32 bias/LN/embed)
# -----------------------------------------------------------------------------
def init_params(key, input_dim, d_model, nhead, num_layers, dim_ff):
    D, F = d_model, dim_ff

    def nrm(k, shape, scale=0.02, dtype=jnp.float32):
        return (scale * jax.random.normal(k, shape)).astype(dtype)

    keys = jax.random.split(key, 4 + num_layers)

    def layer_weights(k):
        lk = jax.random.split(k, 8)
        return dict(
            wqkv=nrm(lk[0], (D, 3 * D)),   # torch in_proj is [3D, D]; stored transposed
            bqkv=nrm(lk[1], (1, 3 * D)),
            wo=nrm(lk[2], (D, D)),
            bo=nrm(lk[3], (1, D)),
            w1=nrm(lk[4], (D, F)),
            b1=nrm(lk[5], (1, F)),
            w2=nrm(lk[6], (F, D)),
            b2=nrm(lk[7], (1, D)),
        )

    layers = [layer_weights(keys[4 + l]) for l in range(num_layers)]

    def stack(name, dtype=jnp.float32):
        return jnp.stack([lw[name] for lw in layers]).astype(dtype)

    # pack (ln1_w, ln1_b, ln2_w, ln2_b) rows into one [L, 4, D] slab
    ln_row = jnp.concatenate(
        [jnp.ones((1, 1, D)), jnp.zeros((1, 1, D)),
         jnp.ones((1, 1, D)), jnp.zeros((1, 1, D))], axis=1)

    return {
        'embed_w': nrm(keys[0], (input_dim, D)),              # f32 (tiny; parity)
        'embed_b': nrm(keys[1], (1, D)),
        'wqkv': stack('wqkv', jnp.bfloat16),
        'bqkv': stack('bqkv'),
        'wo': stack('wo', jnp.bfloat16),
        'bo': stack('bo'),
        'w1': stack('w1', jnp.bfloat16),
        'b1': stack('b1'),
        'w2': stack('w2', jnp.bfloat16),
        'b2': stack('b2'),
        'ln': jnp.tile(ln_row, (num_layers, 1, 1)).astype(jnp.float32),
        'cls_w': nrm(keys[2], (1, D)),
        'cls_b': nrm(keys[3], (1, 1)),
    }


# -----------------------------------------------------------------------------
if __name__ == "__main__":
    # Small shapes consistent with the module (d_model/nhead/num_layers defaults).
    BATCH, SEQ_LEN, INPUT_DIM = 2, 8, 16
    D_MODEL, NHEAD, NUM_LAYERS = 128, 4, 2
    DIM_FF = 2048  # nn.TransformerEncoderLayer default

    key = jax.random.PRNGKey(0)
    k_params, k_x = jax.random.split(key)

    params = init_params(k_params, INPUT_DIM, D_MODEL, NHEAD, NUM_LAYERS, DIM_FF)
    x = jax.random.normal(k_x, (BATCH, SEQ_LEN, INPUT_DIM), dtype=jnp.float32)

    fwd = jax.jit(functools.partial(bot_request_transformer_forward,
                                    nhead=NHEAD, num_layers=NUM_LAYERS))
    out = fwd(x, params)
    jax.block_until_ready(out)

    assert out.shape == (BATCH, 1), out.shape
    assert out.dtype == jnp.float32
    assert bool(jnp.all(jnp.isfinite(out)))
    assert bool(jnp.all((out >= 0.0) & (out <= 1.0)))
    print("KERNEL_OK")
</pallas_src>

<mosaic_0001>
module attributes {stable_mosaic.version = 11 : i64} {
  func.func @bot_request_transformer_kernel(%arg0: i32, %arg1: memref<16x16xf32, #tpu.memory_space<vmem>>, %arg2: memref<16x128xf32, #tpu.memory_space<vmem>>, %arg3: memref<1x128xf32, #tpu.memory_space<vmem>>, %arg4: memref<1x128x384xbf16, #tpu.memory_space<vmem>>, %arg5: memref<1x1x384xf32, #tpu.memory_space<vmem>>, %arg6: memref<1x128x128xbf16, #tpu.memory_space<vmem>>, %arg7: memref<1x1x128xf32, #tpu.memory_space<vmem>>, %arg8: memref<1x128x2048xbf16, #tpu.memory_space<vmem>>, %arg9: memref<1x1x2048xf32, #tpu.memory_space<vmem>>, %arg10: memref<1x2048x128xbf16, #tpu.memory_space<vmem>>, %arg11: memref<1x1x128xf32, #tpu.memory_space<vmem>>, %arg12: memref<1x4x128xf32, #tpu.memory_space<vmem>>, %arg13: memref<1x128xf32, #tpu.memory_space<vmem>>, %arg14: memref<1x1xf32, #tpu.memory_space<vmem>>, %arg15: memref<2x1xf32, #tpu.memory_space<vmem>>, %arg16: memref<16x128xf32, #tpu.memory_space<vmem>>) attributes {dimension_semantics = [#tpu.dimension_semantics<arbitrary>], iteration_bounds = array<i64: 2>, scalar_prefetch = 0 : i64, scratch_operands = 1 : i64, tpu.core_type = #tpu.core_type<tc>, window_params = [{pipeline_mode = #tpu.pipeline_mode<synchronous>, transform_indices = @transform_0, window_bounds = array<i64: 16, 16>}, {pipeline_mode = #tpu.pipeline_mode<synchronous>, transform_indices = @transform_1, window_bounds = array<i64: 16, 128>}, {pipeline_mode = #tpu.pipeline_mode<synchronous>, transform_indices = @transform_2, window_bounds = array<i64: 1, 128>}, {transform_indices = @transform_3, window_bounds = array<i64: 1, 128, 384>}, {transform_indices = @transform_4, window_bounds = array<i64: 1, 1, 384>}, {transform_indices = @transform_5, window_bounds = array<i64: 1, 128, 128>}, {transform_indices = @transform_6, window_bounds = array<i64: 1, 1, 128>}, {transform_indices = @transform_7, window_bounds = array<i64: 1, 128, 2048>}, {transform_indices = @transform_8, window_bounds = array<i64: 1, 1, 2048>}, {transform_indices = @transform_9, window_bounds = array<i64: 1, 2048, 128>}, {transform_indices = @transform_10, window_bounds = array<i64: 1, 1, 128>}, {transform_indices = @transform_11, window_bounds = array<i64: 1, 4, 128>}, {pipeline_mode = #tpu.pipeline_mode<synchronous>, transform_indices = @transform_12, window_bounds = array<i64: 1, 128>}, {pipeline_mode = #tpu.pipeline_mode<synchronous>, transform_indices = @transform_13, window_bounds = array<i64: 1, 1>}, {pipeline_mode = #tpu.pipeline_mode<synchronous>, transform_indices = @transform_14, window_bounds = array<i64: 2, 1>}]} {
    %c0_i32 = arith.constant 0 : i32
    %0 = arith.cmpi eq, %arg0, %c0_i32 : i32
    %1 = arith.extui %0 : i1 to i32
    %c0_i32_0 = arith.constant 0 : i32
    %2 = arith.cmpi ne, %1, %c0_i32_0 : i32
    scf.if %2 {
      %c0_85 = arith.constant 0 : index
      %c0_86 = arith.constant 0 : index
      %171 = vector.load %arg1[%c0_85, %c0_86] : memref<16x16xf32, #tpu.memory_space<vmem>>, vector<16x16xf32>
      %c0_87 = arith.constant 0 : index
      %c0_88 = arith.constant 0 : index
      %172 = vector.load %arg2[%c0_87, %c0_88] : memref<16x128xf32, #tpu.memory_space<vmem>>, vector<16x128xf32>
      %cst_89 = arith.constant dense<0.000000e+00> : vector<16x128xf32>
      %173 = tpu.matmul %171, %172, %cst_89 {dimension_numbers = #tpu.dot_dimension_numbers<[1], [0], [0], [1], [0, 0, 1, 1], [], []>} : vector<16x16xf32>, vector<16x128xf32>, vector<16x128xf32> -> vector<16x128xf32>
      %c0_90 = arith.constant 0 : index
      %c0_91 = arith.constant 0 : index
      %174 = vector.load %arg3[%c0_90, %c0_91] : memref<1x128xf32, #tpu.memory_space<vmem>>, vector<1x128xf32>
      %175 = vector.broadcast %174 : vector<1x128xf32> to vector<16x128xf32>
      %176 = arith.addf %173, %175 : vector<16x128xf32>
      %c0_92 = arith.constant 0 : index
      %c0_93 = arith.constant 0 : index
      %177 = vector.load %arg16[%c0_92, %c0_93] : memref<16x128xf32, #tpu.memory_space<vmem>>, vector<16x128xf32>
      tpu.vector_store %arg16[%c0_92, %c0_93], %176 {strides = array<i32>} : memref<16x128xf32, #tpu.memory_space<vmem>>, vector<16x128xf32>,
    } else {
    }
    %c0 = arith.constant 0 : index
    %c0_1 = arith.constant 0 : index
    %3 = vector.load %arg16[%c0, %c0_1] : memref<16x128xf32, #tpu.memory_space<vmem>>, vector<16x128xf32>
    %4 = arith.truncf %3 : vector<16x128xf32> to vector<16x128xbf16>
    %c0_2 = arith.constant 0 : index
    %c0_3 = arith.constant 0 : index
    %c0_4 = arith.constant 0 : index
    %5 = vector.load %arg4[%c0_2, %c0_3, %c0_4] : memref<1x128x384xbf16, #tpu.memory_space<vmem>>, vector<1x128x384xbf16>
    %6 = vector.shape_cast %5 : vector<1x128x384xbf16> to vector<128x384xbf16>
    %cst = arith.constant dense<0.000000e+00> : vector<16x384xf32>
    %7 = tpu.matmul %4, %6, %cst {dimension_numbers = #tpu.dot_dimension_numbers<[1], [0], [0], [1], [0, 0, 1, 1], [], []>} : vector<16x128xbf16>, vector<128x384xbf16>, vector<16x384xf32> -> vector<16x384xf32>
    %c0_5 = arith.constant 0 : index
    %c0_6 = arith.constant 0 : index
    %c0_7 = arith.constant 0 : index
    %8 = vector.load %arg5[%c0_5, %c0_6, %c0_7] : memref<1x1x384xf32, #tpu.memory_space<vmem>>, vector<1x1x384xf32>
    %9 = vector.shape_cast %8 : vector<1x1x384xf32> to vector<1x384xf32>
    %10 = vector.broadcast %9 : vector<1x384xf32> to vector<16x384xf32>
    %11 = arith.addf %7, %10 : vector<16x384xf32>
    %12 = vector.extract_strided_slice %11 {offsets = [0, 0], sizes = [16, 128], strides = [1, 1]} : vector<16x384xf32> to vector<16x128xf32>
    %cst_8 = arith.constant 0.176776692 : f32
    %13 = vector.broadcast %cst_8 : f32 to vector<16x128xf32>
    %14 = arith.mulf %12, %13 : vector<16x128xf32>
    %15 = vector.extract_strided_slice %11 {offsets = [0, 128], sizes = [16, 128], strides = [1, 1]} : vector<16x384xf32> to vector<16x128xf32>
    %16 = vector.extract_strided_slice %11 {offsets = [0, 256], sizes = [16, 128], strides = [1, 1]} : vector<16x384xf32> to vector<16x128xf32>
    %17 = vector.shape_cast %14 : vector<16x128xf32> to vector<2x8x4x32xf32>
    %18 = tpu.transpose %17, [0, 2, 1, 3] : vector<2x8x4x32xf32> -> vector<2x4x8x32xf32>
    %19 = vector.shape_cast %18 : vector<2x4x8x32xf32> to vector<8x8x32xf32>
    %20 = vector.shape_cast %15 : vector<16x128xf32> to vector<2x8x4x32xf32>
    %21 = tpu.transpose %20, [0, 2, 1, 3] : vector<2x8x4x32xf32> -> vector<2x4x8x32xf32>
    %22 = vector.shape_cast %21 : vector<2x4x8x32xf32> to vector<8x8x32xf32>
    %23 = vector.shape_cast %16 : vector<16x128xf32> to vector<2x8x4x32xf32>
    %24 = tpu.transpose %23, [0, 2, 1, 3] : vector<2x8x4x32xf32> -> vector<2x4x8x32xf32>
    %25 = vector.shape_cast %24 : vector<2x4x8x32xf32> to vector<8x8x32xf32>
    %26 = arith.truncf %19 : vector<8x8x32xf32> to vector<8x8x32xbf16>
    %27 = arith.truncf %22 : vector<8x8x32xf32> to vector<8x8x32xbf16>
    "tpu.trace_start"() <{level = 10 : i32, message = "nqd,nkd->nqk"}> : () -> ()
    %cst_9 = arith.constant dense<0.000000e+00> : vector<8x8x8xf32>
    %28 = tpu.matmul %26, %27, %cst_9 {dimension_numbers = #tpu.dot_dimension_numbers<[2], [2], [1], [1], [0, 0, 0, 1, 1, 1], [0], [0]>} : vector<8x8x32xbf16>, vector<8x8x32xbf16>, vector<8x8x8xf32> -> vector<8x8x8xf32>
    "tpu.trace_stop"() : () -> ()
    %cst_10 = arith.constant dense<0xFF800000> : vector<8x8xf32>
    %29 = vector.multi_reduction <maximumf>, %28, %cst_10 [2] : vector<8x8x8xf32> to vector<8x8xf32>
    %30 = vector.shape_cast %29 : vector<8x8xf32> to vector<8x8x1xf32>
    %31 = vector.broadcast %30 : vector<8x8x1xf32> to vector<8x8x8xf32>
    %32 = arith.subf %28, %31 : vector<8x8x8xf32>
    %33 = math.exp %32 : vector<8x8x8xf32>
    %cst_11 = arith.constant dense<0.000000e+00> : vector<8x8xf32>
    %34 = vector.multi_reduction <add>, %33, %cst_11 [2] : vector<8x8x8xf32> to vector<8x8xf32>
    %35 = vector.shape_cast %34 : vector<8x8xf32> to vector<8x8x1xf32>
    %36 = tpu.reciprocal %35 {approx = true} : vector<8x8x1xf32> -> vector<8x8x1xf32>
    %37 = vector.broadcast %36 : vector<8x8x1xf32> to vector<8x8x8xf32>
    %38 = arith.mulf %33, %37 : vector<8x8x8xf32>
    %39 = arith.truncf %38 : vector<8x8x8xf32> to vector<8x8x8xbf16>
    %40 = arith.truncf %25 : vector<8x8x32xf32> to vector<8x8x32xbf16>
    "tpu.trace_start"() <{level = 10 : i32, message = "nqk,nkd->nqd"}> : () -> ()
    %cst_12 = arith.constant dense<0.000000e+00> : vector<8x8x32xf32>
    %41 = tpu.matmul %39, %40, %cst_12 {dimension_numbers = #tpu.dot_dimension_numbers<[2], [1], [1], [2], [0, 0, 0, 1, 1, 2], [0], [0]>} : vector<8x8x8xbf16>, vector<8x8x32xbf16>, vector<8x8x32xf32> -> vector<8x8x32xf32>
    "tpu.trace_stop"() : () -> ()
    %42 = vector.shape_cast %41 : vector<8x8x32xf32> to vector<2x4x8x32xf32>
    %43 = tpu.transpose %42, [0, 2, 1, 3] : vector<2x4x8x32xf32> -> vector<2x8x4x32xf32>
    %44 = vector.shape_cast %43 : vector<2x8x4x32xf32> to vector<16x128xf32>
    %45 = arith.truncf %44 : vector<16x128xf32> to vector<16x128xbf16>
    %c0_13 = arith.constant 0 : index
    %c0_14 = arith.constant 0 : index
    %c0_15 = arith.constant 0 : index
    %46 = vector.load %arg6[%c0_13, %c0_14, %c0_15] : memref<1x128x128xbf16, #tpu.memory_space<vmem>>, vector<1x128x128xbf16>
    %47 = vector.shape_cast %46 : vector<1x128x128xbf16> to vector<128x128xbf16>
    %cst_16 = arith.constant dense<0.000000e+00> : vector<16x128xf32>
    %48 = tpu.matmul %45, %47, %cst_16 {dimension_numbers = #tpu.dot_dimension_numbers<[1], [0], [0], [1], [0, 0, 1, 1], [], []>} : vector<16x128xbf16>, vector<128x128xbf16>, vector<16x128xf32> -> vector<16x128xf32>
    %c0_17 = arith.constant 0 : index
    %c0_18 = arith.constant 0 : index
    %c0_19 = arith.constant 0 : index
    %49 = vector.load %arg7[%c0_17, %c0_18, %c0_19] : memref<1x1x128xf32, #tpu.memory_space<vmem>>, vector<1x1x128xf32>
    %50 = vector.shape_cast %49 : vector<1x1x128xf32> to vector<1x128xf32>
    %51 = vector.broadcast %50 : vector<1x128xf32> to vector<16x128xf32>
    %52 = arith.addf %48, %51 : vector<16x128xf32>
    %c0_20 = arith.constant 0 : index
    %c0_21 = arith.constant 0 : index
    %c0_22 = arith.constant 0 : index
    %53 = vector.load %arg12[%c0_20, %c0_21, %c0_22] : memref<1x4x128xf32, #tpu.memory_space<vmem>>, vector<1x4x128xf32>
    %54 = vector.shape_cast %53 : vector<1x4x128xf32> to vector<4x128xf32>
    %55 = vector.extract_strided_slice %54 {offsets = [0, 0], sizes = [1, 128], strides = [1, 1]} : vector<4x128xf32> to vector<1x128xf32>
    %56 = vector.extract_strided_slice %54 {offsets = [1, 0], sizes = [1, 128], strides = [1, 1]} : vector<4x128xf32> to vector<1x128xf32>
    %57 = vector.extract_strided_slice %54 {offsets = [2, 0], sizes = [1, 128], strides = [1, 1]} : vector<4x128xf32> to vector<1x128xf32>
    %58 = vector.extract_strided_slice %54 {offsets = [3, 0], sizes = [1, 128], strides = [1, 1]} : vector<4x128xf32> to vector<1x128xf32>
    %59 = arith.addf %3, %52 : vector<16x128xf32>
    %cst_23 = arith.constant dense<0.000000e+00> : vector<16xf32>
    %60 = vector.multi_reduction <add>, %59, %cst_23 [1] : vector<16x128xf32> to vector<16xf32>
    %61 = vector.shape_cast %60 : vector<16xf32> to vector<16x1xf32>
    %cst_24 = arith.constant 1.280000e+02 : f32
    %62 = vector.broadcast %cst_24 : f32 to vector<16x1xf32>
    %63 = arith.divf %61, %62 : vector<16x1xf32>
    %64 = vector.broadcast %63 : vector<16x1xf32> to vector<16x128xf32>
    %65 = arith.subf %59, %64 : vector<16x128xf32>
    %66 = arith.mulf %65, %65 : vector<16x128xf32>
    %cst_25 = arith.constant dense<0.000000e+00> : vector<16xf32>
    %67 = vector.multi_reduction <add>, %66, %cst_25 [1] : vector<16x128xf32> to vector<16xf32>
    %68 = vector.shape_cast %67 : vector<16xf32> to vector<16x1xf32>
    %cst_26 = arith.constant 1.280000e+02 : f32
    %69 = vector.broadcast %cst_26 : f32 to vector<16x1xf32>
    %70 = arith.divf %68, %69 : vector<16x1xf32>
    %71 = vector.broadcast %63 : vector<16x1xf32> to vector<16x128xf32>
    %72 = arith.subf %59, %71 : vector<16x128xf32>
    %cst_27 = arith.constant 9.99999974E-6 : f32
    %73 = vector.broadcast %cst_27 : f32 to vector<16x1xf32>
    %74 = arith.addf %70, %73 : vector<16x1xf32>
    %75 = math.rsqrt %74 : vector<16x1xf32>
    %76 = vector.broadcast %75 : vector<16x1xf32> to vector<16x128xf32>
    %77 = arith.mulf %72, %76 : vector<16x128xf32>
    %78 = vector.broadcast %55 : vector<1x128xf32> to vector<16x128xf32>
    %79 = arith.mulf %77, %78 : vector<16x128xf32>
    %80 = vector.broadcast %56 : vector<1x128xf32> to vector<16x128xf32>
    %81 = arith.addf %79, %80 : vector<16x128xf32>
    %82 = arith.truncf %81 : vector<16x128xf32> to vector<16x128xbf16>
    %cst_28 = arith.constant 0.000000e+00 : f32
    %83 = vector.broadcast %cst_28 : f32 to vector<16x128xf32>
    %c0_29 = arith.constant 0 : index
    %c0_30 = arith.constant 0 : index
    %c0_31 = arith.constant 0 : index
    %84 = vector.load %arg11[%c0_29, %c0_30, %c0_31] : memref<1x1x128xf32, #tpu.memory_space<vmem>>, vector<1x1x128xf32>
    %85 = vector.shape_cast %84 : vector<1x1x128xf32> to vector<1x128xf32>
    %86 = vector.broadcast %85 : vector<1x128xf32> to vector<16x128xf32>
    %87 = arith.addf %83, %86 : vector<16x128xf32>
    %c0_32 = arith.constant 0 : index
    %c0_33 = arith.constant 0 : index
    %c0_34 = arith.constant 0 : index
    %88 = vector.load %arg8[%c0_32, %c0_33, %c0_34] : memref<1x128x2048xbf16, #tpu.memory_space<vmem>>, vector<1x128x512xbf16>
    %89 = vector.shape_cast %88 : vector<1x128x512xbf16> to vector<128x512xbf16>
    %cst_35 = arith.constant dense<0.000000e+00> : vector<16x512xf32>
    %90 = tpu.matmul %82, %89, %cst_35 {dimension_numbers = #tpu.dot_dimension_numbers<[1], [0], [0], [1], [0, 0, 1, 1], [], []>} : vector<16x128xbf16>, vector<128x512xbf16>, vector<16x512xf32> -> vector<16x512xf32>
    %c0_36 = arith.constant 0 : index
    %c0_37 = arith.constant 0 : index
    %c0_38 = arith.constant 0 : index
    %91 = vector.load %arg9[%c0_36, %c0_37, %c0_38] : memref<1x1x2048xf32, #tpu.memory_space<vmem>>, vector<1x1x512xf32>
    %92 = vector.shape_cast %91 : vector<1x1x512xf32> to vector<1x512xf32>
    %93 = vector.broadcast %92 : vector<1x512xf32> to vector<16x512xf32>
    %94 = arith.addf %90, %93 : vector<16x512xf32>
    %cst_39 = arith.constant 0.000000e+00 : f32
    %95 = vector.broadcast %cst_39 : f32 to vector<16x512xf32>
    %96 = arith.maximumf %94, %95 : vector<16x512xf32>
    %97 = arith.truncf %96 : vector<16x512xf32> to vector<16x512xbf16>
    %c0_40 = arith.constant 0 : index
    %c0_41 = arith.constant 0 : index
    %c0_42 = arith.constant 0 : index
    %98 = vector.load %arg10[%c0_40, %c0_41, %c0_42] : memref<1x2048x128xbf16, #tpu.memory_space<vmem>>, vector<1x512x128xbf16>
    %99 = vector.shape_cast %98 : vector<1x512x128xbf16> to vector<512x128xbf16>
    %cst_43 = arith.constant dense<0.000000e+00> : vector<16x128xf32>
    %100 = tpu.matmul %97, %99, %cst_43 {dimension_numbers = #tpu.dot_dimension_numbers<[1], [0], [0], [1], [0, 0, 1, 1], [], []>} : vector<16x512xbf16>, vector<512x128xbf16>, vector<16x128xf32> -> vector<16x128xf32>
    %101 = arith.addf %87, %100 : vector<16x128xf32>
    %c0_44 = arith.constant 0 : index
    %c0_45 = arith.constant 0 : index
    %c512 = arith.constant 512 : index
    %102 = vector.load %arg8[%c0_44, %c0_45, %c512] : memref<1x128x2048xbf16, #tpu.memory_space<vmem>>, vector<1x128x512xbf16>
    %103 = vector.shape_cast %102 : vector<1x128x512xbf16> to vector<128x512xbf16>
    %cst_46 = arith.constant dense<0.000000e+00> : vector<16x512xf32>
    %104 = tpu.matmul %82, %103, %cst_46 {dimension_numbers = #tpu.dot_dimension_numbers<[1], [0], [0], [1], [0, 0, 1, 1], [], []>} : vector<16x128xbf16>, vector<128x512xbf16>, vector<16x512xf32> -> vector<16x512xf32>
    %c0_47 = arith.constant 0 : index
    %c0_48 = arith.constant 0 : index
    %c512_49 = arith.constant 512 : index
    %105 = vector.load %arg9[%c0_47, %c0_48, %c512_49] : memref<1x1x2048xf32, #tpu.memory_space<vmem>>, vector<1x1x512xf32>
    %106 = vector.shape_cast %105 : vector<1x1x512xf32> to vector<1x512xf32>
    %107 = vector.broadcast %106 : vector<1x512xf32> to vector<16x512xf32>
    %108 = arith.addf %104, %107 : vector<16x512xf32>
    %cst_50 = arith.constant 0.000000e+00 : f32
    %109 = vector.broadcast %cst_50 : f32 to vector<16x512xf32>
    %110 = arith.maximumf %108, %109 : vector<16x512xf32>
    %111 = arith.truncf %110 : vector<16x512xf32> to vector<16x512xbf16>
    %c0_51 = arith.constant 0 : index
    %c512_52 = arith.constant 512 : index
    %c0_53 = arith.constant 0 : index
    %112 = vector.load %arg10[%c0_51, %c512_52, %c0_53] : memref<1x2048x128xbf16, #tpu.memory_space<vmem>>, vector<1x512x128xbf16>
    %113 = vector.shape_cast %112 : vector<1x512x128xbf16> to vector<512x128xbf16>
    %cst_54 = arith.constant dense<0.000000e+00> : vector<16x128xf32>
    %114 = tpu.matmul %111, %113, %cst_54 {dimension_numbers = #tpu.dot_dimension_numbers<[1], [0], [0], [1], [0, 0, 1, 1], [], []>} : vector<16x512xbf16>, vector<512x128xbf16>, vector<16x128xf32> -> vector<16x128xf32>
    %115 = arith.addf %101, %114 : vector<16x128xf32>
    %c0_55 = arith.constant 0 : index
    %c0_56 = arith.constant 0 : index
    %c1024 = arith.constant 1024 : index
    %116 = vector.load %arg8[%c0_55, %c0_56, %c1024] : memref<1x128x2048xbf16, #tpu.memory_space<vmem>>, vector<1x128x512xbf16>
    %117 = vector.shape_cast %116 : vector<1x128x512xbf16> to vector<128x512xbf16>
    %cst_57 = arith.constant dense<0.000000e+00> : vector<16x512xf32>
    %118 = tpu.matmul %82, %117, %cst_57 {dimension_numbers = #tpu.dot_dimension_numbers<[1], [0], [0], [1], [0, 0, 1, 1], [], []>} : vector<16x128xbf16>, vector<128x512xbf16>, vector<16x512xf32> -> vector<16x512xf32>
    %c0_58 = arith.constant 0 : index
    %c0_59 = arith.constant 0 : index
    %c1024_60 = arith.constant 1024 : index
    %119 = vector.load %arg9[%c0_58, %c0_59, %c1024_60] : memref<1x1x2048xf32, #tpu.memory_space<vmem>>, vector<1x1x512xf32>
    %120 = vector.shape_cast %119 : vector<1x1x512xf32> to vector<1x512xf32>
    %121 = vector.broadcast %120 : vector<1x512xf32> to vector<16x512xf32>
    %122 = arith.addf %118, %121 : vector<16x512xf32>
    %cst_61 = arith.constant 0.000000e+00 : f32
    %123 = vector.broadcast %cst_61 : f32 to vector<16x512xf32>
    %124 = arith.maximumf %122, %123 : vector<16x512xf32>
    %125 = arith.truncf %124 : vector<16x512xf32> to vector<16x512xbf16>
    %c0_62 = arith.constant 0 : index
    %c1024_63 = arith.constant 1024 : index
    %c0_64 = arith.constant 0 : index
    %126 = vector.load %arg10[%c0_62, %c1024_63, %c0_64] : memref<1x2048x128xbf16, #tpu.memory_space<vmem>>, vector<1x512x128xbf16>
    %127 = vector.shape_cast %126 : vector<1x512x128xbf16> to vector<512x128xbf16>
    %cst_65 = arith.constant dense<0.000000e+00> : vector<16x128xf32>
    %128 = tpu.matmul %125, %127, %cst_65 {dimension_numbers = #tpu.dot_dimension_numbers<[1], [0], [0], [1], [0, 0, 1, 1], [], []>} : vector<16x512xbf16>, vector<512x128xbf16>, vector<16x128xf32> -> vector<16x128xf32>
    %129 = arith.addf %115, %128 : vector<16x128xf32>
    %c0_66 = arith.constant 0 : index
    %c0_67 = arith.constant 0 : index
    %c1536 = arith.constant 1536 : index
    %130 = vector.load %arg8[%c0_66, %c0_67, %c1536] : memref<1x128x2048xbf16, #tpu.memory_space<vmem>>, vector<1x128x512xbf16>
    %131 = vector.shape_cast %130 : vector<1x128x512xbf16> to vector<128x512xbf16>
    %cst_68 = arith.constant dense<0.000000e+00> : vector<16x512xf32>
    %132 = tpu.matmul %82, %131, %cst_68 {dimension_numbers = #tpu.dot_dimension_numbers<[1], [0], [0], [1], [0, 0, 1, 1], [], []>} : vector<16x128xbf16>, vector<128x512xbf16>, vector<16x512xf32> -> vector<16x512xf32>
    %c0_69 = arith.constant 0 : index
    %c0_70 = arith.constant 0 : index
    %c1536_71 = arith.constant 1536 : index
    %133 = vector.load %arg9[%c0_69, %c0_70, %c1536_71] : memref<1x1x2048xf32, #tpu.memory_space<vmem>>, vector<1x1x512xf32>
    %134 = vector.shape_cast %133 : vector<1x1x512xf32> to vector<1x512xf32>
    %135 = vector.broadcast %134 : vector<1x512xf32> to vector<16x512xf32>
    %136 = arith.addf %132, %135 : vector<16x512xf32>
    %cst_72 = arith.constant 0.000000e+00 : f32
    %137 = vector.broadcast %cst_72 : f32 to vector<16x512xf32>
    %138 = arith.maximumf %136, %137 : vector<16x512xf32>
    %139 = arith.truncf %138 : vector<16x512xf32> to vector<16x512xbf16>
    %c0_73 = arith.constant 0 : index
    %c1536_74 = arith.constant 1536 : index
    %c0_75 = arith.constant 0 : index
    %140 = vector.load %arg10[%c0_73, %c1536_74, %c0_75] : memref<1x2048x128xbf16, #tpu.memory_space<vmem>>, vector<1x512x128xbf16>
    %141 = vector.shape_cast %140 : vector<1x512x128xbf16> to vector<512x128xbf16>
    %cst_76 = arith.constant dense<0.000000e+00> : vector<16x128xf32>
    %142 = tpu.matmul %139, %141, %cst_76 {dimension_numbers = #tpu.dot_dimension_numbers<[1], [0], [0], [1], [0, 0, 1, 1], [], []>} : vector<16x512xbf16>, vector<512x128xbf16>, vector<16x128xf32> -> vector<16x128xf32>
    %143 = arith.addf %129, %142 : vector<16x128xf32>
    %144 = arith.addf %81, %143 : vector<16x128xf32>
    %cst_77 = arith.constant dense<0.000000e+00> : vector<16xf32>
    %145 = vector.multi_reduction <add>, %144, %cst_77 [1] : vector<16x128xf32> to vector<16xf32>
    %146 = vector.shape_cast %145 : vector<16xf32> to vector<16x1xf32>
    %cst_78 = arith.constant 1.280000e+02 : f32
    %147 = vector.broadcast %cst_78 : f32 to vector<16x1xf32>
    %148 = arith.divf %146, %147 : vector<16x1xf32>
    %149 = vector.broadcast %148 : vector<16x1xf32> to vector<16x128xf32>
    %150 = arith.subf %144, %149 : vector<16x128xf32>
    %151 = arith.mulf %150, %150 : vector<16x128xf32>
    %cst_79 = arith.constant dense<0.000000e+00> : vector<16xf32>
    %152 = vector.multi_reduction <add>, %151, %cst_79 [1] : vector<16x128xf32> to vector<16xf32>
    %153 = vector.shape_cast %152 : vector<16xf32> to vector<16x1xf32>
    %cst_80 = arith.constant 1.280000e+02 : f32
    %154 = vector.broadcast %cst_80 : f32 to vector<16x1xf32>
    %155 = arith.divf %153, %154 : vector<16x1xf32>
    %156 = vector.broadcast %148 : vector<16x1xf32> to vector<16x128xf32>
    %157 = arith.subf %144, %156 : vector<16x128xf32>
    %cst_81 = arith.constant 9.99999974E-6 : f32
    %158 = vector.broadcast %cst_81 : f32 to vector<16x1xf32>
    %159 = arith.addf %155, %158 : vector<16x1xf32>
    %160 = math.rsqrt %159 : vector<16x1xf32>
    %161 = vector.broadcast %160 : vector<16x1xf32> to vector<16x128xf32>
    %162 = arith.mulf %157, %161 : vector<16x128xf32>
    %163 = vector.broadcast %57 : vector<1x128xf32> to vector<16x128xf32>
    %164 = arith.mulf %162, %163 : vector<16x128xf32>
    %165 = vector.broadcast %58 : vector<1x128xf32> to vector<16x128xf32>
    %166 = arith.addf %164, %165 : vector<16x128xf32>
    %c0_82 = arith.constant 0 : index
    %c0_83 = arith.constant 0 : index
    %167 = vector.load %arg16[%c0_82, %c0_83] : memref<16x128xf32, #tpu.memory_space<vmem>>, vector<16x128xf32>
    tpu.vector_store %arg16[%c0_82, %c0_83], %166 {strides = array<i32>} : memref<16x128xf32, #tpu.memory_space<vmem>>, vector<16x128xf32>,
    %c1_i32 = arith.constant 1 : i32
    %168 = arith.cmpi eq, %arg0, %c1_i32 : i32
    %169 = arith.extui %168 : i1 to i32
    %c0_i32_84 = arith.constant 0 : i32
    %170 = arith.cmpi ne, %169, %c0_i32_84 : i32
    scf.if %170 {
      %c0_85 = arith.constant 0 : index
      %c0_86 = arith.constant 0 : index
      %171 = vector.load %arg16[%c0_85, %c0_86] : memref<16x128xf32, #tpu.memory_space<vmem>>, vector<16x128xf32>
      %172 = vector.shape_cast %171 : vector<16x128xf32> to vector<2x8x128xf32>
      %173 = vector.extract_strided_slice %172 {offsets = [0, 7, 0], sizes = [2, 1, 128], strides = [1, 1, 1]} : vector<2x8x128xf32> to vector<2x1x128xf32>
      %174 = vector.shape_cast %173 : vector<2x1x128xf32> to vector<2x128xf32>
      %c0_87 = arith.constant 0 : index
      %c0_88 = arith.constant 0 : index
      %175 = vector.load %arg13[%c0_87, %c0_88] : memref<1x128xf32, #tpu.memory_space<vmem>>, vector<1x128xf32>
      %176 = vector.broadcast %175 : vector<1x128xf32> to vector<2x128xf32>
      %177 = arith.mulf %174, %176 : vector<2x128xf32>
      %cst_89 = arith.constant dense<0.000000e+00> : vector<2xf32>
      %178 = vector.multi_reduction <add>, %177, %cst_89 [1] : vector<2x128xf32> to vector<2xf32>
      %179 = vector.shape_cast %178 : vector<2xf32> to vector<2x1xf32>
      %c0_90 = arith.constant 0 : index
      %c0_91 = arith.constant 0 : index
      %180 = vector.load %arg14[%c0_90, %c0_91] : memref<1x1xf32, #tpu.memory_space<vmem>>, vector<1x1xf32>
      %181 = vector.broadcast %180 : vector<1x1xf32> to vector<2x1xf32>
      %182 = arith.addf %179, %181 : vector<2x1xf32>
      %cst_92 = arith.constant 0.000000e+00 : f32
      %183 = vector.broadcast %cst_92 : f32 to vector<2x1xf32>
      %184 = arith.subf %183, %182 : vector<2x1xf32>
      %185 = math.exp %184 : vector<2x1xf32>
      %cst_93 = arith.constant 1.000000e+00 : f32
      %186 = vector.broadcast %cst_93 : f32 to vector<2x1xf32>
      %187 = arith.addf %186, %185 : vector<2x1xf32>
      %cst_94 = arith.constant 1.000000e+00 : f32
      %188 = vector.broadcast %cst_94 : f32 to vector<2x1xf32>
      %189 = arith.divf %188, %187 : vector<2x1xf32>
      %c0_95 = arith.constant 0 : index
      %c0_96 = arith.constant 0 : index
      %190 = vector.load %arg15[%c0_95, %c0_96] : memref<2x1xf32, #tpu.memory_space<vmem>>, vector<2x1xf32>
      tpu.vector_store %arg15[%c0_95, %c0_96], %189 {strides = array<i32>} : memref<2x1xf32, #tpu.memory_space<vmem>>, vector<2x1xf32>,
    } else {
    }
    return
  }
  func.func @transform_0(%arg0: i32) -> (i32, i32) {
    %c0_i32 = arith.constant 0 : i32
    %c0_i32_0 = arith.constant 0 : i32
    %c0_i32_1 = arith.constant 0 : i32
    return %c0_i32, %c0_i32_0 : i32, i32
  }
  func.func @transform_1(%arg0: i32) -> (i32, i32) {
    %c0_i32 = arith.constant 0 : i32
    %c0_i32_0 = arith.constant 0 : i32
    %c0_i32_1 = arith.constant 0 : i32
    return %c0_i32, %c0_i32_0 : i32, i32
  }
  func.func @transform_2(%arg0: i32) -> (i32, i32) {
    %c0_i32 = arith.constant 0 : i32
    %c0_i32_0 = arith.constant 0 : i32
    %c0_i32_1 = arith.constant 0 : i32
    return %c0_i32, %c0_i32_0 : i32, i32
  }
  func.func @transform_3(%arg0: i32) -> (i32, i32, i32) {
    %c0_i32 = arith.constant 0 : i32
    %c0_i32_0 = arith.constant 0 : i32
    %c0_i32_1 = arith.constant 0 : i32
    return %arg0, %c0_i32, %c0_i32_0 : i32, i32, i32
  }
  func.func @transform_4(%arg0: i32) -> (i32, i32, i32) {
    %c0_i32 = arith.constant 0 : i32
    %c0_i32_0 = arith.constant 0 : i32
    %c0_i32_1 = arith.constant 0 : i32
    return %arg0, %c0_i32, %c0_i32_0 : i32, i32, i32
  }
  func.func @transform_5(%arg0: i32) -> (i32, i32, i32) {
    %c0_i32 = arith.constant 0 : i32
    %c0_i32_0 = arith.constant 0 : i32
    %c0_i32_1 = arith.constant 0 : i32
    return %arg0, %c0_i32, %c0_i32_0 : i32, i32, i32
  }
  func.func @transform_6(%arg0: i32) -> (i32, i32, i32) {
    %c0_i32 = arith.constant 0 : i32
    %c0_i32_0 = arith.constant 0 : i32
    %c0_i32_1 = arith.constant 0 : i32
    return %arg0, %c0_i32, %c0_i32_0 : i32, i32, i32
  }
  func.func @transform_7(%arg0: i32) -> (i32, i32, i32) {
    %c0_i32 = arith.constant 0 : i32
    %c0_i32_0 = arith.constant 0 : i32
    %c0_i32_1 = arith.constant 0 : i32
    return %arg0, %c0_i32, %c0_i32_0 : i32, i32, i32
  }
  func.func @transform_8(%arg0: i32) -> (i32, i32, i32) {
    %c0_i32 = arith.constant 0 : i32
    %c0_i32_0 = arith.constant 0 : i32
    %c0_i32_1 = arith.constant 0 : i32
    return %arg0, %c0_i32, %c0_i32_0 : i32, i32, i32
  }
  func.func @transform_9(%arg0: i32) -> (i32, i32, i32) {
    %c0_i32 = arith.constant 0 : i32
    %c0_i32_0 = arith.constant 0 : i32
    %c0_i32_1 = arith.constant 0 : i32
    return %arg0, %c0_i32, %c0_i32_0 : i32, i32, i32
  }
  func.func @transform_10(%arg0: i32) -> (i32, i32, i32) {
    %c0_i32 = arith.constant 0 : i32
    %c0_i32_0 = arith.constant 0 : i32
    %c0_i32_1 = arith.constant 0 : i32
    return %arg0, %c0_i32, %c0_i32_0 : i32, i32, i32
  }
  func.func @transform_11(%arg0: i32) -> (i32, i32, i32) {
    %c0_i32 = arith.constant 0 : i32
    %c0_i32_0 = arith.constant 0 : i32
    %c0_i32_1 = arith.constant 0 : i32
    return %arg0, %c0_i32, %c0_i32_0 : i32, i32, i32
  }
  func.func @transform_12(%arg0: i32) -> (i32, i32) {
    %c0_i32 = arith.constant 0 : i32
    %c0_i32_0 = arith.constant 0 : i32
    %c0_i32_1 = arith.constant 0 : i32
    return %c0_i32, %c0_i32_0 : i32, i32
  }
  func.func @transform_13(%arg0: i32) -> (i32, i32) {
    %c0_i32 = arith.constant 0 : i32
    %c0_i32_0 = arith.constant 0 : i32
    %c0_i32_1 = arith.constant 0 : i32
    return %c0_i32, %c0_i32_0 : i32, i32
  }
  func.func @transform_14(%arg0: i32) -> (i32, i32) {
    %c0_i32 = arith.constant 0 : i32
    %c0_i32_0 = arith.constant 0 : i32
    %c0_i32_1 = arith.constant 0 : i32
    return %c0_i32, %c0_i32_0 : i32, i32
  }
}

</mosaic_0001>

<bundles_post_ra>
// kernel: bot_request_transformer_forward.1
= control target key start
LH: loop header
LB: loop body
LE: loop exit
PB: predicated region body
PF: predicated region fallthrough
CT: control target
= control target key end

     0   :  { %s9131_s0 = inlined_call_operand.hbm [shape: f32[16,16], index: 0, kind: input, shape index: {}]   ;;  %s9132_s1 = inlined_call_operand.vmem [shape: f32[16,128], index: 1, kind: input, shape index: {}]   ;;  %s9133_s2 = inlined_call_operand.hbm [shape: f32[1,128], index: 2, kind: input, shape index: {}]   ;;  %s9134_s3 = inlined_call_operand.hbm [shape: bf16[2,128,384], index: 3, kind: input, shape index: {}]   ;;  %s9135_s4 = inlined_call_operand.hbm [shape: f32[2,1,384], index: 4, kind: input, shape index: {}]   ;;  %s9136_s5 = inlined_call_operand.hbm [shape: bf16[2,128,128], index: 5, kind: input, shape index: {}]   ;;  %s9137_s6 = inlined_call_operand.hbm [shape: f32[2,1,128], index: 6, kind: input, shape index: {}]   ;;  %s9138_s7 = inlined_call_operand.hbm [shape: bf16[2,128,2048], index: 7, kind: input, shape index: {}]   ;;  %s9139_s8 = inlined_call_operand.hbm [shape: f32[2,1,2048], index: 8, kind: input, shape index: {}]   ;;  %s9140_s9 = inlined_call_operand.hbm [shape: bf16[2,2048,128], index: 9, kind: input, shape index: {}]   ;;  %s9141_s10 = inlined_call_operand.hbm [shape: f32[2,1,128], index: 10, kind: input, shape index: {}]   ;;  %s9142_s11 = inlined_call_operand.hbm [shape: f32[2,4,128], index: 11, kind: input, shape index: {}]   ;;  %s9143_s12 = inlined_call_operand.hbm [shape: f32[1,128], index: 12, kind: input, shape index: {}]   ;;  %s9144_s13 = inlined_call_operand.<no memory space> [shape: f32[1,1], index: 13, kind: input, shape index: {}]   ;;  %s9145_s14 = inlined_call_operand.vmem [shape: f32[2,1], index: 14, kind: output, shape index: {}]  }
   0x1   :  { %9167 = sst [smem:[#allocation29_spill]] %s9131_s0  ;;  %v19_v0 = vstv %s9144_s13 }
   0x2   :  { %9168 = sst [smem:[#allocation30_spill]] %s9132_s1  ;;  %20 = vst [vmem:[#allocation3] sm:$0x1] %v19_v0 }
   0x3   :  { %9169 = sst [smem:[#allocation31_spill]] %s9134_s3 }
   0x4   :  { %9170 = sst [smem:[#allocation32_spill]] %s9142_s11 }
   0x5   :  { %9171 = sst [smem:[#allocation33_spill]] %s9145_s14 }
   0x6   :  { %21 = vsyncpa [#allocation5], 0 }
   0x7   :  { %22 = vsyncpa [#allocation7], 0  ;;  %s7863_s15 = smov 0   ;;  %s7865_s16 = smov 0  }
   0x8   :  { %s7867_s17 = smov 0   ;;  %s7869_s18 = smov 0  }
   0x9 LB: > { %9172 = sst [smem:[#allocation22_spill]] %s7748_s16  ;;  %s7882_s13 = sadd.s32 4294967295, %s7756_s18   ;;  %s7756_s18 = sphi %s7869_s18, %s9210_s18   ;;  %s7752_s17 = sphi %s7867_s17, %s9213_s17   ;;  %s7748_s16 = sphi %s7865_s16, %s9212_s16   ;;  %s7744_s15 = sphi %s7863_s15, %s9211_s15  }
   0xa   : > { %9173 = sst [smem:[#allocation23_spill]] %s7752_s17  ;;  %s7885_s19 = sadd.s32 1, %s7756_s18  }
   0xb   : > { %9174 = sst [smem:[#allocation24_spill]] %s7882_s13  ;;  %s95_s20 = ssub.s32 %s7756_s18, %s7885_s19 }
   0xc   : > { %9175 = sst [smem:[#allocation25_spill]] %s7885_s19  ;;  %s98_s21 = sadd.s32 1, %s7752_s17 }
   0xd   : > { %p96_p0 = scmp.eq.s32.totalorder %s95_s20, 0  ;;  %p105_p1 = scmp.ne.s32.totalorder %s7752_s17, %s7748_s16 }
   0xe   : > { %p106_p2 = scmp.eq.s32.totalorder %s7756_s18, 0  ;;  %p111_p3 = scmp.ne.s32.totalorder %s7748_s16, %s7744_s15 }
   0xf   : > { %s7895_s22 = scalar_select %p96_p0, %s7752_s17, %s98_s21  }
  0x10   : > { %p7897_p4 = por %p106_p2, %p105_p1  ;;  %p9146_p5 = scmp.eq.s32.totalorder %s7882_s13, 0 }
  0x11   : > { %9176 = sst [smem:[#allocation26_spill]] %s7895_s22  ;;  %p6275_p6 = scmp.ge.s32.totalorder %s7756_s18, 1 }
  0x12   : > { %p393_p7 = scmp.lt.s32.totalorder %s7756_s18, 3  ;;  %p7906_p8 = por %p9146_p5, %p111_p3 }
  0x13   : > { %s7758_s26 = smov [#allocation4]   ;;  %p7092_p13 = scmp.lt.s32.totalorder %s7756_s18, 2 }
  0x14   : > { %s9178_s24 = scalar_select %p7906_p8, 1, 0 }
  0x15   : > { %p7911_p10 = pnand %p6275_p6, %p393_p7  ;;  %s405_s27 = sshll.u32 %s7758_s26, 4  ;;  %s406_s27 = int_to_ptr.vmem [resolvable:$true] %s405_s27 }
  0x16   : > { %9179 = sst [smem:[#allocation27_spill]] %s9178_s24  ;;  %s7925_s29 = sand.u32 1, %s7752_s17  }
  0x17   : > { %s9180_s25 = scalar_select %p7911_p10, 1, 0 }
  0x18   : > { %p7051_p11 = pneg %p7911_p10  ;;  %s447_s30 = sand.u32 1, %s7756_s18  }
  0x19   : > { %9181 = sst [smem:[#allocation28_spill]] %s9180_s25  ;;  %p7930_p0 = pnand %p7092_p13, %p7897_p4 }
  0x1a   : > { %p7919_p12 = pnand %p7051_p11, %p9146_p5  ;;  %s7391_s20 = scalar_lea.vmem %s406_s27, 256 }
  0x1b   : > { %p7392_p2 = scmp.ne.s32.totalorder %s406_s27, %s7391_s20  ;;  %p7399_p7 = scmp.lt.s32.totalorder %s406_s27, %s406_s27 }
  0x1c   : > { %s9182_s28 = scalar_select %p7919_p12, 1, 0 }
  0x1d   : > { %p9159_p1 = pneg %p7919_p12  ;;  %p7400_p11 = scmp.lt.s32.totalorder %s7391_s20, %s7391_s20 }
  0x1f   : > { %p7394_p3 = pnand %p7392_p2, %p9159_p1  ;;  %p7401_p9 = por %p7400_p11, %p7399_p7 }
  0x21   : > { %p7395_p6 = pneg %p7394_p3 }
  0x23   : > { %p7402_p5 = pnand %p7401_p9, %p7395_p6 }
  0x25   : > { %7405 = shalt.err (!%p7402_p5)
}
  0x26   : > { %s7759_s21 = smov 128   ;;  %s7760_s23 = smov 8  }
  0x27   : > { %s9184_s0 = sld [smem:[#allocation29_spill]]  ;;  %s7015_s17 = smul.u32 192, %s7925_s29 }
  0x28   : > { %s7016_s19 = smul.u32 3072, %s7756_s18  ;;  %s9185_s3 = sld [smem:[#allocation31_spill]] }
  0x29   : > { %s7017_s14 = smul.u32 3, %s7925_s29  ;;  %s451_s16 = scalar_lea.vmem [#allocation8], %s7015_s17 }
  0x2a   : > { %s458_s13 = sshll.u32 %s451_s16, 4  ;;  %s7954_s25 = scalar_lea.sflag [#allocation5], %s447_s30  ;;  %s7952_s13 = int_to_ptr.vmem [resolvable:$true] %s458_s13 }
  0x2b   : > { %p7960_p5 = pneg %p7930_p0 }
  0x2d   : > { %7054 = dma.hbm_to_vmem [thread:$0]  (!%p7919_p12), %s9184_s0, 256, %s406_s27, [#allocation5], %s7759_s21, %s7759_s21, %s7760_s23  }
  0x2e   : > { %s7950_s24 = scalar_lea.hbm %s9185_s3, %s7016_s19  ;;  %s7411_s17 = scalar_lea.hbm %s9185_s3, 6144 }
  0x2f   : > { %s7406_s11 = scalar_lea.hbm %s7950_s24, 3072  ;;  %p7412_p2 = scmp.lt.s32.totalorder %s7950_s24, %s9185_s3 }
  0x30   : > { %p7407_p4 = scmp.ne.s32.totalorder %s7950_s24, %s7406_s11  ;;  %p7413_p3 = scmp.lt.s32.totalorder %s7411_s17, %s7406_s11 }
  0x32   : > { %p7409_p9 = pnand %p7960_p5, %p7407_p4  ;;  %p7414_p6 = por %p7413_p3, %p7412_p2 }
  0x34   : > { %p7410_p13 = pneg %p7409_p9 }
  0x36   : > { %p7415_p7 = pnand %p7414_p6, %p7410_p13 }
  0x38   : > { %7418 = shalt.err (!%p7415_p7)
}
  0x39   : > { %s7419_s30 = scalar_lea.vmem %s7952_s13, 3072  ;;  %s7761_s21 = smov [#allocation8]  }
  0x3a   : > { %p7420_p11 = scmp.ne.s32.totalorder %s7952_s13, %s7419_s30  ;;  %s7424_s23 = sshll.u32 %s7761_s21, 4  ;;  %s7425_s23 = int_to_ptr.vmem [resolvable:$false] %s7424_s23 }
  0x3b   : > { %s7426_s26 = scalar_lea.vmem %s7425_s23, 6144  ;;  %p7427_p1 = scmp.lt.s32.totalorder %s7952_s13, %s7425_s23 }
  0x3c   : > { %p7422_p4 = pnand %p7420_p11, %p7960_p5  ;;  %p7428_p8 = scmp.lt.s32.totalorder %s7426_s26, %s7419_s30 }
  0x3e   : > { %p7423_p9 = pneg %p7422_p4  ;;  %p7429_p10 = por %p7428_p8, %p7427_p1 }
  0x40   : > { %p7430_p12 = pnand %p7429_p10, %p7423_p9 }
  0x42   : > { %7433 = shalt.err (!%p7430_p12)
}
  0x43   : > { %s7762_s11 = smov 192   ;;  %s7763_s20 = smov 12  }
  0x44   : > { %7064 = dma.hbm_to_vmem [thread:$0]  (!%p7930_p0), %s7950_s24, 3072, %s7952_s13, %s7954_s25, %s7762_s11, %s7762_s11, %s7763_s20  }
  0x45   : > { %s7018_s1 = smul.u32 48, %s7756_s18  ;;  %s472_s19 = scalar_lea.vmem [#allocation9], %s7017_s14 }
  0x46   : > { %s480_s17 = sshll.u32 %s472_s19, 4  ;;  %s6282_s16 = sshll.u32 %s7925_s29, 6  ;;  %s481_s17 = int_to_ptr.vmem [resolvable:$true] %s480_s17 }
  0x47   : > { %s478_s21 = scalar_lea.hbm %s9135_s4, %s7018_s1  ;;  %s7439_s3 = scalar_lea.hbm %s9135_s4, 96 }
  0x48   : > { %s7434_s23 = scalar_lea.hbm %s478_s21, 48  ;;  %p7440_p1 = scmp.lt.s32.totalorder %s478_s21, %s9135_s4 }
  0x49   : > { %p7435_p8 = scmp.ne.s32.totalorder %s478_s21, %s7434_s23  ;;  %p7441_p13 = scmp.lt.s32.totalorder %s7439_s3, %s7434_s23 }
  0x4b   : > { %p7437_p10 = pnand %p7435_p8, %p7960_p5  ;;  %p7442_p2 = por %p7441_p13, %p7440_p1 }
  0x4d   : > { %p7438_p12 = pneg %p7437_p10 }
  0x4f   : > { %p7443_p3 = pnand %p7442_p2, %p7438_p12 }
  0x51   : > { %7446 = shalt.err (!%p7443_p3)
}
  0x52   : > { %s7447_s14 = scalar_lea.vmem %s481_s17, 48  ;;  %s7764_s11 = smov [#allocation9]  }
  0x53   : > { %p7448_p6 = scmp.ne.s32.totalorder %s481_s17, %s7447_s14  ;;  %s7452_s20 = sshll.u32 %s7764_s11, 4  ;;  %s7453_s20 = int_to_ptr.vmem [resolvable:$false] %s7452_s20 }
  0x54   : > { %s7454_s1 = scalar_lea.vmem %s7453_s20, 96  ;;  %p7455_p4 = scmp.lt.s32.totalorder %s481_s17, %s7453_s20 }
  0x55   : > { %p7450_p7 = pnand %p7448_p6, %p7960_p5  ;;  %p7456_p9 = scmp.lt.s32.totalorder %s7454_s1, %s7447_s14 }
  0x57   : > { %p7451_p11 = pneg %p7450_p7  ;;  %p7457_p8 = por %p7456_p9, %p7455_p4 }
  0x59   : > { %p7458_p10 = pnand %p7457_p8, %p7451_p11 }
  0x5b   : > { %7461 = shalt.err (!%p7458_p10)
}
  0x5c   : > { %7067 = dma.hbm_to_vmem [thread:$0]  (!%p7930_p0), %s478_s21, 48, %s481_s17, %s7954_s25  }
  0x5d   : > { %s6638_s0 = sshll.u32 %s7756_s18, 10  ;;  %s491_s3 = scalar_lea.vmem [#allocation10], %s6282_s16 }
  0x5e   : > { %s498_s19 = sshll.u32 %s491_s3, 4  ;;  %s8007_s23 = scalar_lea.hbm %s9136_s5, %s6638_s0  ;;  %s8009_s19 = int_to_ptr.vmem [resolvable:$true] %s498_s19 }
  0x5f   : > { %s7462_s26 = scalar_lea.hbm %s8007_s23, 1024  ;;  %s7467_s16 = scalar_lea.hbm %s9136_s5, 2048 }
  0x60   : > { %p7463_p12 = scmp.ne.s32.totalorder %s8007_s23, %s7462_s26  ;;  %p7468_p2 = scmp.lt.s32.totalorder %s8007_s23, %s9136_s5 }
  0x61   : > { %p7469_p3 = scmp.lt.s32.totalorder %s7467_s16, %s7462_s26 }
  0x62   : > { %p7465_p1 = pnand %p7463_p12, %p7960_p5 }
  0x63   : > { %p7470_p6 = por %p7469_p3, %p7468_p2 }
  0x64   : > { %p7466_p13 = pneg %p7465_p1 }
  0x66   : > { %p7471_p7 = pnand %p7470_p6, %p7466_p13 }
  0x68   : > { %7474 = shalt.err (!%p7471_p7)
}
  0x69   : > { %s7475_s14 = scalar_lea.vmem %s8009_s19, 1024  ;;  %s7765_s11 = smov [#allocation10]  }
  0x6a   : > { %p7476_p11 = scmp.ne.s32.totalorder %s8009_s19, %s7475_s14  ;;  %s7480_s20 = sshll.u32 %s7765_s11, 4  ;;  %s7481_s20 = int_to_ptr.vmem [resolvable:$false] %s7480_s20 }
  0x6b   : > { %s7482_s1 = scalar_lea.vmem %s7481_s20, 2048  ;;  %p7483_p8 = scmp.lt.s32.totalorder %s8009_s19, %s7481_s20 }
  0x6c   : > { %p7478_p4 = pnand %p7476_p11, %p7960_p5  ;;  %p7484_p10 = scmp.lt.s32.totalorder %s7482_s1, %s7475_s14 }
  0x6e   : > { %p7479_p9 = pneg %p7478_p4  ;;  %p7485_p12 = por %p7484_p10, %p7483_p8 }
  0x70   : > { %p7486_p1 = pnand %p7485_p12, %p7479_p9 }
  0x72   : > { %7489 = shalt.err (!%p7486_p1)
}
  0x73   : > { %s7766_s0 = smov 64   ;;  %s9165_s3 = smov 4  }
  0x74   : > { %7070 = dma.hbm_to_vmem [thread:$0]  (!%p7930_p0), %s8007_s23, 1024, %s8009_s19, %s7954_s25, %s7766_s0, %s7766_s0, %s9165_s3  }
  0x75   : > { %s9164_s27 = sshll.u32 %s7756_s18, 4  ;;  %s511_s17 = scalar_lea.vmem [#allocation11], %s7925_s29 }
  0x76   : > { %s8041_s13 = scalar_lea.hbm %s9137_s6, %s9164_s27  ;;  %s518_s16 = sshll.u32 %s511_s17, 4  ;;  %s519_s16 = int_to_ptr.vmem [resolvable:$true] %s518_s16 }
  0x77   : > { %s6286_s21 = sshll.u32 %s7925_s29, 10  ;;  %s7490_s24 = scalar_lea.hbm %s8041_s13, 16 }
  0x78   : > { %p7491_p13 = scmp.ne.s32.totalorder %s8041_s13, %s7490_s24  ;;  %s7495_s14 = scalar_lea.hbm %s9137_s6, 32 }
  0x79   : > { %p7496_p6 = scmp.lt.s32.totalorder %s8041_s13, %s9137_s6  ;;  %p7497_p7 = scmp.lt.s32.totalorder %s7495_s14, %s7490_s24 }
  0x7a   : > { %p7493_p2 = pnand %p7491_p13, %p7960_p5 }
  0x7b   : > { %p7498_p11 = por %p7497_p7, %p7496_p6 }
  0x7c   : > { %p7494_p3 = pneg %p7493_p2 }
  0x7e   : > { %p7499_p4 = pnand %p7498_p11, %p7494_p3 }
  0x80   : > { %7502 = shalt.err (!%p7499_p4)
}
  0x81   : > { %s7503_s1 = scalar_lea.vmem %s519_s16, 16  ;;  %s7768_s30 = smov [#allocation11]  }
  0x82   : > { %p7504_p9 = scmp.ne.s32.totalorder %s519_s16, %s7503_s1  ;;  %s7508_s26 = sshll.u32 %s7768_s30, 4  ;;  %s7509_s26 = int_to_ptr.vmem [resolvable:$false] %s7508_s26 }
  0x83   : > { %s7510_s17 = scalar_lea.vmem %s7509_s26, 32  ;;  %p7511_p12 = scmp.lt.s32.totalorder %s519_s16, %s7509_s26 }
  0x84   : > { %p7506_p8 = pnand %p7504_p9, %p7960_p5  ;;  %p7512_p1 = scmp.lt.s32.totalorder %s7510_s17, %s7503_s1 }
  0x86   : > { %p7507_p10 = pneg %p7506_p8  ;;  %p7513_p13 = por %p7512_p1, %p7511_p12 }
  0x88   : > { %p7514_p2 = pnand %p7513_p13, %p7507_p10 }
  0x8a   : > { %7517 = shalt.err (!%p7514_p2)
}
  0x8b   : > { %7073 = dma.hbm_to_vmem [thread:$0]  (!%p7930_p0), %s8041_s13, 16, %s519_s16, %s7954_s25  }
  0x8c   : > { %s6639_s24 = sshll.u32 %s7756_s18, 14  ;;  %s529_s11 = scalar_lea.vmem [#allocation12], %s6286_s21 }
  0x8d   : > { %s8068_s14 = scalar_lea.hbm %s9138_s7, %s6639_s24  ;;  %s536_s20 = sshll.u32 %s529_s11, 4  ;;  %s8072_s20 = int_to_ptr.vmem [resolvable:$true] %s536_s20 }
  0x8e   : > { %s7518_s1 = scalar_lea.hbm %s8068_s14, 16384  ;;  %s7523_s30 = scalar_lea.hbm %s9138_s7, 32768 }
  0x8f   : > { %p7519_p3 = scmp.ne.s32.totalorder %s8068_s14, %s7518_s1  ;;  %p7524_p11 = scmp.lt.s32.totalorder %s8068_s14, %s9138_s7 }
  0x90   : > { %p7525_p4 = scmp.lt.s32.totalorder %s7523_s30, %s7518_s1 }
  0x91   : > { %p7521_p6 = pnand %p7519_p3, %p7960_p5 }
  0x92   : > { %p7526_p9 = por %p7525_p4, %p7524_p11 }
  0x93   : > { %p7522_p7 = pneg %p7521_p6 }
  0x95   : > { %p7527_p8 = pnand %p7526_p9, %p7522_p7 }
  0x97   : > { %7530 = shalt.err (!%p7527_p8)
}
  0x98   : > { %s7531_s19 = scalar_lea.vmem %s8072_s20, 16384  ;;  %s7769_s23 = smov [#allocation12]  }
  0x99   : > { %p7532_p10 = scmp.ne.s32.totalorder %s8072_s20, %s7531_s19  ;;  %s7536_s11 = sshll.u32 %s7769_s23, 4  ;;  %s7537_s11 = int_to_ptr.vmem [resolvable:$false] %s7536_s11 }
  0x9a   : > { %s7538_s13 = scalar_lea.vmem %s7537_s11, 32768  ;;  %p7539_p13 = scmp.lt.s32.totalorder %s8072_s20, %s7537_s11 }
  0x9b   : > { %p7534_p12 = pnand %p7532_p10, %p7960_p5  ;;  %p7540_p2 = scmp.lt.s32.totalorder %s7538_s13, %s7531_s19 }
  0x9d   : > { %p7535_p1 = pneg %p7534_p12  ;;  %p7541_p3 = por %p7540_p2, %p7539_p13 }
  0x9f   : > { %p7542_p6 = pnand %p7541_p3, %p7535_p1 }
  0xa1   : > { %7545 = shalt.err (!%p7542_p6)
}
  0xa2   : > { %s7770_s1 = smov 1024   ;;  %s6289_s16 = sshll.u32 %s7925_s29, 4 }
  0xa3   : > { %7076 = dma.hbm_to_vmem [thread:$0]  (!%p7930_p0), %s8068_s14, 16384, %s8072_s20, %s7954_s25, %s7770_s1, %s7770_s1, %s7766_s0  }
  0xa4   : > { %s6640_s30 = sshll.u32 %s7756_s18, 8  ;;  %s550_s23 = scalar_lea.vmem [#allocation13], %s6289_s16 }
  0xa5   : > { %s8101_s19 = scalar_lea.hbm %s9139_s8, %s6640_s30  ;;  %s558_s11 = sshll.u32 %s550_s23, 4  ;;  %s559_s11 = int_to_ptr.vmem [resolvable:$true] %s558_s11 }
  0xa6   : > { %s8108_s3 = scalar_lea.hbm %s9140_s9, %s6639_s24  ;;  %s7546_s14 = scalar_lea.hbm %s8101_s19, 256 }
  0xa7   : > { %p7547_p7 = scmp.ne.s32.totalorder %s8101_s19, %s7546_s14  ;;  %s7551_s30 = scalar_lea.hbm %s9139_s8, 512 }
  0xa8   : > { %p7552_p9 = scmp.lt.s32.totalorder %s8101_s19, %s9139_s8  ;;  %p7553_p8 = scmp.lt.s32.totalorder %s7551_s30, %s7546_s14 }
  0xa9   : > { %p7549_p11 = pnand %p7547_p7, %p7960_p5 }
  0xaa   : > { %p7554_p10 = por %p7553_p8, %p7552_p9 }
  0xab   : > { %p7550_p4 = pneg %p7549_p11 }
  0xad   : > { %p7555_p12 = pnand %p7554_p10, %p7550_p4 }
  0xaf   : > { %7558 = shalt.err (!%p7555_p12)
}
  0xb0   : > { %s7559_s27 = scalar_lea.vmem %s559_s11, 256  ;;  %s7771_s24 = smov [#allocation13]  }
  0xb1   : > { %p7560_p1 = scmp.ne.s32.totalorder %s559_s11, %s7559_s27  ;;  %s7564_s16 = sshll.u32 %s7771_s24, 4  ;;  %s7565_s16 = int_to_ptr.vmem [resolvable:$false] %s7564_s16 }
  0xb2   : > { %s7566_s23 = scalar_lea.vmem %s7565_s16, 512  ;;  %p7567_p3 = scmp.lt.s32.totalorder %s559_s11, %s7565_s16 }
  0xb3   : > { %p7562_p13 = pnand %p7560_p1, %p7960_p5  ;;  %p7568_p6 = scmp.lt.s32.totalorder %s7566_s23, %s7559_s27 }
  0xb5   : > { %p7563_p2 = pneg %p7562_p13  ;;  %p7569_p7 = por %p7568_p6, %p7567_p3 }
  0xb7   : > { %p7570_p11 = pnand %p7569_p7, %p7563_p2 }
  0xb9   : > { %7573 = shalt.err (!%p7570_p11)
}
  0xba   : > { %7079 = dma.hbm_to_vmem [thread:$0]  (!%p7930_p0), %s8101_s19, 256, %s559_s11, %s7954_s25  }
  0xbb   : > { %s569_s13 = scalar_lea.vmem [#allocation14], %s6286_s21  ;;  %s7772_s20 = smov [#allocation6]  }
  0xbc   : > { %s576_s14 = sshll.u32 %s569_s13, 4  ;;  %s8131_s1 = sshll.u32 %s7772_s20, 4  ;;  %s8129_s14 = int_to_ptr.vmem [resolvable:$true] %s576_s14  ;;  %s423_s1 = int_to_ptr.vmem [resolvable:$true] %s8131_s1 }
  0xbd   : > { %s7574_s30 = scalar_lea.hbm %s8108_s3, 16384  ;;  %s7579_s27 = scalar_lea.hbm %s9140_s9, 32768 }
  0xbe   : > { %p7575_p4 = scmp.ne.s32.totalorder %s8108_s3, %s7574_s30  ;;  %p7580_p10 = scmp.lt.s32.totalorder %s8108_s3, %s9140_s9 }
  0xbf   : > { %p7581_p12 = scmp.lt.s32.totalorder %s7579_s27, %s7574_s30 }
  0xc0   : > { %p7577_p9 = pnand %p7575_p4, %p7960_p5 }
  0xc1   : > { %p7582_p1 = por %p7581_p12, %p7580_p10 }
  0xc2   : > { %p7578_p8 = pneg %p7577_p9 }
  0xc4   : > { %p7583_p13 = pnand %p7582_p1, %p7578_p8 }
  0xc6   : > { %7586 = shalt.err (!%p7583_p13)
}
  0xc7   : > { %s7587_s21 = scalar_lea.vmem %s8129_s14, 16384  ;;  %s7773_s19 = smov [#allocation14]  }
  0xc8   : > { %p7588_p2 = scmp.ne.s32.totalorder %s8129_s14, %s7587_s21  ;;  %s7592_s11 = sshll.u32 %s7773_s19, 4  ;;  %s7593_s11 = int_to_ptr.vmem [resolvable:$false] %s7592_s11 }
  0xc9   : > { %s7594_s23 = scalar_lea.vmem %s7593_s11, 32768  ;;  %p7595_p7 = scmp.lt.s32.totalorder %s8129_s14, %s7593_s11 }
  0xca   : > { %p7590_p3 = pnand %p7588_p2, %p7960_p5  ;;  %p7596_p11 = scmp.lt.s32.totalorder %s7594_s23, %s7587_s21 }
  0xcc   : > { %p7591_p6 = pneg %p7590_p3  ;;  %p7597_p4 = por %p7596_p11, %p7595_p7 }
  0xce   : > { %p7598_p9 = pnand %p7597_p4, %p7591_p6 }
  0xd0   : > { %7601 = shalt.err (!%p7598_p9)
}
  0xd1   : > { %s9187_s13 = smov 4   ;;  %s7613_s20 = scalar_lea.vmem %s423_s1, 16 }
  0xd2   : > { %7082 = dma.hbm_to_vmem [thread:$0]  (!%p7930_p0), %s8108_s3, 16384, %s8129_s14, %s7954_s25, %s7766_s0, %s7766_s0, %s9187_s13  }
  0xd3   : > { %p7614_p8 = scmp.ne.s32.totalorder %s423_s1, %s7613_s20  ;;  %p9188_p10 = scmp.ne.s32.totalorder %s9182_s28, 0 }
  0xd4   : > { %s7620_s30 = scalar_lea.vmem %s423_s1, 32  ;;  %p7621_p2 = scmp.lt.s32.totalorder %s423_s1, %s423_s1 }
  0xd5   : > { %p9189_p12 = pneg %p9188_p10  ;;  %p7622_p3 = scmp.lt.s32.totalorder %s7620_s30, %s7613_s20 }
  0xd7   : > { %p7616_p1 = pnand %p7614_p8, %p9189_p12  ;;  %p7623_p6 = por %p7622_p3, %p7621_p2 }
  0xd9   : > { %p7617_p13 = pneg %p7616_p1 }
  0xdb   : > { %p7624_p7 = pnand %p7623_p6, %p7617_p13 }
  0xdd   : > { %7627 = shalt.err (!%p7624_p7)
}
  0xde   : > { %7057 = dma.hbm_to_vmem [thread:$0]  (!%p9188_p10), %s9133_s2, 16, %s423_s1, [#allocation7]  }
  0xdf   : > { %s9190_s0 = sshll.u32 %s7756_s18, 4  ;;  %s589_s24 = scalar_lea.vmem [#allocation15], %s7925_s29 }
  0xe0   : > { %s594_s27 = scalar_lea.hbm %s9141_s10, %s9190_s0  ;;  %s596_s16 = sshll.u32 %s589_s24, 4  ;;  %s597_s16 = int_to_ptr.vmem [resolvable:$true] %s596_s16 }
  0xe1   : > { %s7628_s21 = scalar_lea.hbm %s594_s27, 16  ;;  %s7633_s23 = scalar_lea.hbm %s9141_s10, 32 }
  0xe2   : > { %p7629_p11 = scmp.ne.s32.totalorder %s594_s27, %s7628_s21  ;;  %p7634_p8 = scmp.lt.s32.totalorder %s594_s27, %s9141_s10 }
  0xe3   : > { %p7635_p12 = scmp.lt.s32.totalorder %s7633_s23, %s7628_s21 }
  0xe4   : > { %p7631_p4 = pnand %p7629_p11, %p7960_p5 }
  0xe5   : > { %p7636_p1 = por %p7635_p12, %p7634_p8 }
  0xe6   : > { %p7632_p9 = pneg %p7631_p4 }
  0xe8   : > { %p7637_p13 = pnand %p7636_p1, %p7632_p9 }
  0xea   : > { %7640 = shalt.err (!%p7637_p13)
}
  0xeb   : > { %s7641_s1 = scalar_lea.vmem %s597_s16, 16  ;;  %s7774_s30 = smov [#allocation15]  }
  0xec   : > { %p7642_p2 = scmp.ne.s32.totalorder %s597_s16, %s7641_s1  ;;  %s7646_s26 = sshll.u32 %s7774_s30, 4  ;;  %s7647_s26 = int_to_ptr.vmem [resolvable:$false] %s7646_s26 }
  0xed   : > { %s7648_s17 = scalar_lea.vmem %s7647_s26, 32  ;;  %p7649_p7 = scmp.lt.s32.totalorder %s597_s16, %s7647_s26 }
  0xee   : > { %p7644_p3 = pnand %p7642_p2, %p7960_p5  ;;  %p7650_p11 = scmp.lt.s32.totalorder %s7648_s17, %s7641_s1 }
  0xf0   : > { %p7645_p6 = pneg %p7644_p3  ;;  %p7651_p4 = por %p7650_p11, %p7649_p7 }
  0xf2   : > { %p7652_p10 = pnand %p7651_p4, %p7645_p6 }
  0xf4   : > { %7655 = shalt.err (!%p7652_p10)
}
  0xf5   : > { %7085 = dma.hbm_to_vmem [thread:$0]  (!%p7930_p0), %s594_s27, 16, %s597_s16, %s7954_s25  }
  0xf6   : > { %s7775_s0 = smov [#allocation17]   ;;  %s6296_s14 = sshll.u32 %s7925_s29, 2 }
  0xf7   : > { %s433_s3 = sshll.u32 %s7775_s0, 4  ;;  %p9191_p8 = scmp.ne.s32.totalorder %s9182_s28, 0  ;;  %s434_s3 = int_to_ptr.vmem [resolvable:$true] %s433_s3 }
  0xf8   : > { %s7667_s24 = scalar_lea.vmem %s434_s3, 16  ;;  %s7674_s21 = scalar_lea.vmem %s434_s3, 32 }
  0xf9   : > { %p7668_p9 = scmp.ne.s32.totalorder %s434_s3, %s7667_s24  ;;  %p9192_p12 = pneg %p9191_p8 }
  0xfa   : > { %p7675_p2 = scmp.lt.s32.totalorder %s434_s3, %s434_s3  ;;  %p7676_p3 = scmp.lt.s32.totalorder %s7674_s21, %s7667_s24 }
  0xfb   : > { %p7670_p1 = pnand %p7668_p9, %p9192_p12 }
  0xfc   : > { %p7677_p10 = por %p7676_p3, %p7675_p2 }
  0xfd   : > { %p7671_p13 = pneg %p7670_p1 }
  0xff   : > { %p7678_p6 = pnand %p7677_p10, %p7671_p13 }
 0x101   : > { %7681 = shalt.err (!%p7678_p6)
}
 0x102   : > { %7060 = dma.hbm_to_vmem [thread:$0]  (!%p9191_p8), %s9143_s12, 16, %s434_s3, [#allocation7]  }
 0x103   : > { %s6297_s29 = sshll.u32 %s7756_s18, 6  ;;  %s607_s16 = scalar_lea.vmem [#allocation16], %s6296_s14 }
 0x104   : > { %s614_s11 = sshll.u32 %s607_s16, 4  ;;  %s9193_s20 = sld [smem:[#allocation32_spill]]  ;;  %s615_s11 = int_to_ptr.vmem [resolvable:$true] %s614_s11 }
 0x10a   : > { %s612_s1 = scalar_lea.hbm %s9193_s20, %s6297_s29  ;;  %s7687_s17 = scalar_lea.hbm %s9193_s20, 128 }
 0x10b   : > { %s7682_s30 = scalar_lea.hbm %s612_s1, 64  ;;  %p7688_p9 = scmp.lt.s32.totalorder %s612_s1, %s9193_s20 }
 0x10c   : > { %p7683_p7 = scmp.ne.s32.totalorder %s612_s1, %s7682_s30  ;;  %p7689_p8 = scmp.lt.s32.totalorder %s7687_s17, %s7682_s30 }
 0x10e   : > { %p7685_p11 = pnand %p7683_p7, %p7960_p5  ;;  %p7690_p12 = por %p7689_p8, %p7688_p9 }
 0x110   : > { %p7686_p4 = pneg %p7685_p11 }
 0x112   : > { %p7691_p1 = pnand %p7690_p12, %p7686_p4 }
 0x114   : > { %7694 = shalt.err (!%p7691_p1)
}
 0x115   : > { %s7695_s18 = scalar_lea.vmem %s615_s11, 64  ;;  %s7776_s3 = smov [#allocation16]  }
 0x116   : > { %p7696_p13 = scmp.ne.s32.totalorder %s615_s11, %s7695_s18  ;;  %s7700_s14 = sshll.u32 %s7776_s3, 4  ;;  %s7701_s14 = int_to_ptr.vmem [resolvable:$false] %s7700_s14 }
 0x117   : > { %s7702_s21 = scalar_lea.vmem %s7701_s14, 128  ;;  %p7703_p10 = scmp.lt.s32.totalorder %s615_s11, %s7701_s14 }
 0x118   : > { %p7698_p2 = pnand %p7696_p13, %p7960_p5  ;;  %p7704_p6 = scmp.lt.s32.totalorder %s7702_s21, %s7695_s18 }
 0x11a   : > { %p7699_p3 = pneg %p7698_p2  ;;  %p7705_p7 = por %p7704_p6, %p7703_p10 }
 0x11c   : > { %p7706_p11 = pnand %p7705_p7, %p7699_p3 }
 0x11e   : > { %7709 = shalt.err (!%p7706_p11)
}
 0x11f   : > { %7088 = dma.hbm_to_vmem [thread:$0]  (!%p7930_p0), %s612_s1, 64, %s615_s11, %s7954_s25  }
 0x120   : > { %s9194_s19 = sld [smem:[#allocation28_spill]] }
 0x126   : > { %p9195_p4 = scmp.ne.s32.totalorder %s9194_s19, 0 }
 0x127   : > { %s9196_s27 = sld [smem:[#allocation24_spill]] (!%p9195_p4) }
 0x128   : > { %623 = sbr.rel (%p9195_p4) target bundleno = 4022 (0xfb6), region = 76 }
 0x12d   : > { %p9197_p9 = scmp.eq.s32.totalorder %s9196_s27, 0 }
 0x12f   : > { %7727 = dma.done.wait (%p9197_p9), [#allocation5], 256   ;;  %p9198_p5 = pmov %p9197_p9 }
 0x131   : > { %7729 = vsyncadd (%p9198_p5), [#allocation5], 4294967040  ;;  %p9199_p8 = pmov %p9198_p5 }
 0x132   : > { %p9200_p12 = pmov %p9198_p5 }
 0x133   : > { %7731 = dma.done.wait (%p9199_p8), [#allocation7], 16  }
 0x134   : > { %7733 = vsyncadd (%p9200_p12), [#allocation7], 4294967280  ;;  %s9201_s22 = sld [smem:[#allocation22_spill]]  ;;  %s633_s29 = sand.u32 1, %s9196_s27  }
 0x135   : > { %s9202_s15 = sld [smem:[#allocation27_spill]]  ;;  %s634_s11 = scalar_lea.sflag [#allocation5], %s633_s29 }
 0x13a   : > { %s8223_s25 = sand.u32 1, %s9201_s22  }
 0x13b   : > { %s7019_s16 = smul.u32 192, %s8223_s25  ;;  %p9203_p0 = scmp.ne.s32.totalorder %s9202_s15, 0 }
 0x13d   : > { %s8226_s23 = scalar_lea.vmem [#allocation8], %s7019_s16 }
 0x13e   : > { %7735 = dma.done.wait (%p9203_p0), %s634_s11, 37264  }
 0x13f   : > { %7737 = vsyncadd (%p9203_p0), %s634_s11, 4294930032  ;;  %s7020_s13 = smul.u32 3, %s8223_s25  ;;  %s6301_s1 = sshll.u32 %s8223_s25, 6 }
 0x140   : > { %s6302_s30 = sshll.u32 %s8223_s25, 10  ;;  %s6303_s28 = sshll.u32 %s8223_s25, 4 }
 0x141   : > { %s6305_s26 = sshll.u32 %s8223_s25, 2  ;;  %s8237_s17 = scalar_lea.vmem [#allocation9], %s7020_s13 }
 0x142   : > { %s8239_s0 = scalar_lea.vmem [#allocation10], %s6301_s1  ;;  %s663_s24 = scalar_lea.vmem [#allocation11], %s8223_s25 }
 0x143   : > { %s8242_s18 = scalar_lea.vmem [#allocation12], %s6302_s30  ;;  %s8244_s3 = scalar_lea.vmem [#allocation13], %s6303_s28 }
 0x144   : > { %s8246_s14 = scalar_lea.vmem [#allocation14], %s6302_s30  ;;  %s698_s21 = scalar_lea.vmem [#allocation15], %s8223_s25 }
 0x145   : > { %s8249_s19 = scalar_lea.vmem [#allocation16], %s6305_s26  ;;  %p9204_p1 = pmov %p9198_p5 }
 0x147   : > { %7739 = dma.done.wait (%p9204_p1), [#allocation7], 16   ;;  %p9205_p13 = pmov %p9204_p1 }
 0x148   : > { %p9206_p2 = scmp.ne.s32.totalorder %s9196_s27, 0 }
 0x149   : > { %7741 = vsyncadd (%p9205_p13), [#allocation7], 4294967280  ;;  %s9207_s29 = sld [smem:[#allocation30_spill]] (!%p9206_p2) }
 0x14a   : > { %793 = sbr.rel (%p9206_p2) target bundleno = 538 (0x21a), region = 128 }
 0x14f   : > { %v797_v1 = vld [vmem:[%s9207_s29 + $0x8] sm:$0xff]  ;;  %v796_v2 = vld [vmem:[%s9207_s29] sm:$0xff]  ;;  %v794_v3 = vld [vmem:[#allocation4] sm:$0xff]  ;;  %vm805_vm0 = vcmask 130048  }
 0x150   : > { %6872 = vmatprep.subr.mxu0 %v797_v1  ;;  %6876 = vmatprep.mubr.msk.f32.mxu0 %vm805_vm0, %v794_v3  ;;  %v795_v4 = vld [vmem:[#allocation4 + $0x8] sm:$0xff]  ;;  %v6308_v5 = vld [vmem:[#allocation6] ss:$0 sm:$0xff] }
 0x151   : > { %6873 = vmatpush3.msra.mxu0 %v797_v1 }
 0x152   : > { %6874 = vmatprep.subr.mxu0 %v796_v2 }
 0x153   : > { %6875 = vmatpush3.msra.mxu0 %v796_v2 }
 0x154   : > { %6877 = vmatmul.mubr.msk.f32.vlgmr.msra.gmra.mxu0 %vm805_vm0, %v795_v4 }
 0x214   : > { %v6878_v6 = vpop.f32.mrf.mxu0 }
 0x215   : > { %v884_v7 = vadd.f32 %v6878_v6, %v6308_v5 }
 0x216   : > { %v878_v8 = vpop.f32.mrf.mxu0 }
 0x217   : > { %888 = vst [vmem:[#allocation2 + $0x8] sm:$0xff] %v884_v7  ;;  %v879_v9 = vadd.f32 %v6308_v5, %v878_v8 }
 0x219   : > { %887 = vst [vmem:[#allocation2] sm:$0xff] %v879_v9 }
 0x21a PF: > { %v7161_v10 = vld [vmem:[%s8226_s23 + $0xac] ss:$12 sps:$4 sm:$0xff]   ;;  %v7163_v11 = vld [vmem:[%s8226_s23 + $0xa8] ss:$12 sps:$4 sm:$0xff]   ;;  %v7777_v12 = vmov 0   ;;  %v7778_v31 = vmov 0.0   ;;  %v926_v37 = vlaneseq }
 0x21b   : > { %1101 = vmatprep.mubr.bf16.mxu0 %v7777_v12  ;;  %1069 = vmatprep.subr.bf16.mxu0 %v7161_v10  ;;  %v7164_v13 = vld [vmem:[%s8226_s23 + $0x94] ss:$12 sps:$4 sm:$0xff]   ;;  %v7166_v14 = vld [vmem:[%s8226_s23 + $0x90] ss:$12 sps:$4 sm:$0xff]   ;;  %v7169_v16 = vld [vmem:[%s8226_s23 + $0x78] ss:$12 sps:$4 sm:$0xff]  }
 0x21c   : > { %1070 = vmatpush1.bf16.msra.mxu0 %v7163_v11  ;;  %v7167_v15 = vld [vmem:[%s8226_s23 + $0x7c] ss:$12 sps:$4 sm:$0xff]   ;;  %v7170_v17 = vld [vmem:[%s8226_s23 + $0x64] ss:$12 sps:$4 sm:$0xff]   ;;  %v7172_v18 = vld [vmem:[%s8226_s23 + $0x60] ss:$12 sps:$4 sm:$0xff]   ;;  %6879 = vmatprep.subr.bf16.mxu1 %v7778_v31 }
 0x21d   : > { %1071 = vmatprep.subr.bf16.mxu0 %v7164_v13  ;;  %v7173_v19 = vld [vmem:[%s8226_s23 + $0x4c] ss:$12 sps:$4 sm:$0xff]   ;;  %v7175_v20 = vld [vmem:[%s8226_s23 + $0x48] ss:$12 sps:$4 sm:$0xff]   ;;  %v7178_v22 = vld [vmem:[%s8226_s23 + $0x30] ss:$12 sps:$4 sm:$0xff]  }
 0x21e   : > { %v7176_v21 = vld [vmem:[%s8226_s23 + $0x34] ss:$12 sps:$4 sm:$0xff]   ;;  %v7179_v23 = vld [vmem:[%s8226_s23 + $0x1c] ss:$12 sps:$4 sm:$0xff]   ;;  %v7181_v24 = vld [vmem:[%s8226_s23 + $0x18] ss:$12 sps:$4 sm:$0xff]  }
 0x21f   : > { %v7182_v25 = vld [vmem:[%s8226_s23 + $0x4] ss:$12 sps:$4 sm:$0xff]   ;;  %v7184_v26 = vld [vmem:[%s8226_s23] ss:$12 sps:$4 sm:$0xff]   ;;  %v7188_v34 = vld [vmem:[%s8226_s23 + $0x68] ss:$12 sps:$4 sm:$0xff]  }
 0x220   : > { %1072 = vmatpush1.bf16.msra.mxu0 %v7166_v14  ;;  %v889_v27 = vld [vmem:[#allocation2] sm:$0xff]  ;;  %v890_v28 = vld [vmem:[#allocation2 + $0x8] sm:$0xff]  ;;  %v8295_v39 = vshrl.u32 %v926_v37, 7  ;;  %vm7779_vm1 = vmmov 0   ;;  %s7780_s27 = smov 32   ;;  %s7782_s13 = smov 64  }
 0x221   : > { %1073 = vmatprep.subr.bf16.mxu0 %v7167_v15  ;;  %v891_v29 = vpack.c.bf16 %v890_v28, %v889_v27  ;;  %v7185_v30 = vld [vmem:[%s8226_s23 + $0xb0] ss:$12 sps:$4 sm:$0xff]   ;;  %v7186_v32 = vld [vmem:[%s8226_s23 + $0x98] ss:$12 sps:$4 sm:$0xff]   ;;  %v7187_v33 = vld [vmem:[%s8226_s23 + $0x80] ss:$12 sps:$4 sm:$0xff]   ;;  %6895 = vmatprep.mubr.msk.bf16.mxu1 %vm7779_vm1, %v7778_v31 }
 0x222   : > { %6880 = vmatpush3.bf16.msra.mxu1 %v7185_v30  ;;  %v7189_v35 = vld [vmem:[%s8226_s23 + $0x50] ss:$12 sps:$4 sm:$0xff]   ;;  %v7190_v36 = vld [vmem:[%s8226_s23 + $0x38] ss:$12 sps:$4 sm:$0xff]   ;;  %v7191_v38 = vld [vmem:[%s8226_s23 + $0x20] ss:$12 sps:$4 sm:$0xff]  }
 0x223   : > { %6881 = vmatprep.subr.bf16.mxu1 %v7778_v31  ;;  %v7192_v40 = vld [vmem:[%s8226_s23 + $0x8] ss:$12 sps:$4 sm:$0xff]   ;;  %v8300_v41 = vsub.s32 0, %v8295_v39  ;;  %v8303_v42 = vsub.s32 1, %v8295_v39  ;;  %v8306_v43 = vld [vmem:[%s8237_s17] sm:$0x7] }
 0x224   : > { %1074 = vmatpush1.bf16.msra.mxu0 %v7169_v16  ;;  %s7781_s23 = smov 96   ;;  %v7783_v56 = vmov 1983009808   ;;  %v7784_v58 = vmov 1934713408   ;;  %vm2047_vm2 = vcmask 261120  }
 0x225   : > { %1075 = vmatprep.subr.bf16.mxu0 %v7170_v17  ;;  %v929_v44 = vrot.slane %v8306_v43, %v8300_v41  ;;  %v933_v45 = vrot.slane %v8306_v43, %v8303_v42  ;;  %v1178_v57 = vunpack.c.l.s4 %v7783_v56  ;;  %v1210_v59 = vunpack.c.l.s4 %v7784_v58  ;;  %s9208_s25 = sld [smem:[#allocation24_spill]] }
 0x226   : > { %6882 = vmatpush3.bf16.msra.mxu1 %v7186_v32  ;;  %vm2416_vm3 = vcmask 64512   ;;  %vm2524_vm4 = vcmask 1043456   ;;  %vm3188_vm5 = vcmask 523264   ;;  %vm3191_vm6 = vcmask 785408  }
 0x227   : > { %6883 = vmatprep.subr.bf16.mxu1 %v7778_v31  ;;  %v1179_v60 = vunpack.c.0.s8 %v1178_v57  ;;  %v1211_v63 = vunpack.c.0.s8 %v1210_v59 }
 0x228   : > { %1076 = vmatpush1.bf16.msra.mxu0 %v7172_v18 }
 0x229   : > { %1077 = vmatprep.subr.bf16.mxu0 %v7173_v19  ;;  %v8342_v0 = vsub.s32 %v1179_v60, %v8295_v39  ;;  %v8345_v7 = vsub.s32 %v1211_v63, %v8295_v39 }
 0x22a   : > { %6884 = vmatpush3.bf16.msra.mxu1 %v7187_v33 }
 0x22b   : > { %6885 = vmatprep.subr.bf16.mxu1 %v7778_v31  ;;  %p6633_p3 = scmp.ne.s32.totalorder %s9208_s25, 1 }
 0x22c   : > { %1078 = vmatpush1.bf16.msra.mxu0 %v7175_v20  ;;  %s9209_s28 = sld [smem:[#allocation33_spill]] (!%p6633_p3) }
 0x22d   : > { %1079 = vmatprep.subr.bf16.mxu0 %v7176_v21 }
 0x22e   : > { %6886 = vmatpush3.bf16.msra.mxu1 %v7188_v34 }
 0x22f   : > { %6887 = vmatprep.subr.bf16.mxu1 %v7778_v31 }
 0x230   : > { %1080 = vmatpush1.bf16.msra.mxu0 %v7178_v22 }
 0x231   : > { %1081 = vmatprep.subr.bf16.mxu0 %v7179_v23 }
 0x232   : > { %6888 = vmatpush3.bf16.msra.mxu1 %v7189_v35 }
 0x233   : > { %6889 = vmatprep.subr.bf16.mxu1 %v7778_v31 }
 0x234   : > { %1082 = vmatpush1.bf16.msra.mxu0 %v7181_v24 }
 0x235   : > { %1083 = vmatprep.subr.bf16.mxu0 %v7182_v25 }
 0x236   : > { %6890 = vmatpush3.bf16.msra.mxu1 %v7190_v36 }
 0x237   : > { %6891 = vmatprep.subr.bf16.mxu1 %v7778_v31 }
 0x238   : > { %1084 = vmatpush1.bf16.msra.mxu0 %v7184_v26 }
 0x239   : > { %6923 = vmatprep.subr.bf16.mxu0 %v7778_v31 }
 0x23a   : > { %6892 = vmatpush3.bf16.msra.mxu1 %v7191_v38 }
 0x23b   : > { %1102 = vmatmul.mubr.bf16.vlgmr.msra.gmra.mxu0 %v891_v29  ;;  %6893 = vmatprep.subr.bf16.mxu1 %v7778_v31 }
 0x23c   : > { %6925 = vmatprep.mubr.msk.bf16.mxu0 %vm7779_vm1, %v7778_v31 }
 0x23e   : > { %6894 = vmatpush3.bf16.msra.mxu1 %v7192_v40 }
 0x23f   : > { %6899 = vmatprep.subr.bf16.mxu1 %v7778_v31 }
 0x241   : > { %6896 = vmatmul.mubr.bf16.vlgmr.msra.gmra.mxu1 %v891_v29 }
 0x242   : > { %6901 = vmatprep.mubr.msk.bf16.mxu1 %vm7779_vm1, %v7778_v31 }
 0x2fb   : > { %v1103_v46 = vpop.f32.mrf.mxu0 }
 0x2fc   : > { %v1104_v48 = vadd.f32 %v1103_v46, %v929_v44 }
 0x2fd   : > { %v1105_v47 = vpop.f32.mrf.mxu0 }
 0x2fe   : > { %v1106_v49 = vadd.f32 %v1105_v47, %v933_v45  ;;  %v1153_v50 = vmul.f32 0.17677669, %v1104_v48 }
 0x2ff   : > { %v1107_v51 = vpop.f32.mrf.mxu0 }
 0x300   : > { %1461 = vrot.lane.b32.xlu1 %v1106_v49, %s7780_s27  ;;  %1449 = vrot.lane.b32.xlu0 %v1106_v49, %s7781_s23  ;;  %v1108_v53 = vadd.f32 %v1107_v51, %v929_v44 }
 0x301   : > { %v1109_v52 = vpop.f32.mrf.mxu0 }
 0x302   : > { %v8325_v54 = vadd.f32 %v1109_v52, %v933_v45  ;;  %v8331_v55 = vmul.f32 0.17677669, %v1108_v53 }
 0x304   : > { %1455 = vrot.lane.b32.xlu0 %v1106_v49, %s7782_s13  ;;  %1157 = vrot.lane.b32.xlu1 %v1153_v50, %s7781_s23 }
 0x308   : > { %1163 = vrot.lane.b32.xlu0 %v1153_v50, %s7782_s13  ;;  %1169 = vrot.lane.b32.xlu1 %v1153_v50, %s7780_s27 }
 0x30c   : > { %1451 = vrot.lane.b32.xlu0 %v8325_v54, %s7781_s23  ;;  %1457 = vrot.lane.b32.xlu1 %v8325_v54, %s7782_s13 }
 0x310   : > { %1463 = vrot.lane.b32.xlu0 %v8325_v54, %s7780_s27  ;;  %1159 = vrot.lane.b32.xlu1 %v8331_v55, %s7781_s23 }
 0x314   : > { %1165 = vrot.lane.b32.xlu0 %v8331_v55, %s7782_s13  ;;  %1171 = vrot.lane.b32.xlu1 %v8331_v55, %s7780_s27 }
 0x372   : > { %v1462_v61 = vpop.permute.xlu1 %1461  ;;  %v1450_v62 = vpop.permute.xlu0 %1449 }
 0x373   : > { %v1483_v1 = vcombine.low %v1450_v62, %v1462_v61  ;;  %v1484_v2 = vcombine.high %v1450_v62, %v1462_v61 }
 0x375   : > { %v1491_v8 = vrot.slane %v1483_v1, %v8342_v0  ;;  %v1498_v9 = vrot.slane %v1484_v2, %v8342_v0 }
 0x376   : > { %v1456_v3 = vpop.permute.xlu0 %1455  ;;  %v1158_v4 = vpop.permute.xlu1 %1157 }
 0x377   : > { %v1467_v5 = vcombine.low %v1106_v49, %v1456_v3  ;;  %v1468_v6 = vcombine.high %v1106_v49, %v1456_v3 }
 0x379   : > { %v1475_v10 = vrot.slane %v1467_v5, %v8342_v0  ;;  %v1482_v11 = vrot.slane %v1468_v6, %v8342_v0 }
 0x37a   : > { %v1164_v13 = vpop.permute.xlu0 %1163  ;;  %v1170_v14 = vpop.permute.xlu1 %1169 }
 0x37b   : > { %v1499_v15 = vcombine.low %v1475_v10, %v1491_v8  ;;  %v1500_v16 = vcombine.high %v1475_v10, %v1491_v8  ;;  %v1515_v17 = vcombine.low %v1482_v11, %v1498_v9  ;;  %v1516_v18 = vcombine.high %v1482_v11, %v1498_v9 }
 0x37c   : > { %v1175_v19 = vcombine.low %v1153_v50, %v1164_v13  ;;  %v1176_v20 = vcombine.high %v1153_v50, %v1164_v13  ;;  %v1191_v21 = vcombine.low %v1158_v4, %v1170_v14  ;;  %v1192_v22 = vcombine.high %v1158_v4, %v1170_v14 }
 0x37d   : > { %v1507_v23 = vrot.slane %v1499_v15, %v8345_v7  ;;  %v1514_v24 = vrot.slane %v1500_v16, %v8345_v7  ;;  %v1523_v25 = vrot.slane %v1515_v17, %v8345_v7  ;;  %v1530_v26 = vrot.slane %v1516_v18, %v8345_v7 }
 0x37e   : > { %v1183_v27 = vrot.slane %v1175_v19, %v8342_v0  ;;  %v1190_v28 = vrot.slane %v1176_v20, %v8342_v0  ;;  %v1199_v29 = vrot.slane %v1191_v21, %v8342_v0  ;;  %v1206_v30 = vrot.slane %v1192_v22, %v8342_v0  ;;  %v1452_v32 = vpop.permute.xlu0 %1451  ;;  %v1458_v33 = vpop.permute.xlu1 %1457 }
 0x37f   : > { %v1603_v38 = vcombine.low %v1507_v23, %v1514_v24  ;;  %v6339_v40 = vcombine.high %v1507_v23, %v1514_v24  ;;  %v1619_v44 = vcombine.low %v1523_v25, %v1530_v26  ;;  %v1535_v51 = vcombine.low %v8325_v54, %v1458_v33 }
 0x380   : > { %v1207_v34 = vcombine.low %v1183_v27, %v1199_v29  ;;  %v1208_v35 = vcombine.high %v1183_v27, %v1199_v29  ;;  %v1223_v36 = vcombine.low %v1190_v28, %v1206_v30  ;;  %v1224_v37 = vcombine.high %v1190_v28, %v1206_v30 }
 0x381   : > { %v1536_v52 = vcombine.high %v8325_v54, %v1458_v33  ;;  %v6340_v57 = vcombine.high %v1523_v25, %v1530_v26  ;;  %v1543_v61 = vrot.slane %v1535_v51, %v8342_v0  ;;  %v8370_v2 = vrot.slane %v1603_v38, %v8342_v0 }
 0x382   : > { %v1215_v45 = vrot.slane %v1207_v34, %v8345_v7  ;;  %v1222_v46 = vrot.slane %v1208_v35, %v8345_v7  ;;  %v1231_v47 = vrot.slane %v1223_v36, %v8345_v7  ;;  %v1238_v48 = vrot.slane %v1224_v37, %v8345_v7  ;;  %v1464_v49 = vpop.permute.xlu0 %1463  ;;  %v1160_v50 = vpop.permute.xlu1 %1159 }
 0x383   : > { %v1551_v53 = vcombine.low %v1452_v32, %v1464_v49  ;;  %v1552_v56 = vcombine.high %v1452_v32, %v1464_v49  ;;  %v1550_v62 = vrot.slane %v1536_v52, %v8342_v0  ;;  %v8373_v3 = vrot.slane %v6339_v40, %v8342_v0 }
 0x384   : > { %v1311_v58 = vcombine.low %v1215_v45, %v1222_v46  ;;  %v6335_v59 = vcombine.high %v1215_v45, %v1222_v46  ;;  %v1327_v60 = vcombine.low %v1231_v47, %v1238_v48  ;;  %v8376_v54 = vrot.slane %v1619_v44, %v8342_v0 }
 0x385   : > { %v1559_v63 = vrot.slane %v1551_v53, %v8342_v0  ;;  %v1566_v1 = vrot.slane %v1552_v56, %v8342_v0  ;;  %v6336_v4 = vcombine.high %v1231_v47, %v1238_v48  ;;  %v8379_v13 = vrot.slane %v6340_v57, %v8342_v0 }
 0x386   : > { %v1166_v10 = vpop.permute.xlu0 %1165  ;;  %v1172_v11 = vpop.permute.xlu1 %1171  ;;  %v8382_v14 = vrot.slane %v1311_v58, %v8342_v0  ;;  %v8385_v15 = vrot.slane %v6335_v59, %v8342_v0  ;;  %v8388_v16 = vrot.slane %v1327_v60, %v8342_v0  ;;  %v1635_v47 = vcombine.low %v8370_v2, %v8373_v3 }
 0x387   : > { %v1567_v5 = vcombine.low %v1543_v61, %v1559_v63  ;;  %v1568_v6 = vcombine.high %v1543_v61, %v1559_v63  ;;  %v1583_v8 = vcombine.low %v1550_v62, %v1566_v1  ;;  %v1584_v9 = vcombine.high %v1550_v62, %v1566_v1 }
 0x388   : > { %v1243_v21 = vcombine.low %v8331_v55, %v1166_v10  ;;  %v1244_v22 = vcombine.high %v8331_v55, %v1166_v10  ;;  %v1259_v23 = vcombine.low %v1160_v50, %v1172_v11  ;;  %v1260_v24 = vcombine.high %v1160_v50, %v1172_v11 }
 0x389   : > { %v1575_v17 = vrot.slane %v1567_v5, %v8345_v7  ;;  %v1582_v18 = vrot.slane %v1568_v6, %v8345_v7  ;;  %v1591_v19 = vrot.slane %v1583_v8, %v8345_v7  ;;  %v1598_v20 = vrot.slane %v1584_v9, %v8345_v7 }
 0x38a   : > { %v8397_v25 = vrot.slane %v6336_v4, %v8342_v0  ;;  %v1251_v29 = vrot.slane %v1243_v21, %v8342_v0  ;;  %v1258_v30 = vrot.slane %v1244_v22, %v8342_v0  ;;  %v1267_v32 = vrot.slane %v1259_v23, %v8342_v0 }
 0x38b   : > { %v1671_v26 = vcombine.low %v1575_v17, %v1582_v18  ;;  %v6341_v27 = vcombine.high %v1575_v17, %v1582_v18  ;;  %v1687_v28 = vcombine.low %v1591_v19, %v1598_v20  ;;  %v1274_v33 = vrot.slane %v1260_v24, %v8342_v0 }
 0x38c   : > { %v1343_v34 = vcombine.low %v8382_v14, %v8385_v15  ;;  %v6342_v36 = vcombine.high %v1591_v19, %v1598_v20  ;;  %v1275_v37 = vcombine.low %v1251_v29, %v1267_v32  ;;  %v1276_v38 = vcombine.high %v1251_v29, %v1267_v32 }
 0x38d   : > { %v1678_v55 = vrot.slane %v1671_v26, %v8342_v0  ;;  %v1686_v35 = vrot.slane %v6341_v27, %v8342_v0  ;;  %v1291_v40 = vcombine.low %v1258_v30, %v1274_v33  ;;  %v1292_v44 = vcombine.high %v1258_v30, %v1274_v33 }
 0x38e   : > { %v1359_v45 = vcombine.low %v8388_v16, %v8397_v25  ;;  %v1694_v46 = vrot.slane %v1687_v28, %v8342_v0  ;;  %v1651_v48 = vcombine.low %v8376_v54, %v8379_v13  ;;  %v1283_v49 = vrot.slane %v1275_v37, %v8345_v7 }
 0x38f   : > { %v1290_v50 = vrot.slane %v1276_v38, %v8345_v7  ;;  %v1299_v51 = vrot.slane %v1291_v40, %v8345_v7  ;;  %v1306_v52 = vrot.slane %v1292_v44, %v8345_v7  ;;  %v1702_v53 = vrot.slane %v6342_v36, %v8342_v0 }
 0x390   : > { %v1643_v56 = vrot.slane %v1635_v47, %v8345_v7  ;;  %v1659_v57 = vrot.slane %v1651_v48, %v8345_v7  ;;  %v1703_v58 = vcombine.low %v1678_v55, %v1686_v35  ;;  %v1351_v1 = vrot.slane %v1343_v34, %v8345_v7 }
 0x391   : > { %v1379_v59 = vcombine.low %v1283_v49, %v1290_v50  ;;  %v6337_v60 = vcombine.high %v1283_v49, %v1290_v50  ;;  %v1395_v61 = vcombine.low %v1299_v51, %v1306_v52  ;;  %v6338_v62 = vcombine.high %v1299_v51, %v1306_v52 }
 0x392   : > { %v1667_v63 = vcombine.low %v1643_v56, %v1659_v57  ;;  %v1367_v10 = vrot.slane %v1359_v45, %v8345_v7  ;;  %v8428_v11 = vrot.slane %v1703_v58, %v8345_v7  ;;  %v1719_v17 = vcombine.low %v1694_v46, %v1702_v53 }
 0x393   : > { %v1386_v4 = vrot.slane %v1379_v59, %v8342_v0  ;;  %v1394_v5 = vrot.slane %v6337_v60, %v8342_v0  ;;  %v1402_v6 = vrot.slane %v1395_v61, %v8342_v0  ;;  %v1410_v8 = vrot.slane %v6338_v62, %v8342_v0 }
 0x394   : > { %v2039_v9 = vpack.c.bf16 %v1667_v63, %v1667_v63  ;;  %v1668_v20 = vcombine.high %v1643_v56, %v1659_v57  ;;  %v1727_v22 = vrot.slane %v1719_v17, %v8345_v7  ;;  %v1636_v23 = vcombine.high %v8370_v2, %v8373_v3 }
 0x395   : > { %v1411_v18 = vcombine.low %v1386_v4, %v1394_v5  ;;  %v1427_v19 = vcombine.low %v1402_v6, %v1410_v8  ;;  %v1652_v24 = vcombine.high %v8376_v54, %v8379_v13  ;;  %v1375_v26 = vcombine.low %v1351_v1, %v1367_v10 }
 0x396   : > { %v2052_v21 = vsel %vm2047_vm2, %v2039_v9, 0  ;;  %v1735_v27 = vcombine.low %v8428_v11, %v1727_v22  ;;  %v1704_v28 = vcombine.high %v1678_v55, %v1686_v35  ;;  %v1720_v29 = vcombine.high %v1694_v46, %v1702_v53 }
 0x397   : > { %6900 = vmatpush3.bf16.xpose.msra.mxu1 %v2052_v21  ;;  %v2040_v30 = vpack.c.bf16 %v1668_v20, %v1668_v20  ;;  %v1650_v32 = vrot.slane %v1636_v23, %v8345_v7  ;;  %v8440_v33 = vrot.slane %v1411_v18, %v8345_v7  ;;  %v8443_v34 = vrot.slane %v1427_v19, %v8345_v7  ;;  %v1146_v18 = vpop.f32.mrf.mxu1 }
 0x398   : > { %6905 = vmatprep.subr.bf16.mxu1 %v7778_v31  ;;  %v2043_v2 = vpack.c.bf16 %v1735_v27, %v1735_v27  ;;  %v1666_v3 = vrot.slane %v1652_v24, %v8345_v7  ;;  %v1718_v54 = vrot.slane %v1704_v28, %v8345_v7  ;;  %v1734_v13 = vrot.slane %v1720_v29, %v8345_v7 }
 0x399   : > { %v2031_v36 = vpack.c.bf16 %v1375_v26, %v1375_v26  ;;  %v1412_v37 = vcombine.high %v1386_v4, %v1394_v5  ;;  %v1428_v38 = vcombine.high %v1402_v6, %v1410_v8  ;;  %v2098_v40 = vsel %vm2047_vm2, %v2040_v30, 0  ;;  %v6897_v21 = vpop.f32.mrf.mxu1 }
 0x39a   : > { %v2236_v55 = vsel %vm2047_vm2, %v2043_v2, 0  ;;  %v1737_v35 = vcombine.low %v1718_v54, %v1734_v13  ;;  %v1669_v44 = vcombine.low %v1650_v32, %v1666_v3  ;;  %v1443_v45 = vcombine.low %v8440_v33, %v8443_v34 }
 0x39b   : > { %6924 = vmatpush3.bf16.xpose.msra.mxu0 %v2236_v55  ;;  %v1344_v46 = vcombine.high %v8382_v14, %v8385_v15  ;;  %v1360_v47 = vcombine.high %v8388_v16, %v8397_v25  ;;  %v1376_v48 = vcombine.high %v1351_v1, %v1367_v10  ;;  %v1426_v52 = vrot.slane %v1412_v37, %v8345_v7  ;;  %v1149_v23 = vpop.f32.mrf.mxu1 }
 0x39c   : > { %6935 = vmatprep.subr.bf16.mxu0 %v7778_v31  ;;  %v2045_v49 = vpack.c.bf16 %v1737_v35, %v1737_v35  ;;  %v2041_v50 = vpack.c.bf16 %v1669_v44, %v1669_v44  ;;  %v2035_v51 = vpack.c.bf16 %v1443_v45, %v1443_v45  ;;  %v1442_v53 = vrot.slane %v1428_v38, %v8345_v7 }
 0x39d   : > { %v2032_v56 = vpack.c.bf16 %v1376_v48, %v1376_v48  ;;  %v1358_v14 = vrot.slane %v1344_v46, %v8345_v7  ;;  %v1374_v15 = vrot.slane %v1360_v47, %v8345_v7  ;;  %v1670_v25 = vcombine.high %v1650_v32, %v1666_v3  ;;  %v6898_v26 = vpop.f32.mrf.mxu1 }
 0x39e   : > { %6902 = vmatmul.mubr.msk.bf16.vlgmr.msra.gmra.mxu1 %vm2047_vm2, %v2031_v36  ;;  %v2328_v57 = vsel %vm2047_vm2, %v2045_v49, 0  ;;  %v2144_v16 = vsel %vm2047_vm2, %v2041_v50, 0  ;;  %v1445_v58 = vcombine.low %v1426_v52, %v1442_v53  ;;  %v1736_v1 = vcombine.high %v8428_v11, %v1727_v22 }
 0x39f   : > { %6906 = vmatpush3.bf16.xpose.msra.mxu1 %v2098_v40  ;;  %6907 = vmatprep.mubr.msk.bf16.mxu1 %vm7779_vm1, %v7778_v31  ;;  %v1377_v59 = vcombine.low %v1358_v14, %v1374_v15  ;;  %v2042_v60 = vpack.c.bf16 %v1670_v25, %v1670_v25  ;;  %v1378_v4 = vcombine.high %v1358_v14, %v1374_v15  ;;  %v8485_v6 = vsub.s32 2, %v8295_v39 }
 0x3a0   : > { %6911 = vmatprep.subr.bf16.mxu1 %v7778_v31  ;;  %v2037_v61 = vpack.c.bf16 %v1445_v58, %v1445_v58  ;;  %v2044_v5 = vpack.c.bf16 %v1736_v1, %v1736_v1  ;;  %v1738_v10 = vcombine.high %v1718_v54, %v1734_v13  ;;  %v1444_v17 = vcombine.high %v8440_v33, %v8443_v34 }
 0x3a1   : > { %v2033_v62 = vpack.c.bf16 %v1377_v59, %v1377_v59  ;;  %v2190_v63 = vsel %vm2047_vm2, %v2042_v60, 0  ;;  %v2034_v8 = vpack.c.bf16 %v1378_v4, %v1378_v4  ;;  %v937_v11 = vrot.slane %v8306_v43, %v8485_v6 }
 0x3a2   : > { %6926 = vmatmul.mubr.msk.bf16.vlgmr.msra.gmra.mxu0 %vm2047_vm2, %v2035_v51  ;;  %v2282_v9 = vsel %vm2047_vm2, %v2044_v5, 0  ;;  %v2046_v19 = vpack.c.bf16 %v1738_v10, %v1738_v10  ;;  %v2036_v22 = vpack.c.bf16 %v1444_v17, %v1444_v17  ;;  %v1446_v27 = vcombine.high %v1426_v52, %v1442_v53 }
 0x3a3   : > { %6936 = vmatpush3.bf16.xpose.msra.mxu0 %v2328_v57  ;;  %6937 = vmatprep.mubr.msk.bf16.mxu0 %vm7779_vm1, %v7778_v31  ;;  %v8496_v20 = vadd.f32 %v1146_v18, %v937_v11  ;;  %v8502_v24 = vadd.f32 %v1149_v23, %v937_v11 }
 0x3a4   : > { %6947 = vmatprep.subr.bf16.mxu0 %v7778_v31  ;;  %v2374_v43 = vsel %vm2047_vm2, %v2046_v19, 0  ;;  %v2038_v28 = vpack.c.bf16 %v1446_v27, %v1446_v27 }
 0x3a5   : > { %1741 = vrot.lane.b32.xlu1 %v8496_v20, %s7781_s23 }
 0x3a6   : > { %6908 = vmatmul.mubr.msk.bf16.vlgmr.msra.gmra.mxu1 %vm2047_vm2, %v2032_v56 }
 0x3a7   : > { %6912 = vmatpush3.bf16.xpose.msra.mxu1 %v2144_v16  ;;  %6913 = vmatprep.mubr.msk.bf16.mxu1 %vm7779_vm1, %v7778_v31 }
 0x3a8   : > { %6917 = vmatprep.subr.bf16.mxu1 %v7778_v31 }
 0x3aa   : > { %6938 = vmatmul.mubr.msk.bf16.vlgmr.msra.gmra.mxu0 %vm2047_vm2, %v2037_v61 }
 0x3ab   : > { %6949 = vmatprep.mubr.msk.bf16.mxu0 %vm7779_vm1, %v7778_v31 }
 0x3ae   : > { %6914 = vmatmul.mubr.msk.bf16.vlgmr.msra.gmra.mxu1 %vm2047_vm2, %v2033_v62 }
 0x3af   : > { %6918 = vmatpush3.bf16.xpose.msra.mxu1 %v2190_v63  ;;  %6919 = vmatprep.mubr.msk.bf16.mxu1 %vm7779_vm1, %v7778_v31 }
 0x3b0   : > { %6929 = vmatprep.subr.bf16.mxu1 %v7778_v31 }
 0x3b6   : > { %6920 = vmatmul.mubr.msk.bf16.vlgmr.msra.gmra.mxu1 %vm2047_vm2, %v2034_v8 }
 0x3b7   : > { %6930 = vmatpush3.bf16.xpose.msra.mxu1 %v2282_v9  ;;  %6931 = vmatprep.mubr.msk.bf16.mxu1 %vm7779_vm1, %v7778_v31 }
 0x3b8   : > { %6941 = vmatprep.subr.bf16.mxu1 %v7778_v31 }
 0x3be   : > { %6932 = vmatmul.mubr.msk.bf16.vlgmr.msra.gmra.mxu1 %vm2047_vm2, %v2036_v22 }
 0x3bf   : > { %6942 = vmatpush3.bf16.xpose.msra.mxu1 %v2374_v43  ;;  %6943 = vmatprep.mubr.msk.bf16.mxu1 %vm7779_vm1, %v7778_v31 }
 0x3c0   : > { %6953 = vmatprep.subr.bf16.mxu1 %v7778_v31 }
 0x3c6   : > { %6944 = vmatmul.mubr.msk.bf16.vlgmr.msra.gmra.mxu1 %vm2047_vm2, %v2038_v28 }
 0x3c7   : > { %6955 = vmatprep.mubr.msk.bf16.mxu1 %vm7779_vm1, %v7778_v31 }
 0x417   : > { %v1742_v10 = vpop.permute.xlu1 %1741 }
 0x45e   : > { %v2088_v29 = vpop.f32.mrf.mxu1 }
 0x45f   : > { %v2417_v30 = vsel %vm2416_vm3, %v2088_v29, -inf }
 0x460   : > { %2418 = vmax.xlane.f32.xlu0 %v2417_v30  ;;  %v6903_v32 = vpop.f32.mrf.mxu1 }
 0x462   : > { %v2091_v33 = vpop.f32.mrf.mxu1  ;;  %v2272_v2 = vpop.f32.mrf.mxu0 }
 0x463   : > { %v2429_v3 = vsel %vm2416_vm3, %v2272_v2, -inf }
 0x464   : > { %v6904_v34 = vpop.f32.mrf.mxu1  ;;  %2430 = vmax.xlane.f32.xlu1 %v2429_v3  ;;  %v6927_v13 = vpop.f32.mrf.mxu0 }
 0x466   : > { %v2134_v54 = vpop.f32.mrf.mxu1  ;;  %v2275_v55 = vpop.f32.mrf.mxu0 }
 0x467   : > { %v2420_v35 = vsel %vm2416_vm3, %v2134_v54, -inf }
 0x468   : > { %v6909_v36 = vpop.f32.mrf.mxu1  ;;  %2421 = vmax.xlane.f32.xlu1 %v2420_v35  ;;  %v6928_v38 = vpop.f32.mrf.mxu0 }
 0x46a   : > { %v2137_v37 = vpop.f32.mrf.mxu1  ;;  %v8513_v44 = vpop.f32.mrf.mxu0 }
 0x46b   : > { %v2435_v45 = vsel %vm2416_vm3, %v8513_v44, -inf }
 0x46c   : > { %v6910_v40 = vpop.f32.mrf.mxu1  ;;  %2436 = vmax.xlane.f32.xlu1 %v2435_v45  ;;  %v6939_v47 = vpop.f32.mrf.mxu0 }
 0x46e   : > { %v2180_v46 = vpop.f32.mrf.mxu1  ;;  %v2367_v50 = vpop.f32.mrf.mxu0 }
 0x46f   : > { %v2423_v48 = vsel %vm2416_vm3, %v2180_v46, -inf }
 0x470   : > { %2424 = vmax.xlane.f32.xlu0 %v2423_v48  ;;  %v6915_v49 = vpop.f32.mrf.mxu1  ;;  %v6940_v52 = vpop.f32.mrf.mxu0 }
 0x472   : > { %v2183_v51 = vpop.f32.mrf.mxu1 }
 0x474   : > { %v6916_v53 = vpop.f32.mrf.mxu1 }
 0x476   : > { %v2226_v56 = vpop.f32.mrf.mxu1 }
 0x477   : > { %v2426_v57 = vsel %vm2416_vm3, %v2226_v56, -inf }
 0x478   : > { %2427 = vmax.xlane.f32.xlu0 %v2426_v57  ;;  %v6921_v14 = vpop.f32.mrf.mxu1 }
 0x47a   : > { %v2229_v15 = vpop.f32.mrf.mxu1 }
 0x47c   : > { %v6922_v16 = vpop.f32.mrf.mxu1 }
 0x47d   : > { %1753 = vrot.lane.b32.xlu1 %v8496_v20, %s7780_s27 }
 0x47e   : > { %v8519_v25 = vpop.f32.mrf.mxu1 }
 0x47f   : > { %v2432_v58 = vsel %vm2416_vm3, %v8519_v25, -inf }
 0x480   : > { %2433 = vmax.xlane.f32.xlu0 %v2432_v58  ;;  %v6933_v59 = vpop.f32.mrf.mxu1 }
 0x482   : > { %v2321_v60 = vpop.f32.mrf.mxu1 }
 0x484   : > { %v6934_v61 = vpop.f32.mrf.mxu1 }
 0x486   : > { %v8525_v62 = vpop.f32.mrf.mxu1 }
 0x487   : > { %v2438_v63 = vsel %vm2416_vm3, %v8525_v62, -inf }
 0x488   : > { %2439 = vmax.xlane.f32.xlu0 %v2438_v63  ;;  %v6945_v1 = vpop.f32.mrf.mxu1 }
 0x48a   : > { %v2413_v4 = vpop.f32.mrf.mxu1 }
 0x48c   : > { %v6946_v5 = vpop.f32.mrf.mxu1 }
 0x49e   : > { %1747 = vrot.lane.b32.xlu0 %v8496_v20, %s7782_s13 }
 0x4e9   : > { %v2419_v8 = vpop.xlane.xlu0 %2418 }
 0x4ea   : > { %v2441_v9 = vsub.f32 %v2088_v29, %v2419_v8 }
 0x4ec   : > { %v2449_v11 = vmul.f32 1.442695, %v2441_v9 }
 0x4ed   : > { %v2431_v17 = vpop.xlane.xlu1 %2430 }
 0x4ee   : > { %7329 = vpow2.f32 %v2449_v11  ;;  %v2445_v18 = vsub.f32 %v2272_v2, %v2431_v17 }
 0x4f0   : > { %v2457_v19 = vmul.f32 1.442695, %v2445_v18 }
 0x4f1   : > { %v2422_v21 = vpop.xlane.xlu1 %2421 }
 0x4f2   : > { %7331 = vpow2.f32 %v2457_v19  ;;  %v2442_v22 = vsub.f32 %v2134_v54, %v2422_v21 }
 0x4f4   : > { %v2451_v23 = vmul.f32 1.442695, %v2442_v22 }
 0x4f5   : > { %v2437_v36 = vpop.xlane.xlu1 %2436 }
 0x4f6   : > { %7333 = vpow2.f32 %v2451_v23 }
 0x4f9   : > { %v2425_v43 = vpop.xlane.xlu0 %2424  ;;  %v1754_v37 = vpop.permute.xlu1 %1753 }
 0x4fa   : > { %v2443_v26 = vsub.f32 %v2180_v46, %v2425_v43  ;;  %v1775_v45 = vcombine.low %v1742_v10, %v1754_v37  ;;  %v1776_v46 = vcombine.high %v1742_v10, %v1754_v37 }
 0x4fb   : > { %v8531_v27 = vpop.eup %7329 }
 0x4fc   : > { %v2453_v28 = vmul.f32 1.442695, %v2443_v26  ;;  %v2465_v30 = vsel %vm2416_vm3, %v8531_v27, 0.0  ;;  %v1783_v51 = vrot.slane %v1775_v45, %v8342_v0  ;;  %v1790_v52 = vrot.slane %v1776_v46, %v8342_v0 }
 0x4fd   : > { %2466 = vadd.xlane.f32.xlu1 %v2465_v30  ;;  %v2447_v45 = vsub.f32 %v8513_v44, %v2437_v36 }
 0x4fe   : > { %7335 = vpow2.f32 %v2453_v28 }
 0x4ff   : > { %v8535_v29 = vpop.eup %7331  ;;  %v2461_v46 = vmul.f32 1.442695, %v2447_v45 }
 0x500   : > { %v2477_v34 = vsel %vm2416_vm3, %v8535_v29, 0.0 }
 0x501   : > { %v2428_v32 = vpop.xlane.xlu0 %2427  ;;  %2478 = vadd.xlane.f32.xlu0 %v2477_v34 }
 0x502   : > { %v2444_v33 = vsub.f32 %v2226_v56, %v2428_v32 }
 0x503   : > { %v8539_v3 = vpop.eup %7333 }
 0x504   : > { %v2455_v2 = vmul.f32 1.442695, %v2444_v33  ;;  %v2468_v54 = vsel %vm2416_vm3, %v8539_v3, 0.0 }
 0x505   : > { %2469 = vadd.xlane.f32.xlu0 %v2468_v54 }
 0x506   : > { %7337 = vpow2.f32 %v2455_v2 }
 0x509   : > { %v2434_v35 = vpop.xlane.xlu0 %2433 }
 0x50a   : > { %v2446_v2 = vsub.f32 %v8519_v25, %v2434_v35 }
 0x50b   : > { %v8543_v13 = vpop.eup %7335 }
 0x50c   : > { %v2471_v55 = vsel %vm2416_vm3, %v8543_v13, 0.0  ;;  %v2459_v37 = vmul.f32 1.442695, %v2446_v2 }
 0x50d   : > { %2472 = vadd.xlane.f32.xlu1 %v2471_v55 }
 0x50e   : > { %7339 = vpow2.f32 %v2459_v37 }
 0x50f   : > { %7341 = vpow2.f32 %v2461_v46 }
 0x511   : > { %v8547_v38 = vpop.xlane.xlu0 %2439 }
 0x512   : > { %v2448_v44 = vsub.f32 %v8525_v62, %v8547_v38 }
 0x513   : > { %v8549_v40 = vpop.eup %7337 }
 0x514   : > { %v2474_v47 = vsel %vm2416_vm3, %v8549_v40, 0.0  ;;  %v2463_v36 = vmul.f32 1.442695, %v2448_v44 }
 0x515   : > { %v1748_v48 = vpop.permute.xlu0 %1747  ;;  %2475 = vadd.xlane.f32.xlu0 %v2474_v47 }
 0x516   : > { %v1759_v49 = vcombine.low %v8496_v20, %v1748_v48  ;;  %v1760_v50 = vcombine.high %v8496_v20, %v1748_v48  ;;  %7343 = vpow2.f32 %v2463_v36 }
 0x518   : > { %v1767_v53 = vrot.slane %v1759_v49, %v8342_v0  ;;  %v1774_v56 = vrot.slane %v1760_v50, %v8342_v0 }
 0x51a   : > { %v1791_v57 = vcombine.low %v1767_v53, %v1783_v51  ;;  %v1792_v14 = vcombine.high %v1767_v53, %v1783_v51  ;;  %v1807_v15 = vcombine.low %v1774_v56, %v1790_v52  ;;  %v1808_v16 = vcombine.high %v1774_v56, %v1790_v52 }
 0x51b   : > { %v8581_v25 = vpop.eup %7339 }
 0x51c   : > { %v1799_v58 = vrot.slane %v1791_v57, %v8345_v7  ;;  %v1806_v59 = vrot.slane %v1792_v14, %v8345_v7  ;;  %v1815_v60 = vrot.slane %v1807_v15, %v8345_v7  ;;  %v1822_v20 = vrot.slane %v1808_v16, %v8345_v7  ;;  %v8585_v47 = vpop.eup %7341 }
 0x51d   : > { %v2480_v35 = vsel %vm2416_vm3, %v8581_v25, 0.0  ;;  %v2483_v48 = vsel %vm2416_vm3, %v8585_v47, 0.0 }
 0x51e   : > { %v1895_v61 = vcombine.low %v1799_v58, %v1806_v59  ;;  %v6343_v63 = vcombine.high %v1799_v58, %v1806_v59  ;;  %v1911_v1 = vcombine.low %v1815_v60, %v1822_v20  ;;  %v6344_v4 = vcombine.high %v1815_v60, %v1822_v20  ;;  %1749 = vrot.lane.b32.xlu1 %v8502_v24, %s7782_s13 }
 0x520   : > { %v1902_v5 = vrot.slane %v1895_v61, %v8342_v0  ;;  %v1910_v8 = vrot.slane %v6343_v63, %v8342_v0  ;;  %v1918_v9 = vrot.slane %v1911_v1, %v8342_v0  ;;  %v1926_v10 = vrot.slane %v6344_v4, %v8342_v0 }
 0x522   : > { %v1927_v11 = vcombine.low %v1902_v5, %v1910_v8  ;;  %v1943_v17 = vcombine.low %v1918_v9, %v1926_v10  ;;  %v1928_v18 = vcombine.high %v1902_v5, %v1910_v8  ;;  %v1944_v19 = vcombine.high %v1918_v9, %v1926_v10 }
 0x523   : > { %v8593_v49 = vpop.eup %7343 }
 0x524   : > { %v1935_v21 = vrot.slane %v1927_v11, %v8345_v7  ;;  %v1951_v22 = vrot.slane %v1943_v17, %v8345_v7  ;;  %v1942_v23 = vrot.slane %v1928_v18, %v8345_v7  ;;  %v1958_v43 = vrot.slane %v1944_v19, %v8345_v7 }
 0x525   : > { %v2486_v50 = vsel %vm2416_vm3, %v8593_v49, 0.0 }
 0x526   : > { %v1959_v26 = vcombine.low %v1935_v21, %v1951_v22  ;;  %v1960_v28 = vcombine.high %v1935_v21, %v1951_v22  ;;  %v1961_v30 = vcombine.low %v1942_v23, %v1958_v43  ;;  %v1962_v32 = vcombine.high %v1942_v23, %v1958_v43 }
 0x528   : > { %v2513_v33 = vpack.c.bf16 %v1959_v26, %v1959_v26  ;;  %v2514_v34 = vpack.c.bf16 %v1960_v28, %v1960_v28  ;;  %v2515_v14 = vpack.c.bf16 %v1961_v30, %v1961_v30 }
 0x52a   : > { %v2526_v54 = vsel %vm2524_vm4, %v2513_v33, 0  ;;  %v2572_v55 = vsel %vm2524_vm4, %v2514_v34, 0  ;;  %v2618_v38 = vsel %vm2524_vm4, %v2515_v14, 0 }
 0x52b   : > { %1743 = vrot.lane.b32.xlu0 %v8502_v24, %s7781_s23  ;;  %6948 = vmatpush3.bf16.msra.mxu0 %v2526_v54 }
 0x52c   : > { %6954 = vmatpush3.bf16.msra.mxu1 %v2572_v55  ;;  %6959 = vmatprep.subr.bf16.mxu0 %v7778_v31 }
 0x52d   : > { %6965 = vmatprep.subr.bf16.mxu1 %v7778_v31 }
 0x542   : > { %2481 = vadd.xlane.f32.xlu1 %v2480_v35 }
 0x54a   : > { %2484 = vadd.xlane.f32.xlu0 %v2483_v48 }
 0x553   : > { %1755 = vrot.lane.b32.xlu1 %v8502_v24, %s7780_s27 }
 0x577   : > { %2487 = vadd.xlane.f32.xlu1 %v2486_v50 }
 0x586   : > { %v2467_v51 = vpop.xlane.xlu1 %2466 }
 0x587   : > { %7345 = vrcp.f32 %v2467_v51 }
 0x58a   : > { %v2479_v52 = vpop.xlane.xlu0 %2478 }
 0x58e   : > { %v2470_v53 = vpop.xlane.xlu0 %2469 }
 0x58f   : > { %7347 = vrcp.f32 %v2470_v53 }
 0x594   : > { %v7346_v56 = vpop.eup %7345 }
 0x595   : > { %v2497_v57 = vmul.f32 %v7346_v56, %v8531_v27  ;;  %v2516_v27 = vpack.c.bf16 %v1962_v32, %v1962_v32 }
 0x596   : > { %v2473_v15 = vpop.xlane.xlu1 %2472 }
 0x597   : > { %7349 = vrcp.f32 %v2473_v15  ;;  %v2505_v62 = vpack.c.bf16 %v2497_v57, %v2497_v57  ;;  %v2664_v20 = vsel %vm2524_vm4, %v2516_v27, 0 }
 0x599   : > { %6950 = vmatmul.mubr.msk.bf16.vlgmr.msra.gmra.mxu0 %vm2416_vm3, %v2505_v62 }
 0x59a   : > { %6960 = vmatpush3.bf16.msra.mxu0 %v2618_v38  ;;  %6961 = vmatprep.mubr.msk.bf16.mxu0 %vm7779_vm1, %v7778_v31  ;;  %v1750_v8 = vpop.permute.xlu1 %1749 }
 0x59b   : > { %6971 = vmatprep.subr.bf16.mxu0 %v7778_v31  ;;  %v1828_v10 = vcombine.high %v8502_v24, %v1750_v8 }
 0x59c   : > { %v7348_v16 = vpop.eup %7347 }
 0x59d   : > { %v2498_v59 = vmul.f32 %v7348_v16, %v8539_v3 }
 0x59e   : > { %v2476_v58 = vpop.xlane.xlu0 %2475 }
 0x59f   : > { %7351 = vrcp.f32 %v2476_v58  ;;  %v2506_v60 = vpack.c.bf16 %v2498_v59, %v2498_v59 }
 0x5a0   : > { %7353 = vrcp.f32 %v2479_v52 }
 0x5a1   : > { %6956 = vmatmul.mubr.msk.bf16.vlgmr.msra.gmra.mxu1 %vm2416_vm3, %v2506_v60 }
 0x5a2   : > { %6966 = vmatpush3.bf16.msra.mxu1 %v2664_v20  ;;  %6967 = vmatprep.mubr.msk.bf16.mxu1 %vm7779_vm1, %v7778_v31  ;;  %v1744_v11 = vpop.permute.xlu0 %1743 }
 0x5a3   : > { %6977 = vmatprep.subr.bf16.mxu1 %v7778_v31 }
 0x5a4   : > { %v7350_v61 = vpop.eup %7349 }
 0x5a5   : > { %v2499_v63 = vmul.f32 %v7350_v61, %v8543_v13  ;;  %v1827_v13 = vcombine.low %v8502_v24, %v1750_v8 }
 0x5a7   : > { %v2507_v1 = vpack.c.bf16 %v2499_v63, %v2499_v63  ;;  %v1835_v21 = vrot.slane %v1827_v13, %v8342_v0 }
 0x5a9   : > { %6962 = vmatmul.mubr.msk.bf16.vlgmr.msra.gmra.mxu0 %vm2416_vm3, %v2507_v1 }
 0x5aa   : > { %6973 = vmatprep.mubr.msk.bf16.mxu0 %vm7779_vm1, %v7778_v31 }
 0x5ac   : > { %v7352_v3 = vpop.eup %7351 }
 0x5ad   : > { %v2500_v4 = vmul.f32 %v7352_v3, %v8549_v40  ;;  %v1842_v40 = vrot.slane %v1828_v10, %v8342_v0  ;;  %v7354_v53 = vpop.eup %7353 }
 0x5ae   : > { %v2501_v20 = vmul.f32 %v7354_v53, %v8535_v29 }
 0x5af   : > { %v2508_v5 = vpack.c.bf16 %v2500_v4, %v2500_v4 }
 0x5b0   : > { %v2509_v8 = vpack.c.bf16 %v2501_v20, %v2501_v20 }
 0x5b1   : > { %6968 = vmatmul.mubr.msk.bf16.vlgmr.msra.gmra.mxu1 %vm2416_vm3, %v2508_v5 }
 0x5b2   : > { %6979 = vmatprep.mubr.msk.bf16.mxu1 %vm7779_vm1, %v7778_v31 }
 0x5cb   : > { %v2482_v9 = vpop.xlane.xlu1 %2481 }
 0x5cc   : > { %7355 = vrcp.f32 %v2482_v9 }
 0x5cf   : > { %v1756_v17 = vpop.permute.xlu1 %1755 }
 0x5d0   : > { %v1843_v18 = vcombine.low %v1744_v11, %v1756_v17  ;;  %v1844_v19 = vcombine.high %v1744_v11, %v1756_v17 }
 0x5d2   : > { %v1851_v22 = vrot.slane %v1843_v18, %v8342_v0  ;;  %v1858_v23 = vrot.slane %v1844_v19, %v8342_v0 }
 0x5d3   : > { %v2485_v2 = vpop.xlane.xlu0 %2484 }
 0x5d4   : > { %v1859_v43 = vcombine.low %v1835_v21, %v1851_v22  ;;  %v1860_v26 = vcombine.high %v1835_v21, %v1851_v22  ;;  %v1875_v28 = vcombine.low %v1842_v40, %v1858_v23  ;;  %v1876_v30 = vcombine.high %v1842_v40, %v1858_v23 }
 0x5d5   : > { %7357 = vrcp.f32 %v2485_v2  ;;  %v7194_v2 = vld [vmem:[%s8239_s0 + $0x30] sm:$0xff]  }
 0x5d6   : > { %v1867_v24 = vrot.slane %v1859_v43, %v8345_v7  ;;  %v1874_v32 = vrot.slane %v1860_v26, %v8345_v7  ;;  %v1883_v33 = vrot.slane %v1875_v28, %v8345_v7  ;;  %v1890_v34 = vrot.slane %v1876_v30, %v8345_v7 }
 0x5d8   : > { %v1963_v54 = vcombine.low %v1867_v24, %v1874_v32  ;;  %v6345_v55 = vcombine.high %v1867_v24, %v1874_v32  ;;  %v1979_v37 = vcombine.low %v1883_v33, %v1890_v34  ;;  %v6346_v45 = vcombine.high %v1883_v33, %v1890_v34  ;;  %v7193_v33 = vld [vmem:[%s8239_s0 + $0x38] sm:$0xff]  }
 0x5d9   : > { %v7356_v62 = vpop.eup %7355 }
 0x5da   : > { %v1970_v46 = vrot.slane %v1963_v54, %v8342_v0  ;;  %v1978_v35 = vrot.slane %v6345_v55, %v8342_v0  ;;  %v1986_v48 = vrot.slane %v1979_v37, %v8342_v0  ;;  %v1994_v44 = vrot.slane %v6346_v45, %v8342_v0 }
 0x5db   : > { %v2502_v61 = vmul.f32 %v7356_v62, %v8581_v25 }
 0x5dc   : > { %v1995_v36 = vcombine.low %v1970_v46, %v1978_v35  ;;  %v2011_v50 = vcombine.low %v1986_v48, %v1994_v44  ;;  %v1996_v51 = vcombine.high %v1970_v46, %v1978_v35  ;;  %v2012_v52 = vcombine.high %v1986_v48, %v1994_v44  ;;  %v7195_v46 = vld [vmem:[%s8239_s0 + $0x28] sm:$0xff]  }
 0x5dd   : > { %v2510_v9 = vpack.c.bf16 %v2502_v61, %v2502_v61  ;;  %v7197_v61 = vld [vmem:[%s8239_s0 + $0x18] sm:$0xff]  }
 0x5de   : > { %v2003_v56 = vrot.slane %v1995_v36, %v8345_v7  ;;  %v2019_v57 = vrot.slane %v2011_v50, %v8345_v7  ;;  %v2010_v14 = vrot.slane %v1996_v51, %v8345_v7  ;;  %v2026_v15 = vrot.slane %v2012_v52, %v8345_v7 }
 0x5e0   : > { %v2027_v38 = vcombine.low %v2003_v56, %v2019_v57  ;;  %v2028_v16 = vcombine.high %v2003_v56, %v2019_v57  ;;  %v2029_v58 = vcombine.low %v2010_v14, %v2026_v15  ;;  %v2030_v59 = vcombine.high %v2010_v14, %v2026_v15  ;;  %v7196_v14 = vld [vmem:[%s8239_s0 + $0x20] sm:$0xff]  }
 0x5e2   : > { %v2517_v27 = vpack.c.bf16 %v2027_v38, %v2027_v38  ;;  %v2518_v60 = vpack.c.bf16 %v2028_v16, %v2028_v16  ;;  %v2519_v3 = vpack.c.bf16 %v2029_v58, %v2029_v58  ;;  %v2520_v4 = vpack.c.bf16 %v2030_v59, %v2030_v59  ;;  %v7358_v5 = vpop.eup %7357 }
 0x5e3   : > { %v2503_v13 = vmul.f32 %v7358_v5, %v8585_v47 }
 0x5e4   : > { %v2710_v63 = vsel %vm2524_vm4, %v2517_v27, 0  ;;  %v2756_v1 = vsel %vm2524_vm4, %v2518_v60, 0  ;;  %v2802_v29 = vsel %vm2524_vm4, %v2519_v3, 0  ;;  %v2848_v25 = vsel %vm2524_vm4, %v2520_v4, 0 }
 0x5e5   : > { %6972 = vmatpush3.bf16.msra.mxu0 %v2710_v63  ;;  %6978 = vmatpush3.bf16.msra.mxu1 %v2756_v1  ;;  %v2511_v10 = vpack.c.bf16 %v2503_v13, %v2503_v13 }
 0x5e6   : > { %6983 = vmatprep.subr.bf16.mxu0 %v7778_v31  ;;  %6989 = vmatprep.subr.bf16.mxu1 %v7778_v31 }
 0x5e8   : > { %6974 = vmatmul.mubr.msk.bf16.vlgmr.msra.gmra.mxu0 %vm2416_vm3, %v2509_v8  ;;  %6980 = vmatmul.mubr.msk.bf16.vlgmr.msra.gmra.mxu1 %vm2416_vm3, %v2510_v9 }
 0x5e9   : > { %6984 = vmatpush3.bf16.msra.mxu0 %v2802_v29  ;;  %6990 = vmatpush3.bf16.msra.mxu1 %v2848_v25  ;;  %v7198_v25 = vld [vmem:[%s8239_s0 + $0x10] sm:$0xff]  }
 0x5ea   : > { %6985 = vmatprep.mubr.msk.bf16.mxu0 %vm7779_vm1, %v7778_v31  ;;  %6991 = vmatprep.mubr.msk.bf16.mxu1 %vm7779_vm1, %v7778_v31 }
 0x5eb   : > { %6995 = vmatprep.subr.bf16.mxu0 %v7778_v31 }
 0x5f0   : > { %6986 = vmatmul.mubr.msk.bf16.vlgmr.msra.gmra.mxu0 %vm2416_vm3, %v2511_v10 }
 0x5f1   : > { %7011 = vmatprep.mubr.msk.bf16.mxu0 %vm7779_vm1, %v7778_v31  ;;  %6996 = vmatpush3.bf16.msra.mxu0 %v7193_v33 }
 0x5f2   : > { %6997 = vmatprep.subr.bf16.mxu0 %v7778_v31 }
 0x5f5   : > { %6998 = vmatpush3.bf16.msra.mxu0 %v7194_v2 }
 0x5f6   : > { %6999 = vmatprep.subr.bf16.mxu0 %v7778_v31 }
 0x5f9   : > { %7000 = vmatpush3.bf16.msra.mxu0 %v7195_v46 }
 0x5fa   : > { %7001 = vmatprep.subr.bf16.mxu0 %v7778_v31 }
 0x5fd   : > { %7002 = vmatpush3.bf16.msra.mxu0 %v7196_v14 }
 0x5fe   : > { %7003 = vmatprep.subr.bf16.mxu0 %v7778_v31 }
 0x600   : > { %v2488_v11 = vpop.xlane.xlu1 %2487 }
 0x601   : > { %7359 = vrcp.f32 %v2488_v11  ;;  %7004 = vmatpush3.bf16.msra.mxu0 %v7197_v61 }
 0x602   : > { %7005 = vmatprep.subr.bf16.mxu0 %v7778_v31 }
 0x605   : > { %7006 = vmatpush3.bf16.msra.mxu0 %v7198_v25 }
 0x606   : > { %7007 = vmatprep.subr.bf16.mxu0 %v7778_v31 }
 0x60e   : > { %v7360_v17 = vpop.eup %7359 }
 0x60f   : > { %v2504_v18 = vmul.f32 %v7360_v17, %v8593_v49 }
 0x611   : > { %v2512_v19 = vpack.c.bf16 %v2504_v18, %v2504_v18 }
 0x613   : > { %6992 = vmatmul.mubr.msk.bf16.vlgmr.msra.gmra.mxu1 %vm2416_vm3, %v2512_v19 }
 0x614   : > { %3600 = vmatprep.mubr.bf16.mxu1 %v7777_v12 }
 0x659   : > { %v2562_v47 = vpop.f32.mrf.mxu0 }
 0x65b   : > { %v6951_v21 = vpop.f32.mrf.mxu0 }
 0x65d   : > { %v2565_v40 = vpop.f32.mrf.mxu0 }
 0x65f   : > { %v6952_v22 = vpop.f32.mrf.mxu0 }
 0x661   : > { %v2608_v23 = vpop.f32.mrf.mxu1 }
 0x663   : > { %v6957_v43 = vpop.f32.mrf.mxu1 }
 0x665   : > { %v2611_v26 = vpop.f32.mrf.mxu1 }
 0x667   : > { %v6958_v30 = vpop.f32.mrf.mxu1 }
 0x669   : > { %v2654_v28 = vpop.f32.mrf.mxu0 }
 0x66a   : > { %v2890_v24 = vcombine.low %v2562_v47, %v2654_v28  ;;  %v2891_v32 = vcombine.high %v2562_v47, %v2654_v28 }
 0x66b   : > { %v6963_v49 = vpop.f32.mrf.mxu0 }
 0x66c   : > { %v2898_v48 = vrot.slane %v2890_v24, %v8342_v0  ;;  %v2905_v44 = vrot.slane %v2891_v32, %v8342_v0 }
 0x66d   : > { %v2657_v34 = vpop.f32.mrf.mxu0 }
 0x66f   : > { %v6964_v54 = vpop.f32.mrf.mxu0 }
 0x671   : > { %v2700_v55 = vpop.f32.mrf.mxu1 }
 0x672   : > { %v2906_v37 = vcombine.low %v2608_v23, %v2700_v55  ;;  %v2907_v45 = vcombine.high %v2608_v23, %v2700_v55 }
 0x673   : > { %v6969_v35 = vpop.f32.mrf.mxu1 }
 0x674   : > { %v2914_v36 = vrot.slane %v2906_v37, %v8342_v0  ;;  %v2921_v50 = vrot.slane %v2907_v45, %v8342_v0 }
 0x675   : > { %v2703_v51 = vpop.f32.mrf.mxu1 }
 0x676   : > { %v2922_v52 = vcombine.low %v2898_v48, %v2914_v36  ;;  %v2923_v53 = vcombine.high %v2898_v48, %v2914_v36  ;;  %v2938_v56 = vcombine.low %v2905_v44, %v2921_v50  ;;  %v2939_v57 = vcombine.high %v2905_v44, %v2921_v50 }
 0x677   : > { %v6970_v15 = vpop.f32.mrf.mxu1 }
 0x678   : > { %v2930_v62 = vrot.slane %v2922_v52, %v8345_v7  ;;  %v2937_v38 = vrot.slane %v2923_v53, %v8345_v7  ;;  %v2946_v16 = vrot.slane %v2938_v56, %v8345_v7  ;;  %v2953_v58 = vrot.slane %v2939_v57, %v8345_v7 }
 0x67a   : > { %v3026_v59 = vcombine.low %v2930_v62, %v2937_v38  ;;  %v6363_v27 = vcombine.high %v2930_v62, %v2937_v38  ;;  %v3042_v60 = vcombine.low %v2946_v16, %v2953_v58  ;;  %v6364_v20 = vcombine.high %v2946_v16, %v2953_v58 }
 0x67c   : > { %v3033_v63 = vrot.slane %v3026_v59, %v8342_v0  ;;  %v3041_v1 = vrot.slane %v6363_v27, %v8342_v0  ;;  %v3049_v3 = vrot.slane %v3042_v60, %v8342_v0  ;;  %v3057_v4 = vrot.slane %v6364_v20, %v8342_v0  ;;  %v7199_v60 = vld [vmem:[%s8239_s0 + $0x8] sm:$0xff]  }
 0x67d   : > { %7008 = vmatpush3.bf16.msra.mxu0 %v7199_v60 }
 0x67e   : > { %v3059_v5 = vcombine.high %v3033_v63, %v3041_v1  ;;  %v3075_v8 = vcombine.high %v3049_v3, %v3057_v4  ;;  %v3058_v9 = vcombine.low %v3033_v63, %v3041_v1  ;;  %v3074_v29 = vcombine.low %v3049_v3, %v3057_v4  ;;  %7009 = vmatprep.subr.bf16.mxu0 %v7778_v31 }
 0x680   : > { %v8681_v13 = vrot.slane %v3059_v5, %v8345_v7  ;;  %v8684_v10 = vrot.slane %v3075_v8, %v8345_v7  ;;  %v8687_v11 = vrot.slane %v3058_v9, %v8345_v7  ;;  %v8690_v17 = vrot.slane %v3074_v29, %v8345_v7 }
 0x682   : > { %v3092_v18 = vcombine.low %v8681_v13, %v8684_v10  ;;  %v3090_v19 = vcombine.low %v8687_v11, %v8690_v17  ;;  %v3091_v47 = vcombine.high %v8687_v11, %v8690_v17  ;;  %v3093_v21 = vcombine.high %v8681_v13, %v8684_v10  ;;  %v6367_v11 = vld [vmem:[%s663_s24] ss:$0 sm:$0xff] }
 0x6a8   : > { %v2746_v40 = vpop.f32.mrf.mxu0  ;;  %v2792_v22 = vpop.f32.mrf.mxu1 }
 0x6aa   : > { %v6975_v23 = vpop.f32.mrf.mxu0  ;;  %v6981_v43 = vpop.f32.mrf.mxu1 }
 0x6ac   : > { %v2749_v26 = vpop.f32.mrf.mxu0  ;;  %v2795_v28 = vpop.f32.mrf.mxu1 }
 0x6ae   : > { %v6976_v30 = vpop.f32.mrf.mxu0  ;;  %v6982_v24 = vpop.f32.mrf.mxu1 }
 0x6b0   : > { %v2838_v32 = vpop.f32.mrf.mxu0 }
 0x6b1   : > { %v2958_v2 = vcombine.low %v2746_v40, %v2838_v32  ;;  %v2959_v54 = vcombine.high %v2746_v40, %v2838_v32 }
 0x6b2   : > { %v6987_v49 = vpop.f32.mrf.mxu0 }
 0x6b3   : > { %v2966_v35 = vrot.slane %v2958_v2, %v8342_v0  ;;  %v2973_v48 = vrot.slane %v2959_v54, %v8342_v0 }
 0x6b4   : > { %v2841_v33 = vpop.f32.mrf.mxu0 }
 0x6b6   : > { %v6988_v34 = vpop.f32.mrf.mxu0 }
 0x6d3   : > { %v2884_v55 = vpop.f32.mrf.mxu1 }
 0x6d4   : > { %v2974_v37 = vcombine.low %v2792_v22, %v2884_v55  ;;  %v2975_v45 = vcombine.high %v2792_v22, %v2884_v55  ;;  %v7200_v22 = vld [vmem:[%s8239_s0] sm:$0xff]  }
 0x6d5   : > { %v6993_v46 = vpop.f32.mrf.mxu1  ;;  %7010 = vmatpush3.bf16.msra.mxu0 %v7200_v22  ;;  %v3374_v22 = vld [vmem:[%s8242_s18 + $0x280] sm:$0xff] }
 0x6d6   : > { %v2982_v44 = vrot.slane %v2974_v37, %v8342_v0  ;;  %v2989_v36 = vrot.slane %v2975_v45, %v8342_v0 }
 0x6d7   : > { %v2887_v50 = vpop.f32.mrf.mxu1 }
 0x6d8   : > { %v2990_v51 = vcombine.low %v2966_v35, %v2982_v44  ;;  %v2991_v52 = vcombine.high %v2966_v35, %v2982_v44  ;;  %v3006_v53 = vcombine.low %v2973_v48, %v2989_v36  ;;  %v3007_v56 = vcombine.high %v2973_v48, %v2989_v36  ;;  %v7369_v35 = vld [vmem:[#allocation2] sm:$0xff] }
 0x6d9   : > { %v6994_v57 = vpop.f32.mrf.mxu1 }
 0x6da   : > { %v2998_v14 = vrot.slane %v2990_v51, %v8345_v7  ;;  %v3005_v15 = vrot.slane %v2991_v52, %v8345_v7  ;;  %v3014_v62 = vrot.slane %v3006_v53, %v8345_v7  ;;  %v3021_v38 = vrot.slane %v3007_v56, %v8345_v7  ;;  %v7370_v51 = vld [vmem:[#allocation2 + $0x8] sm:$0xff]  ;;  %v3383_v57 = vld [vmem:[%s8242_s18 + $0x388] sm:$0xff] }
 0x6db   : > { %v3382_v53 = vld [vmem:[%s8242_s18 + $0x380] sm:$0xff] }
 0x6dc   : > { %v3094_v16 = vcombine.low %v2998_v14, %v3005_v15  ;;  %v6365_v58 = vcombine.high %v2998_v14, %v3005_v15  ;;  %v3110_v59 = vcombine.low %v3014_v62, %v3021_v38  ;;  %v6366_v27 = vcombine.high %v3014_v62, %v3021_v38  ;;  %v3384_v56 = vld [vmem:[%s8242_s18 + $0x3c0] sm:$0xff]  ;;  %v3385_v62 = vld [vmem:[%s8242_s18 + $0x3c8] sm:$0xff] }
 0x6dd   : > { %v6405_v14 = vcombine.low %v3382_v53, %v3384_v56  ;;  %v6406_v15 = vcombine.high %v3382_v53, %v3384_v56  ;;  %v6407_v38 = vcombine.low %v3383_v57, %v3385_v62 }
 0x6de   : > { %v3101_v20 = vrot.slane %v3094_v16, %v8342_v0  ;;  %v3109_v61 = vrot.slane %v6365_v58, %v8342_v0  ;;  %v3117_v63 = vrot.slane %v3110_v59, %v8342_v0  ;;  %v3125_v1 = vrot.slane %v6366_v27, %v8342_v0 }
 0x6df   : > { %v6408_v16 = vcombine.high %v3383_v57, %v3385_v62  ;;  %3568 = vmatprep.subr.bf16.mxu1 %v6406_v15  ;;  %v3361_v57 = vld [vmem:[%s8242_s18 + $0xc8] sm:$0xff]  ;;  %v3356_v15 = vld [vmem:[%s8242_s18 + $0x40] sm:$0xff] }
 0x6e0   : > { %v3127_v3 = vcombine.high %v3101_v20, %v3109_v61  ;;  %v3143_v4 = vcombine.high %v3117_v63, %v3125_v1  ;;  %v3126_v5 = vcombine.low %v3101_v20, %v3109_v61  ;;  %v3142_v8 = vcombine.low %v3117_v63, %v3125_v1  ;;  %3569 = vmatpush1.bf16.msra.mxu1 %v6405_v14  ;;  %v3354_v14 = vld [vmem:[%s8242_s18] sm:$0xff] }
 0x6e1   : > { %3611 = vmatprep.subr.bf16.mxu0 %v6408_v16  ;;  %v6378_v16 = vcombine.high %v3354_v14, %v3356_v15 }
 0x6e2   : > { %v3141_v9 = vrot.slane %v3127_v3, %v8345_v7  ;;  %v3157_v29 = vrot.slane %v3143_v4, %v8345_v7  ;;  %v3134_v25 = vrot.slane %v3126_v5, %v8345_v7  ;;  %v3150_v40 = vrot.slane %v3142_v8, %v8345_v7  ;;  %v3378_v3 = vld [vmem:[%s8242_s18 + $0x300] sm:$0xff]  ;;  %v3379_v5 = vld [vmem:[%s8242_s18 + $0x308] sm:$0xff] }
 0x6e3   : > { %v3380_v4 = vld [vmem:[%s8242_s18 + $0x340] sm:$0xff] }
 0x6e4   : > { %v3160_v23 = vcombine.low %v3141_v9, %v3157_v29  ;;  %v3159_v43 = vcombine.high %v3134_v25, %v3150_v40  ;;  %v3158_v26 = vcombine.low %v3134_v25, %v3150_v40  ;;  %v3161_v30 = vcombine.high %v3141_v9, %v3157_v29  ;;  %v3381_v9 = vld [vmem:[%s8242_s18 + $0x348] sm:$0xff] }
 0x6e5   : > { %v6402_v8 = vcombine.high %v3378_v3, %v3380_v4  ;;  %v6401_v29 = vcombine.low %v3378_v3, %v3380_v4  ;;  %v6403_v25 = vcombine.low %v3379_v5, %v3381_v9  ;;  %v6404_v40 = vcombine.high %v3379_v5, %v3381_v9  ;;  %v7202_v3 = vld [vmem:[%s8246_s14 + $0xf8] sm:$0xff]  }
 0x6e6   : > { %v7151_v0 = vpack.i.bf16 %v3160_v23, %v3092_v18  ;;  %v7146_v28 = vpack.i.bf16 %v3159_v43, %v3091_v47  ;;  %v7156_v31 = vpack.i.bf16 %v3161_v30, %v3093_v21  ;;  %v3376_v23 = vld [vmem:[%s8242_s18 + $0x2c0] sm:$0xff]  ;;  %v3375_v43 = vld [vmem:[%s8242_s18 + $0x288] sm:$0xff] }
 0x6e7   : > { %3570 = vmatprep.subr.bf16.mxu1 %v6402_v8 }
 0x6e8   : > { %7152 = vrot.lane.b32.xlu1 %v7151_v0, %s7782_s13  ;;  %7147 = vrot.lane.b32.xlu0 %v7146_v28, %s7780_s27  ;;  %v3377_v0 = vld [vmem:[%s8242_s18 + $0x2c8] sm:$0xff]  ;;  %v6397_v28 = vcombine.low %v3374_v22, %v3376_v23 }
 0x6e9   : > { %3571 = vmatpush1.bf16.msra.mxu1 %v6401_v29  ;;  %v6399_v30 = vcombine.low %v3375_v43, %v3377_v0 }
 0x6ec   : > { %7157 = vrot.lane.b32.xlu0 %v7156_v31, %s7781_s23  ;;  %v6400_v31 = vcombine.high %v3375_v43, %v3377_v0 }
 0x75a   : > { %v7153_v24 = vpop.permute.xlu1 %7152  ;;  %v7148_v7 = vpop.permute.xlu0 %7147 }
 0x75b   : > { %v7150_v32 = vunpack.i.h.bf16 %v7148_v7  ;;  %v7149_v49 = vunpack.i.l.bf16 %v7148_v7  ;;  %v7155_v33 = vunpack.i.h.bf16 %v7153_v24  ;;  %v7154_v34 = vunpack.i.l.bf16 %v7153_v24  ;;  %v3370_v24 = vld [vmem:[%s8242_s18 + $0x200] sm:$0xff] }
 0x75c   : > { %v3372_v7 = vld [vmem:[%s8242_s18 + $0x240] sm:$0xff] }
 0x75d   : > { %v3186_v18 = vsel %vm2047_vm2, %v3090_v19, %v7149_v49  ;;  %v3187_v47 = vsel %vm2047_vm2, %v3158_v26, %v7150_v32  ;;  %v6398_v26 = vcombine.high %v3374_v22, %v3376_v23  ;;  %v3371_v32 = vld [vmem:[%s8242_s18 + $0x208] sm:$0xff]  ;;  %v6394_v49 = vcombine.high %v3370_v24, %v3372_v7 }
 0x75e   : > { %v7158_v13 = vpop.permute.xlu0 %7157  ;;  %v3189_v2 = vsel %vm3188_vm5, %v3186_v18, %v7154_v34  ;;  %v3190_v54 = vsel %vm3188_vm5, %v3187_v47, %v7155_v33  ;;  %v3373_v33 = vld [vmem:[%s8242_s18 + $0x248] sm:$0xff]  ;;  %v6393_v34 = vcombine.low %v3370_v24, %v3372_v7 }
 0x75f   : > { %v7160_v10 = vunpack.i.h.bf16 %v7158_v13  ;;  %v7159_v21 = vunpack.i.l.bf16 %v7158_v13  ;;  %3572 = vmatprep.subr.bf16.mxu1 %v6398_v26  ;;  %v6395_v18 = vcombine.low %v3371_v32, %v3373_v33  ;;  %v6396_v47 = vcombine.high %v3371_v32, %v3373_v33  ;;  %v3366_v13 = vld [vmem:[%s8242_s18 + $0x180] sm:$0xff]  ;;  %v7203_v32 = vld [vmem:[%s8246_s14 + $0x38] sm:$0xff]   ;;  %v7205_v33 = vld [vmem:[%s8246_s14 + $0x70] sm:$0xff]  }
 0x760   : > { %3573 = vmatpush1.bf16.msra.mxu1 %v6397_v28 }
 0x761   : > { %v3192_v55 = vsel %vm3191_vm6, %v3189_v2, %v7159_v21  ;;  %v3193_v37 = vsel %vm3191_vm6, %v3190_v54, %v7160_v10  ;;  %3574 = vmatprep.subr.bf16.mxu1 %v6394_v49  ;;  %v3368_v10 = vld [vmem:[%s8242_s18 + $0x1c0] sm:$0xff]  ;;  %v3367_v21 = vld [vmem:[%s8242_s18 + $0x188] sm:$0xff]  ;;  %v7204_v49 = vld [vmem:[%s8246_s14 + $0xb8] sm:$0xff]  }
 0x762   : > { %v3194_v45 = vpack.c.bf16 %v3193_v37, %v3192_v55  ;;  %v6390_v2 = vcombine.high %v3366_v13, %v3368_v10  ;;  %v3369_v54 = vld [vmem:[%s8242_s18 + $0x1c8] sm:$0xff]  ;;  %v6389_v55 = vcombine.low %v3366_v13, %v3368_v10 }
 0x763   : > { %v6391_v37 = vcombine.low %v3367_v21, %v3369_v54  ;;  %v7210_v13 = vld [vmem:[%s8246_s14 + $0xe8] sm:$0xff]  }
 0x764   : > { %7012 = vmatmul.mubr.bf16.vlgmr.msra.gmra.mxu0 %v3194_v45  ;;  %3575 = vmatpush1.bf16.msra.mxu1 %v6393_v34  ;;  %v6392_v45 = vcombine.high %v3367_v21, %v3369_v54  ;;  %v7206_v34 = vld [vmem:[%s8246_s14 + $0xf0] sm:$0xff]   ;;  %v7211_v10 = vld [vmem:[%s8246_s14 + $0x28] sm:$0xff]   ;;  %v7214_v54 = vld [vmem:[%s8246_s14 + $0xe0] sm:$0xff]  }
 0x765   : > { %3643 = vmatprep.mubr.bf16.mxu0 %v7777_v12  ;;  %3612 = vmatpush1.bf16.msra.mxu0 %v6407_v38  ;;  %v7212_v21 = vld [vmem:[%s8246_s14 + $0xa8] sm:$0xff]  }
 0x766   : > { %3613 = vmatprep.subr.bf16.mxu0 %v6404_v40  ;;  %3576 = vmatprep.subr.bf16.mxu1 %v6390_v2  ;;  %v3307_v40 = vld [vmem:[%s8249_s19] sm:$0xf] }
 0x767   : > { %v3336_v23 = vrot.slane %v3307_v40, %v8300_v41  ;;  %v3342_v0 = vrot.slane %v3307_v40, %v8303_v42  ;;  %v7213_v2 = vld [vmem:[%s8246_s14 + $0x60] sm:$0xff]  }
 0x768   : > { %3577 = vmatpush1.bf16.msra.mxu1 %v6389_v55  ;;  %v7215_v55 = vld [vmem:[%s8246_s14 + $0x20] sm:$0xff]  }
 0x769   : > { %3614 = vmatpush1.bf16.msra.mxu0 %v6403_v25 }
 0x76a   : > { %3615 = vmatprep.subr.bf16.mxu0 %v6400_v31 }
 0x76d   : > { %3616 = vmatpush1.bf16.msra.mxu0 %v6399_v30 }
 0x76e   : > { %3617 = vmatprep.subr.bf16.mxu0 %v6396_v47  ;;  %v7209_v47 = vld [vmem:[%s8246_s14 + $0x68] sm:$0xff]  }
 0x771   : > { %3618 = vmatpush1.bf16.msra.mxu0 %v6395_v18  ;;  %v7208_v18 = vld [vmem:[%s8246_s14 + $0xb0] sm:$0xff]  }
 0x772   : > { %3619 = vmatprep.subr.bf16.mxu0 %v6392_v45  ;;  %v7217_v45 = vld [vmem:[%s8246_s14 + $0x58] sm:$0xff]  }
 0x775   : > { %3620 = vmatpush1.bf16.msra.mxu0 %v6391_v37  ;;  %v7216_v37 = vld [vmem:[%s8246_s14 + $0xa0] sm:$0xff]  }
 0x824   : > { %v3300_v17 = vpop.f32.mrf.mxu0 }
 0x825   : > { %v3301_v19 = vadd.f32 %v6367_v11, %v3300_v17  ;;  %v3364_v17 = vld [vmem:[%s8242_s18 + $0x140] sm:$0xff] }
 0x826   : > { %v7013_v46 = vpop.f32.mrf.mxu0 }
 0x827   : > { %v3308_v48 = vadd.f32 %v7369_v35, %v3301_v19  ;;  %v3363_v19 = vld [vmem:[%s8242_s18 + $0x108] sm:$0xff] }
 0x828   : > { %v3303_v44 = vpop.f32.mrf.mxu0  ;;  %v3365_v35 = vld [vmem:[%s8242_s18 + $0x148] sm:$0xff] }
 0x829   : > { %v3304_v36 = vadd.f32 %v6367_v11, %v3303_v44  ;;  %3310 = vadd.xlane.f32.xlu1 %v3308_v48  ;;  %v3362_v11 = vld [vmem:[%s8242_s18 + $0x100] sm:$0xff]  ;;  %v6387_v44 = vcombine.low %v3363_v19, %v3365_v35 }
 0x82a   : > { %v7014_v50 = vpop.f32.mrf.mxu0  ;;  %v6386_v46 = vcombine.high %v3362_v11, %v3364_v17 }
 0x82b   : > { %v3309_v52 = vadd.f32 %v7370_v51, %v3304_v36  ;;  %v6388_v36 = vcombine.high %v3363_v19, %v3365_v35  ;;  %v3358_v50 = vld [vmem:[%s8242_s18 + $0x80] sm:$0xff]  ;;  %v7220_v19 = vld [vmem:[%s8246_s14 + $0x98] sm:$0xff]   ;;  %v7222_v35 = vld [vmem:[%s8246_s14 + $0xd0] sm:$0xff]  }
 0x82c   : > { %3578 = vmatprep.subr.bf16.mxu1 %v6386_v46  ;;  %v3360_v51 = vld [vmem:[%s8242_s18 + $0xc0] sm:$0xff]  ;;  %v7221_v46 = vld [vmem:[%s8246_s14 + $0x50] sm:$0xff]  }
 0x82d   : > { %3312 = vadd.xlane.f32.xlu0 %v3309_v52  ;;  %3621 = vmatprep.subr.bf16.mxu0 %v6388_v36  ;;  %v6381_v53 = vcombine.low %v3358_v50, %v3360_v51  ;;  %v6382_v56 = vcombine.high %v3358_v50, %v3360_v51  ;;  %v7225_v36 = vld [vmem:[%s8246_s14 + $0x48] sm:$0xff]  }
 0x82e   : > { %3622 = vmatpush1.bf16.msra.mxu0 %v6387_v44  ;;  %v7224_v44 = vld [vmem:[%s8246_s14 + $0x90] sm:$0xff]   ;;  %v7226_v50 = vld [vmem:[%s8246_s14 + $0xc8] sm:$0xff]  }
 0x82f   : > { %v7227_v51 = vld [vmem:[%s8246_s14 + $0x8] sm:$0xff]  }
 0x8b2   : > { %v3311_v58 = vpop.xlane.xlu1 %3310 }
 0x8b3   : > { %v3315_v59 = vmul.f32 0.0078125, %v3311_v58  ;;  %v3355_v58 = vld [vmem:[%s8242_s18 + $0x8] sm:$0xff] }
 0x8b5   : > { %v8738_v27 = vsub.f32 %v3308_v48, %v3315_v59  ;;  %v6385_v48 = vcombine.low %v3362_v11, %v3364_v17  ;;  %v3357_v59 = vld [vmem:[%s8242_s18 + $0x48] sm:$0xff]  ;;  %v7218_v11 = vld [vmem:[%s8246_s14 + $0xd8] sm:$0xff]  }
 0x8b6   : > { %v3313_v60 = vpop.xlane.xlu0 %3312  ;;  %v7219_v17 = vld [vmem:[%s8246_s14 + $0x18] sm:$0xff]  }
 0x8b7   : > { %v3316_v20 = vmul.f32 0.0078125, %v3313_v60  ;;  %v3319_v61 = vmul.f32 %v8738_v27, %v8738_v27  ;;  %3579 = vmatpush1.bf16.msra.mxu1 %v6385_v48  ;;  %v6380_v60 = vcombine.high %v3355_v58, %v3357_v59  ;;  %v7223_v48 = vld [vmem:[%s8246_s14 + $0x10] sm:$0xff]  }
 0x8b8   : > { %3580 = vmatprep.subr.bf16.mxu1 %v6382_v56  ;;  %v7230_v56 = vld [vmem:[%s8246_s14 + $0xc0] sm:$0xff]  }
 0x8b9   : > { %v8742_v63 = vsub.f32 %v3309_v52, %v3316_v20  ;;  %3321 = vadd.xlane.f32.xlu0 %v3319_v61  ;;  %v3359_v52 = vld [vmem:[%s8242_s18 + $0x88] sm:$0xff]  ;;  %v6377_v20 = vcombine.low %v3354_v14, %v3356_v15  ;;  %v6379_v61 = vcombine.low %v3355_v58, %v3357_v59  ;;  %v7232_v14 = vld [vmem:[%s8246_s14 + $0x80] sm:$0xff]   ;;  %v4034_v15 = vld [vmem:[%s8242_s18 + $0x390] sm:$0xff] }
 0x8ba   : > { %v6383_v62 = vcombine.low %v3359_v52, %v3361_v57  ;;  %v6384_v38 = vcombine.high %v3359_v52, %v3361_v57  ;;  %v7228_v52 = vld [vmem:[%s8246_s14 + $0x88] sm:$0xff]   ;;  %v7231_v57 = vld [vmem:[%s8246_s14] sm:$0xff]   ;;  %v4037_v59 = vld [vmem:[%s8242_s18 + $0x3d8] sm:$0xff] }
 0x8bb   : > { %v3320_v1 = vmul.f32 %v8742_v63, %v8742_v63  ;;  %3581 = vmatpush1.bf16.msra.mxu1 %v6381_v53  ;;  %v7229_v53 = vld [vmem:[%s8246_s14 + $0x40] sm:$0xff]  }
 0x8bc   : > { %3623 = vmatprep.subr.bf16.mxu0 %v6384_v38  ;;  %3582 = vmatprep.subr.bf16.mxu1 %v6378_v16  ;;  %v4035_v38 = vld [vmem:[%s8242_s18 + $0x398] sm:$0xff] }
 0x8bd   : > { %3323 = vadd.xlane.f32.xlu1 %v3320_v1  ;;  %3624 = vmatpush1.bf16.msra.mxu0 %v6383_v62  ;;  %v7201_v1 = vld [vmem:[%s8246_s14 + $0x78] sm:$0xff]   ;;  %v4036_v62 = vld [vmem:[%s8242_s18 + $0x3d0] sm:$0xff] }
 0x8be   : > { %3625 = vmatprep.subr.bf16.mxu0 %v6380_v60  ;;  %v6469_v16 = vcombine.low %v4034_v15, %v4036_v62  ;;  %v6470_v58 = vcombine.high %v4034_v15, %v4036_v62  ;;  %v6471_v60 = vcombine.low %v4035_v38, %v4037_v59  ;;  %v4024_v15 = vld [vmem:[%s8242_s18 + $0x250] sm:$0xff]  ;;  %v4023_v62 = vld [vmem:[%s8242_s18 + $0x218] sm:$0xff] }
 0x8bf   : > { %3583 = vmatpush1.bf16.msra.mxu1 %v6377_v20  ;;  %v6472_v20 = vcombine.high %v4035_v38, %v4037_v59  ;;  %v4025_v38 = vld [vmem:[%s8242_s18 + $0x258] sm:$0xff] }
 0x8c0   : > { %6696 = vmatprep.subr.bf16.mxu1 %v7201_v1  ;;  %v3386_v1 = vld [vmem:[%s8244_s3] sm:$0xf] }
 0x8c1   : > { %3626 = vmatpush1.bf16.msra.mxu0 %v6379_v61  ;;  %v8826_v61 = vsub.s32 3, %v8295_v39 }
 0x8c2   : > { %6718 = vmatprep.subr.bf16.mxu0 %v7202_v3 }
 0x942   : > { %v3322_v4 = vpop.xlane.xlu0 %3321 }
 0x943   : > { %v3325_v5 = vmul.f32 0.0078125, %v3322_v4 }
 0x945   : > { %v3327_v8 = vadd.f32 1e-05, %v3325_v5  ;;  %v3395_v5 = vrot.slane %v3386_v1, %v8303_v42 }
 0x946   : > { %v3324_v9 = vpop.xlane.xlu1 %3323 }
 0x947   : > { %7361 = vrsqrt.f32 %v3327_v8  ;;  %v3326_v29 = vmul.f32 0.0078125, %v3324_v9  ;;  %v3403_v8 = vrot.slane %v3386_v1, %v8826_v61  ;;  %v3391_v9 = vrot.slane %v3386_v1, %v8300_v41 }
 0x949   : > { %v3328_v25 = vadd.f32 1e-05, %v3326_v29  ;;  %v3399_v29 = vrot.slane %v3386_v1, %v8485_v6  ;;  %v4020_v1 = vld [vmem:[%s8242_s18 + $0x1d0] sm:$0xff] }
 0x94b   : > { %7363 = vrsqrt.f32 %v3328_v25 }
 0x954   : > { %v7362_v22 = vpop.eup %7361 }
 0x955   : > { %v3331_v43 = vmul.f32 %v7362_v22, %v8738_v27 }
 0x957   : > { %v3337_v28 = vmul.f32 %v3336_v23, %v3331_v43 }
 0x958   : > { %v7364_v26 = vpop.eup %7363 }
 0x959   : > { %v3332_v30 = vmul.f32 %v7364_v26, %v8742_v63  ;;  %v8781_v24 = vadd.f32 %v3342_v0, %v3337_v28  ;;  %v7207_v63 = vld [vmem:[%s8246_s14 + $0x30] sm:$0xff]  }
 0x95b   : > { %v3338_v31 = vmul.f32 %v3336_v23, %v3332_v30 }
 0x95d   : > { %v8783_v7 = vadd.f32 %v3342_v0, %v3338_v31 }
 0x95f   : > { %v8789_v27 = vpack.c.bf16 %v8783_v7, %v8781_v24 }
 0x961   : > { %3601 = vmatmul.mubr.bf16.vlgmr.msra.gmra.mxu1 %v8789_v27  ;;  %3644 = vmatmul.mubr.bf16.vlgmr.msra.gmra.mxu0 %v8789_v27 }
 0x962   : > { %6697 = vmatpush3.bf16.msra.mxu1 %v7203_v32  ;;  %6719 = vmatpush3.bf16.msra.mxu0 %v7204_v49 }
 0x963   : > { %6698 = vmatprep.subr.bf16.mxu1 %v7205_v33  ;;  %6720 = vmatprep.subr.bf16.mxu0 %v7206_v34 }
 0x966   : > { %6699 = vmatpush3.bf16.msra.mxu1 %v7207_v63  ;;  %6721 = vmatpush3.bf16.msra.mxu0 %v7208_v18  ;;  %v4030_v18 = vld [vmem:[%s8242_s18 + $0x310] sm:$0xff] }
 0x967   : > { %6700 = vmatprep.subr.bf16.mxu1 %v7209_v47  ;;  %6722 = vmatprep.subr.bf16.mxu0 %v7210_v13  ;;  %v4032_v47 = vld [vmem:[%s8242_s18 + $0x350] sm:$0xff] }
 0x96a   : > { %6701 = vmatpush3.bf16.msra.mxu1 %v7211_v10  ;;  %6723 = vmatpush3.bf16.msra.mxu0 %v7212_v21 }
 0x96b   : > { %6702 = vmatprep.subr.bf16.mxu1 %v7213_v2  ;;  %6724 = vmatprep.subr.bf16.mxu0 %v7214_v54  ;;  %v4031_v54 = vld [vmem:[%s8242_s18 + $0x318] sm:$0xff] }
 0x96e   : > { %6703 = vmatpush3.bf16.msra.mxu1 %v7215_v55  ;;  %6725 = vmatpush3.bf16.msra.mxu0 %v7216_v37  ;;  %v4033_v55 = vld [vmem:[%s8242_s18 + $0x358] sm:$0xff] }
 0x96f   : > { %6704 = vmatprep.subr.bf16.mxu1 %v7217_v45  ;;  %6726 = vmatprep.subr.bf16.mxu0 %v7218_v11 }
 0x972   : > { %6705 = vmatpush3.bf16.msra.mxu1 %v7219_v17  ;;  %6727 = vmatpush3.bf16.msra.mxu0 %v7220_v19 }
 0x973   : > { %6706 = vmatprep.subr.bf16.mxu1 %v7221_v46  ;;  %6728 = vmatprep.subr.bf16.mxu0 %v7222_v35  ;;  %v6466_v35 = vcombine.high %v4030_v18, %v4032_v47 }
 0x976   : > { %6707 = vmatpush3.bf16.msra.mxu1 %v7223_v48  ;;  %6729 = vmatpush3.bf16.msra.mxu0 %v7224_v44  ;;  %v6468_v48 = vcombine.high %v4031_v54, %v4033_v55  ;;  %v4026_v44 = vld [vmem:[%s8242_s18 + $0x290] sm:$0xff] }
 0x977   : > { %6708 = vmatprep.subr.bf16.mxu1 %v7225_v36  ;;  %6730 = vmatprep.subr.bf16.mxu0 %v7226_v50  ;;  %v4028_v36 = vld [vmem:[%s8242_s18 + $0x2d0] sm:$0xff]  ;;  %v4027_v50 = vld [vmem:[%s8242_s18 + $0x298] sm:$0xff] }
 0x97a   : > { %6709 = vmatpush3.bf16.msra.mxu1 %v7227_v51  ;;  %6731 = vmatpush3.bf16.msra.mxu0 %v7228_v52  ;;  %v4029_v51 = vld [vmem:[%s8242_s18 + $0x2d8] sm:$0xff]  ;;  %v6465_v52 = vcombine.low %v4030_v18, %v4032_v47  ;;  %v4006_v18 = vld [vmem:[%s8242_s18 + $0x10] sm:$0xff] }
 0x97b   : > { %6710 = vmatprep.subr.bf16.mxu1 %v7229_v53  ;;  %6732 = vmatprep.subr.bf16.mxu0 %v7230_v56  ;;  %v6467_v53 = vcombine.low %v4031_v54, %v4033_v55  ;;  %v6462_v56 = vcombine.high %v4026_v44, %v4028_v36  ;;  %v4008_v47 = vld [vmem:[%s8242_s18 + $0x50] sm:$0xff] }
 0x97c   : > { %v6442_v54 = vcombine.high %v4006_v18, %v4008_v47 }
 0x97e   : > { %6711 = vmatpush3.bf16.msra.mxu1 %v7231_v57  ;;  %6733 = vmatpush3.bf16.msra.mxu0 %v7232_v14  ;;  %v6464_v57 = vcombine.high %v4027_v50, %v4029_v51  ;;  %v4022_v14 = vld [vmem:[%s8242_s18 + $0x210] sm:$0xff] }
 0x97f   : > { %4220 = vmatprep.subr.bf16.mxu1 %v6470_v58  ;;  %4263 = vmatprep.subr.bf16.mxu0 %v6472_v20  ;;  %v6463_v58 = vcombine.low %v4027_v50, %v4029_v51  ;;  %v6458_v59 = vcombine.high %v4022_v14, %v4024_v15  ;;  %v4018_v20 = vld [vmem:[%s8242_s18 + $0x190] sm:$0xff]  ;;  %v7241_v50 = vld [vmem:[%s8246_s14 + $0x168] sm:$0xff]  }
 0x980   : > { %v7242_v51 = vld [vmem:[%s8246_s14 + $0x1e8] sm:$0xff]  }
 0xa21   : > { %v3602_v3 = vpop.f32.mrf.mxu1  ;;  %v3645_v4 = vpop.f32.mrf.mxu0 }
 0xa22   : > { %v3603_v28 = vadd.f32 %v3602_v3, %v3391_v9  ;;  %v3646_v30 = vadd.f32 %v3645_v4, %v3399_v29  ;;  %v4019_v3 = vld [vmem:[%s8242_s18 + $0x198] sm:$0xff] }
 0xa23   : > { %v3604_v25 = vpop.f32.mrf.mxu1  ;;  %v3647_v40 = vpop.f32.mrf.mxu0  ;;  %v4021_v4 = vld [vmem:[%s8242_s18 + $0x1d8] sm:$0xff] }
 0xa24   : > { %v3605_v43 = vadd.f32 %v3604_v25, %v3395_v5  ;;  %v3648_v39 = vadd.f32 %v3647_v40, %v3403_v8  ;;  %v3654_v37 = vmax.f32 %v3603_v28, 0.0  ;;  %v3656_v45 = vmax.f32 %v3646_v30, 0.0  ;;  %v4014_v25 = vld [vmem:[%s8242_s18 + $0x110] sm:$0xff] }
 0xa25   : > { %v3606_v22 = vpop.f32.mrf.mxu1  ;;  %v3649_v23 = vpop.f32.mrf.mxu0  ;;  %v4016_v40 = vld [vmem:[%s8242_s18 + $0x150] sm:$0xff] }
 0xa26   : > { %v3607_v26 = vadd.f32 %v3606_v22, %v3391_v9  ;;  %v3650_v0 = vadd.f32 %v3649_v23, %v3399_v29  ;;  %v3655_v13 = vmax.f32 %v3605_v43, 0.0  ;;  %v3657_v10 = vmax.f32 %v3648_v39, 0.0  ;;  %v4015_v22 = vld [vmem:[%s8242_s18 + $0x118] sm:$0xff]  ;;  %v4010_v28 = vld [vmem:[%s8242_s18 + $0x90] sm:$0xff] }
 0xa27   : > { %v3608_v31 = vpop.f32.mrf.mxu1  ;;  %v3651_v32 = vpop.f32.mrf.mxu0  ;;  %v6454_v9 = vcombine.high %v4018_v20, %v4020_v1  ;;  %v6456_v29 = vcombine.high %v4019_v3, %v4021_v4  ;;  %v4017_v23 = vld [vmem:[%s8242_s18 + $0x158] sm:$0xff]  ;;  %v6453_v43 = vcombine.low %v4018_v20, %v4020_v1  ;;  %v6455_v39 = vcombine.low %v4019_v3, %v4021_v4  ;;  %v4012_v30 = vld [vmem:[%s8242_s18 + $0xd0] sm:$0xff]  ;;  %v7257_v3 = vld [vmem:[%s8246_s14 + $0x148] sm:$0xff]  }
 0xa28   : > { %v3609_v49 = vadd.f32 %v3608_v31, %v3395_v5  ;;  %v3652_v33 = vadd.f32 %v3651_v32, %v3403_v8  ;;  %v3658_v34 = vmax.f32 %v3607_v26, 0.0  ;;  %v3660_v63 = vmax.f32 %v3650_v0, 0.0  ;;  %v4011_v31 = vld [vmem:[%s8242_s18 + $0x98] sm:$0xff]  ;;  %v7255_v20 = vld [vmem:[%s8246_s14 + $0x110] sm:$0xff]   ;;  %v7258_v4 = vld [vmem:[%s8246_s14 + $0x1c8] sm:$0xff]  }
 0xa29   : > { %v6457_v5 = vcombine.low %v4022_v14, %v4024_v15  ;;  %v6459_v8 = vcombine.low %v4023_v62, %v4025_v38  ;;  %v6450_v26 = vcombine.high %v4014_v25, %v4016_v40  ;;  %v6452_v0 = vcombine.high %v4015_v22, %v4017_v23  ;;  %v4013_v32 = vld [vmem:[%s8242_s18 + $0xd8] sm:$0xff]  ;;  %v7247_v14 = vld [vmem:[%s8246_s14 + $0x120] sm:$0xff]   ;;  %v7256_v1 = vld [vmem:[%s8246_s14 + $0x190] sm:$0xff]  }
 0xa2a   : > { %v3659_v21 = vmax.f32 %v3609_v49, 0.0  ;;  %v3661_v2 = vmax.f32 %v3652_v33, 0.0  ;;  %v3662_v19 = vpack.c.bf16 %v3658_v34, %v3654_v37  ;;  %v3664_v46 = vpack.c.bf16 %v3660_v63, %v3656_v45  ;;  %v7248_v15 = vld [vmem:[%s8246_s14 + $0x1a0] sm:$0xff]  }
 0xa2b   : > { %v6449_v49 = vcombine.low %v4014_v25, %v4016_v40  ;;  %v6451_v33 = vcombine.low %v4015_v22, %v4017_v23  ;;  %v6446_v34 = vcombine.high %v4010_v28, %v4012_v30  ;;  %v6448_v63 = vcombine.high %v4011_v31, %v4013_v32  ;;  %v7263_v25 = vld [vmem:[%s8246_s14 + $0x100] sm:$0xff]  }
 0xa2c   : > { %v3663_v11 = vpack.c.bf16 %v3659_v21, %v3655_v13  ;;  %v3665_v17 = vpack.c.bf16 %v3661_v2, %v3657_v10  ;;  %v4007_v13 = vld [vmem:[%s8242_s18 + $0x18] sm:$0xff]  ;;  %v6445_v21 = vcombine.low %v4010_v28, %v4012_v30  ;;  %v6447_v2 = vcombine.low %v4011_v31, %v4013_v32  ;;  %v7264_v40 = vld [vmem:[%s8246_s14 + $0x180] sm:$0xff]  }
 0xa2d   : > { %v4009_v10 = vld [vmem:[%s8242_s18 + $0x58] sm:$0xff]  ;;  %v6441_v37 = vcombine.low %v4006_v18, %v4008_v47  ;;  %v8898_v22 = vld [vmem:[%s8242_s18 + $0x3a0] sm:$0xff] }
 0xa2e   : > { %3954 = vmatprep.mubr.bf16.mxu1 %v3663_v11  ;;  %3995 = vmatprep.mubr.bf16.mxu0 %v3665_v17  ;;  %v6444_v55 = vcombine.high %v4007_v13, %v4009_v10  ;;  %v6443_v45 = vcombine.low %v4007_v13, %v4009_v10  ;;  %v7233_v11 = vld [vmem:[%s8246_s14 + $0x178] sm:$0xff]   ;;  %v8901_v23 = vld [vmem:[%s8242_s18 + $0x3e0] sm:$0xff] }
 0xa2f   : > { %3955 = vmatmul.mubr.bf16.vlgmr.msra.gmra.mxu1 %v3662_v19  ;;  %3996 = vmatmul.mubr.bf16.vlgmr.msra.gmra.mxu0 %v3664_v46  ;;  %v7234_v17 = vld [vmem:[%s8246_s14 + $0x1f8] sm:$0xff]  }
 0xa30   : > { %4221 = vmatpush1.bf16.msra.mxu1 %v6469_v16  ;;  %4264 = vmatpush1.bf16.msra.mxu0 %v6471_v60  ;;  %v6461_v16 = vcombine.low %v4026_v44, %v4028_v36  ;;  %v6460_v60 = vcombine.high %v4023_v62, %v4025_v38  ;;  %v7235_v19 = vld [vmem:[%s8246_s14 + $0x138] sm:$0xff]   ;;  %v7239_v44 = vld [vmem:[%s8246_s14 + $0x130] sm:$0xff]  }
 0xa31   : > { %4222 = vmatprep.subr.bf16.mxu1 %v6466_v35  ;;  %4265 = vmatprep.subr.bf16.mxu0 %v6468_v48  ;;  %v7236_v46 = vld [vmem:[%s8246_s14 + $0x1b8] sm:$0xff]   ;;  %v7237_v35 = vld [vmem:[%s8246_s14 + $0x170] sm:$0xff]  }
 0xa32   : > { %4252 = vmatprep.mubr.bf16.mxu1 %v7777_v12  ;;  %4295 = vmatprep.mubr.bf16.mxu0 %v7777_v12  ;;  %v7238_v48 = vld [vmem:[%s8246_s14 + $0x1f0] sm:$0xff]   ;;  %v7249_v62 = vld [vmem:[%s8246_s14 + $0x158] sm:$0xff]  }
 0xa33   : > { %v7240_v36 = vld [vmem:[%s8246_s14 + $0x1b0] sm:$0xff]   ;;  %v7250_v38 = vld [vmem:[%s8246_s14 + $0x1d8] sm:$0xff]  }
 0xa34   : > { %4223 = vmatpush1.bf16.msra.mxu1 %v6465_v52  ;;  %4266 = vmatpush1.bf16.msra.mxu0 %v6467_v53  ;;  %v7243_v52 = vld [vmem:[%s8246_s14 + $0x128] sm:$0xff]  }
 0xa35   : > { %4224 = vmatprep.subr.bf16.mxu1 %v6462_v56  ;;  %4267 = vmatprep.subr.bf16.mxu0 %v6464_v57  ;;  %v7244_v53 = vld [vmem:[%s8246_s14 + $0x1a8] sm:$0xff]   ;;  %v7245_v56 = vld [vmem:[%s8246_s14 + $0x160] sm:$0xff]  }
 0xa36   : > { %v7246_v57 = vld [vmem:[%s8246_s14 + $0x1e0] sm:$0xff]  }
 0xa38   : > { %4225 = vmatpush1.bf16.msra.mxu1 %v6461_v16  ;;  %4268 = vmatpush1.bf16.msra.mxu0 %v6463_v58  ;;  %v7251_v16 = vld [vmem:[%s8246_s14 + $0x118] sm:$0xff]  }
 0xa39   : > { %4226 = vmatprep.subr.bf16.mxu1 %v6458_v59  ;;  %4269 = vmatprep.subr.bf16.mxu0 %v6460_v60  ;;  %v7252_v58 = vld [vmem:[%s8246_s14 + $0x198] sm:$0xff]   ;;  %v7253_v59 = vld [vmem:[%s8246_s14 + $0x150] sm:$0xff]  }
 0xa3a   : > { %v7254_v60 = vld [vmem:[%s8246_s14 + $0x1d0] sm:$0xff]  }
 0xa3c   : > { %4227 = vmatpush1.bf16.msra.mxu1 %v6457_v5  ;;  %4270 = vmatpush1.bf16.msra.mxu0 %v6459_v8  ;;  %v7259_v5 = vld [vmem:[%s8246_s14 + $0x108] sm:$0xff]  }
 0xa3d   : > { %4228 = vmatprep.subr.bf16.mxu1 %v6454_v9  ;;  %4271 = vmatprep.subr.bf16.mxu0 %v6456_v29  ;;  %v7260_v8 = vld [vmem:[%s8246_s14 + $0x188] sm:$0xff]   ;;  %v7261_v9 = vld [vmem:[%s8246_s14 + $0x140] sm:$0xff]  }
 0xa3e   : > { %v7262_v29 = vld [vmem:[%s8246_s14 + $0x1c0] sm:$0xff]  }
 0xa40   : > { %4229 = vmatpush1.bf16.msra.mxu1 %v6453_v43  ;;  %4272 = vmatpush1.bf16.msra.mxu0 %v6455_v39  ;;  %v8904_v43 = vld [vmem:[%s8242_s18 + $0x3a8] sm:$0xff]  ;;  %v6533_v39 = vcombine.low %v8898_v22, %v8901_v23 }
 0xa41   : > { %4230 = vmatprep.subr.bf16.mxu1 %v6450_v26  ;;  %4273 = vmatprep.subr.bf16.mxu0 %v6452_v0  ;;  %v6534_v26 = vcombine.high %v8898_v22, %v8901_v23  ;;  %v8911_v0 = vld [vmem:[%s8242_s18 + $0x3e8] sm:$0xff] }
 0xa42   : > { %v6535_v28 = vcombine.low %v8904_v43, %v8911_v0  ;;  %v6536_v30 = vcombine.high %v8904_v43, %v8911_v0  ;;  %v4670_v0 = vld [vmem:[%s8242_s18 + $0x1a0] sm:$0xff] }
 0xa44   : > { %4231 = vmatpush1.bf16.msra.mxu1 %v6449_v49  ;;  %4274 = vmatpush1.bf16.msra.mxu0 %v6451_v33 }
 0xa45   : > { %4232 = vmatprep.subr.bf16.mxu1 %v6446_v34  ;;  %4275 = vmatprep.subr.bf16.mxu0 %v6448_v63 }
 0xa48   : > { %4233 = vmatpush1.bf16.msra.mxu1 %v6445_v21  ;;  %4276 = vmatpush1.bf16.msra.mxu0 %v6447_v2 }
 0xa49   : > { %4234 = vmatprep.subr.bf16.mxu1 %v6442_v54  ;;  %4277 = vmatprep.subr.bf16.mxu0 %v6444_v55 }
 0xa4c   : > { %4235 = vmatpush1.bf16.msra.mxu1 %v6441_v37  ;;  %4278 = vmatpush1.bf16.msra.mxu0 %v6443_v45  ;;  %v4038_v37 = vld [vmem:[%s8244_s3 + $0x4] sm:$0xf] }
 0xa4d   : > { %6740 = vmatprep.subr.bf16.mxu1 %v7233_v11  ;;  %6762 = vmatprep.subr.bf16.mxu0 %v7234_v17  ;;  %v4047_v17 = vrot.slane %v4038_v37, %v8303_v42 }
 0xa4f   : > { %4253 = vmatmul.mubr.bf16.vlgmr.msra.gmra.mxu1 %v8789_v27  ;;  %4296 = vmatmul.mubr.bf16.vlgmr.msra.gmra.mxu0 %v8789_v27 }
 0xa50   : > { %6741 = vmatpush3.bf16.msra.mxu1 %v7235_v19  ;;  %6763 = vmatpush3.bf16.msra.mxu0 %v7236_v46  ;;  %v4055_v19 = vrot.slane %v4038_v37, %v8826_v61  ;;  %v4043_v46 = vrot.slane %v4038_v37, %v8300_v41 }
 0xa51   : > { %6742 = vmatprep.subr.bf16.mxu1 %v7237_v35  ;;  %6764 = vmatprep.subr.bf16.mxu0 %v7238_v48  ;;  %v4051_v35 = vrot.slane %v4038_v37, %v8485_v6  ;;  %v4676_v37 = vld [vmem:[%s8242_s18 + $0x260] sm:$0xff] }
 0xa54   : > { %6743 = vmatpush3.bf16.msra.mxu1 %v7239_v44  ;;  %6765 = vmatpush3.bf16.msra.mxu0 %v7240_v36 }
 0xa55   : > { %6744 = vmatprep.subr.bf16.mxu1 %v7241_v50  ;;  %6766 = vmatprep.subr.bf16.mxu0 %v7242_v51 }
 0xa58   : > { %6745 = vmatpush3.bf16.msra.mxu1 %v7243_v52  ;;  %6767 = vmatpush3.bf16.msra.mxu0 %v7244_v53 }
 0xa59   : > { %6746 = vmatprep.subr.bf16.mxu1 %v7245_v56  ;;  %6768 = vmatprep.subr.bf16.mxu0 %v7246_v57 }
 0xa5c   : > { %6747 = vmatpush3.bf16.msra.mxu1 %v7247_v14  ;;  %6769 = vmatpush3.bf16.msra.mxu0 %v7248_v15 }
 0xa5d   : > { %6748 = vmatprep.subr.bf16.mxu1 %v7249_v62  ;;  %6770 = vmatprep.subr.bf16.mxu0 %v7250_v38 }
 0xa60   : > { %6749 = vmatpush3.bf16.msra.mxu1 %v7251_v16  ;;  %6771 = vmatpush3.bf16.msra.mxu0 %v7252_v58 }
 0xa61   : > { %6750 = vmatprep.subr.bf16.mxu1 %v7253_v59  ;;  %6772 = vmatprep.subr.bf16.mxu0 %v7254_v60  ;;  %v4682_v60 = vld [vmem:[%s8242_s18 + $0x320] sm:$0xff] }
 0xa64   : > { %6751 = vmatpush3.bf16.msra.mxu1 %v7255_v20  ;;  %6773 = vmatpush3.bf16.msra.mxu0 %v7256_v1  ;;  %v4684_v20 = vld [vmem:[%s8242_s18 + $0x360] sm:$0xff] }
 0xa65   : > { %6752 = vmatprep.subr.bf16.mxu1 %v7257_v3  ;;  %6774 = vmatprep.subr.bf16.mxu0 %v7258_v4 }
 0xa68   : > { %6753 = vmatpush3.bf16.msra.mxu1 %v7259_v5  ;;  %6775 = vmatpush3.bf16.msra.mxu0 %v7260_v8  ;;  %v4683_v8 = vld [vmem:[%s8242_s18 + $0x328] sm:$0xff] }
 0xa69   : > { %6754 = vmatprep.subr.bf16.mxu1 %v7261_v9  ;;  %6776 = vmatprep.subr.bf16.mxu0 %v7262_v29  ;;  %v4685_v9 = vld [vmem:[%s8242_s18 + $0x368] sm:$0xff] }
 0xa6c   : > { %6755 = vmatpush3.bf16.msra.mxu1 %v7263_v25  ;;  %6777 = vmatpush3.bf16.msra.mxu0 %v7264_v40 }
 0xa6d   : > { %4872 = vmatprep.subr.bf16.mxu1 %v6534_v26  ;;  %4915 = vmatprep.subr.bf16.mxu0 %v6536_v30 }
 0xaef   : > { %v6712_v31 = vpop.f32.mrf.mxu1  ;;  %v6734_v32 = vpop.f32.mrf.mxu0 }
 0xaf1   : > { %v6713_v49 = vpop.f32.mrf.mxu1  ;;  %v6735_v33 = vpop.f32.mrf.mxu0 }
 0xaf2   : > { %v6714_v34 = vadd.f32 %v6713_v49, %v6712_v31  ;;  %v6736_v63 = vadd.f32 %v6735_v33, %v6734_v32  ;;  %v6530_v32 = vcombine.high %v4682_v60, %v4684_v20  ;;  %v6532_v49 = vcombine.high %v4683_v8, %v4685_v9  ;;  %v4678_v33 = vld [vmem:[%s8242_s18 + $0x2a0] sm:$0xff] }
 0xaf3   : > { %v6715_v18 = vpop.f32.mrf.mxu1  ;;  %v6737_v47 = vpop.f32.mrf.mxu0 }
 0xaf4   : > { %v8917_v13 = vadd.f32 %v6736_v63, %v6714_v34  ;;  %v4680_v34 = vld [vmem:[%s8242_s18 + $0x2e0] sm:$0xff]  ;;  %v4679_v63 = vld [vmem:[%s8242_s18 + $0x2a8] sm:$0xff] }
 0xaf5   : > { %v6716_v10 = vpop.f32.mrf.mxu1  ;;  %v6738_v21 = vpop.f32.mrf.mxu0  ;;  %v6525_v22 = vcombine.low %v4678_v33, %v4680_v34 }
 0xaf6   : > { %v6717_v2 = vadd.f32 %v6716_v10, %v6715_v18  ;;  %v6739_v54 = vadd.f32 %v6738_v21, %v6737_v47  ;;  %v4681_v18 = vld [vmem:[%s8242_s18 + $0x2e8] sm:$0xff]  ;;  %v6529_v47 = vcombine.low %v4682_v60, %v4684_v20  ;;  %v6531_v10 = vcombine.low %v4683_v8, %v4685_v9 }
 0xaf7   : > { %v6526_v21 = vcombine.high %v4678_v33, %v4680_v34  ;;  %v6527_v23 = vcombine.low %v4679_v63, %v4681_v18  ;;  %v7269_v33 = vld [vmem:[%s8246_s14 + $0x270] sm:$0xff]  }
 0xaf8   : > { %v8919_v55 = vadd.f32 %v6739_v54, %v6717_v2  ;;  %v6528_v2 = vcombine.high %v4679_v63, %v4681_v18  ;;  %v4674_v54 = vld [vmem:[%s8242_s18 + $0x220] sm:$0xff]  ;;  %v7270_v34 = vld [vmem:[%s8246_s14 + $0x2f0] sm:$0xff]  }
 0xaf9   : > { %v6522_v43 = vcombine.high %v4674_v54, %v4676_v37  ;;  %v7271_v63 = vld [vmem:[%s8246_s14 + $0x230] sm:$0xff]  }
 0xafa   : > { %v7272_v18 = vld [vmem:[%s8246_s14 + $0x2b0] sm:$0xff]  }
 0xb0f   : > { %v4254_v45 = vpop.f32.mrf.mxu1  ;;  %v4297_v11 = vpop.f32.mrf.mxu0 }
 0xb10   : > { %v4255_v57 = vadd.f32 %v4254_v45, %v4043_v46  ;;  %v4298_v14 = vadd.f32 %v4297_v11, %v4051_v35  ;;  %v4675_v45 = vld [vmem:[%s8242_s18 + $0x228] sm:$0xff] }
 0xb11   : > { %v4256_v48 = vpop.f32.mrf.mxu1  ;;  %v4299_v44 = vpop.f32.mrf.mxu0  ;;  %v4677_v11 = vld [vmem:[%s8242_s18 + $0x268] sm:$0xff] }
 0xb12   : > { %v4257_v51 = vadd.f32 %v4256_v48, %v4047_v17  ;;  %v4300_v52 = vadd.f32 %v4299_v44, %v4055_v19  ;;  %v4306_v29 = vmax.f32 %v4255_v57, 0.0  ;;  %v4308_v25 = vmax.f32 %v4298_v14, 0.0 }
 0xb13   : > { %v4258_v36 = vpop.f32.mrf.mxu1  ;;  %v4301_v50 = vpop.f32.mrf.mxu0 }
 0xb14   : > { %v4259_v53 = vadd.f32 %v4258_v36, %v4043_v46  ;;  %v4302_v56 = vadd.f32 %v4301_v50, %v4051_v35  ;;  %v4307_v1 = vmax.f32 %v4257_v51, 0.0  ;;  %v4309_v3 = vmax.f32 %v4300_v52, 0.0  ;;  %v4666_v36 = vld [vmem:[%s8242_s18 + $0x120] sm:$0xff]  ;;  %v4667_v51 = vld [vmem:[%s8242_s18 + $0x128] sm:$0xff] }
 0xb15   : > { %v4260_v15 = vpop.f32.mrf.mxu1  ;;  %v4303_v62 = vpop.f32.mrf.mxu0  ;;  %v6521_v46 = vcombine.low %v4674_v54, %v4676_v37  ;;  %v6523_v35 = vcombine.low %v4675_v45, %v4677_v11  ;;  %v4668_v50 = vld [vmem:[%s8242_s18 + $0x160] sm:$0xff]  ;;  %v4669_v52 = vld [vmem:[%s8242_s18 + $0x168] sm:$0xff] }
 0xb16   : > { %v4261_v38 = vadd.f32 %v4260_v15, %v4047_v17  ;;  %v4304_v16 = vadd.f32 %v4303_v62, %v4055_v19  ;;  %v4310_v58 = vmax.f32 %v4259_v53, 0.0  ;;  %v4312_v59 = vmax.f32 %v4302_v56, 0.0  ;;  %v4671_v17 = vld [vmem:[%s8242_s18 + $0x1a8] sm:$0xff]  ;;  %v4662_v15 = vld [vmem:[%s8242_s18 + $0xa0] sm:$0xff] }
 0xb17   : > { %v4673_v19 = vld [vmem:[%s8242_s18 + $0x1e8] sm:$0xff]  ;;  %v6514_v57 = vcombine.high %v4666_v36, %v4668_v50  ;;  %v6516_v14 = vcombine.high %v4667_v51, %v4669_v52  ;;  %v4664_v62 = vld [vmem:[%s8242_s18 + $0xe0] sm:$0xff] }
 0xb18   : > { %v4311_v4 = vmax.f32 %v4261_v38, 0.0  ;;  %v4313_v5 = vmax.f32 %v4304_v16, 0.0  ;;  %v4314_v30 = vpack.c.bf16 %v4310_v58, %v4306_v29  ;;  %v4316_v31 = vpack.c.bf16 %v4312_v59, %v4308_v25  ;;  %v4663_v38 = vld [vmem:[%s8242_s18 + $0xa8] sm:$0xff]  ;;  %v7277_v54 = vld [vmem:[%s8246_s14 + $0x260] sm:$0xff]  }
 0xb19   : > { %v6520_v44 = vcombine.high %v4671_v17, %v4673_v19  ;;  %v6519_v56 = vcombine.low %v4671_v17, %v4673_v19  ;;  %v4665_v16 = vld [vmem:[%s8242_s18 + $0xe8] sm:$0xff]  ;;  %v6513_v58 = vcombine.low %v4666_v36, %v4668_v50  ;;  %v6515_v59 = vcombine.low %v4667_v51, %v4669_v52  ;;  %v7278_v37 = vld [vmem:[%s8246_s14 + $0x2e0] sm:$0xff]   ;;  %v7287_v17 = vld [vmem:[%s8246_s14 + $0x210] sm:$0xff]  }
 0xb1a   : > { %v4315_v40 = vpack.c.bf16 %v4311_v4, %v4307_v1  ;;  %v4317_v26 = vpack.c.bf16 %v4313_v5, %v4309_v3  ;;  %v6510_v60 = vcombine.high %v4662_v15, %v4664_v62  ;;  %v6512_v20 = vcombine.high %v4663_v38, %v4665_v16  ;;  %v4658_v1 = vld [vmem:[%s8242_s18 + $0x20] sm:$0xff]  ;;  %v4659_v4 = vld [vmem:[%s8242_s18 + $0x28] sm:$0xff]  ;;  %v7288_v19 = vld [vmem:[%s8246_s14 + $0x290] sm:$0xff]  }
 0xb1b   : > { %v4660_v3 = vld [vmem:[%s8242_s18 + $0x60] sm:$0xff]  ;;  %v4661_v5 = vld [vmem:[%s8242_s18 + $0x68] sm:$0xff]  ;;  %v6509_v8 = vcombine.low %v4662_v15, %v4664_v62  ;;  %v6511_v9 = vcombine.low %v4663_v38, %v4665_v16  ;;  %v9010_v62 = vld [vmem:[%s8242_s18 + $0x3f8] sm:$0xff] }
 0xb1c   : > { %4606 = vmatprep.mubr.bf16.mxu1 %v4315_v40  ;;  %4647 = vmatprep.mubr.bf16.mxu0 %v4317_v26  ;;  %v6506_v29 = vcombine.high %v4658_v1, %v4660_v3  ;;  %v6508_v25 = vcombine.high %v4659_v4, %v4661_v5  ;;  %v6505_v40 = vcombine.low %v4658_v1, %v4660_v3  ;;  %v7293_v36 = vld [vmem:[%s8246_s14 + $0x240] sm:$0xff]  }
 0xb1d   : > { %4607 = vmatmul.mubr.bf16.vlgmr.msra.gmra.mxu1 %v4314_v30  ;;  %4648 = vmatmul.mubr.bf16.vlgmr.msra.gmra.mxu0 %v4316_v31  ;;  %v6507_v26 = vcombine.low %v4659_v4, %v4661_v5  ;;  %v7265_v30 = vld [vmem:[%s8246_s14 + $0x278] sm:$0xff]   ;;  %v7294_v50 = vld [vmem:[%s8246_s14 + $0x2c0] sm:$0xff]  }
 0xb1e   : > { %4873 = vmatpush1.bf16.msra.mxu1 %v6533_v39  ;;  %4916 = vmatpush1.bf16.msra.mxu0 %v6535_v28  ;;  %v6524_v39 = vcombine.high %v4675_v45, %v4677_v11  ;;  %v4672_v28 = vld [vmem:[%s8242_s18 + $0x1e0] sm:$0xff]  ;;  %v7266_v31 = vld [vmem:[%s8246_s14 + $0x2f8] sm:$0xff]  }
 0xb1f   : > { %4874 = vmatprep.subr.bf16.mxu1 %v6530_v32  ;;  %4917 = vmatprep.subr.bf16.mxu0 %v6532_v49  ;;  %v6518_v48 = vcombine.high %v4670_v0, %v4672_v28  ;;  %v6517_v53 = vcombine.low %v4670_v0, %v4672_v28  ;;  %v7267_v32 = vld [vmem:[%s8246_s14 + $0x238] sm:$0xff]   ;;  %v7279_v45 = vld [vmem:[%s8246_s14 + $0x220] sm:$0xff]   ;;  %v7285_v0 = vld [vmem:[%s8246_s14 + $0x250] sm:$0xff]  }
 0xb20   : > { %4904 = vmatprep.mubr.bf16.mxu1 %v7777_v12  ;;  %4947 = vmatprep.mubr.bf16.mxu0 %v7777_v12  ;;  %v7268_v49 = vld [vmem:[%s8246_s14 + $0x2b8] sm:$0xff]   ;;  %v7280_v11 = vld [vmem:[%s8246_s14 + $0x2a0] sm:$0xff]   ;;  %v7286_v28 = vld [vmem:[%s8246_s14 + $0x2d0] sm:$0xff]  }
 0xb21   : > { %v7295_v51 = vld [vmem:[%s8246_s14 + $0x200] sm:$0xff]  }
 0xb22   : > { %4875 = vmatpush1.bf16.msra.mxu1 %v6529_v47  ;;  %4918 = vmatpush1.bf16.msra.mxu0 %v6531_v10  ;;  %v7273_v47 = vld [vmem:[%s8246_s14 + $0x268] sm:$0xff]   ;;  %v7296_v52 = vld [vmem:[%s8246_s14 + $0x280] sm:$0xff]  }
 0xb23   : > { %4876 = vmatprep.subr.bf16.mxu1 %v6526_v21  ;;  %4919 = vmatprep.subr.bf16.mxu0 %v6528_v2  ;;  %v7274_v10 = vld [vmem:[%s8246_s14 + $0x2e8] sm:$0xff]  }
 0xb24   : > { %v7275_v21 = vld [vmem:[%s8246_s14 + $0x228] sm:$0xff]  }
 0xb25   : > { %v7276_v2 = vld [vmem:[%s8246_s14 + $0x2a8] sm:$0xff]  }
 0xb26   : > { %4877 = vmatpush1.bf16.msra.mxu1 %v6525_v22  ;;  %4920 = vmatpush1.bf16.msra.mxu0 %v6527_v23  ;;  %v7281_v22 = vld [vmem:[%s8246_s14 + $0x258] sm:$0xff]  }
 0xb27   : > { %4878 = vmatprep.subr.bf16.mxu1 %v6522_v43  ;;  %4921 = vmatprep.subr.bf16.mxu0 %v6524_v39  ;;  %v7282_v23 = vld [vmem:[%s8246_s14 + $0x2d8] sm:$0xff]  }
 0xb28   : > { %v7283_v43 = vld [vmem:[%s8246_s14 + $0x218] sm:$0xff]  }
 0xb29   : > { %v7284_v39 = vld [vmem:[%s8246_s14 + $0x298] sm:$0xff]  }
 0xb2a   : > { %4879 = vmatpush1.bf16.msra.mxu1 %v6521_v46  ;;  %4922 = vmatpush1.bf16.msra.mxu0 %v6523_v35  ;;  %v7289_v46 = vld [vmem:[%s8246_s14 + $0x248] sm:$0xff]  }
 0xb2b   : > { %4880 = vmatprep.subr.bf16.mxu1 %v6518_v48  ;;  %4923 = vmatprep.subr.bf16.mxu0 %v6520_v44  ;;  %v7290_v35 = vld [vmem:[%s8246_s14 + $0x2c8] sm:$0xff]  }
 0xb2c   : > { %v7291_v48 = vld [vmem:[%s8246_s14 + $0x208] sm:$0xff]  }
 0xb2d   : > { %v7292_v44 = vld [vmem:[%s8246_s14 + $0x288] sm:$0xff]  }
 0xb2e   : > { %4881 = vmatpush1.bf16.msra.mxu1 %v6517_v53  ;;  %4924 = vmatpush1.bf16.msra.mxu0 %v6519_v56  ;;  %v8997_v53 = vld [vmem:[%s8242_s18 + $0x3b0] sm:$0xff] }
 0xb2f   : > { %4882 = vmatprep.subr.bf16.mxu1 %v6514_v57  ;;  %4925 = vmatprep.subr.bf16.mxu0 %v6516_v14  ;;  %v9000_v56 = vld [vmem:[%s8242_s18 + $0x3f0] sm:$0xff]  ;;  %v9003_v57 = vld [vmem:[%s8242_s18 + $0x3b8] sm:$0xff] }
 0xb30   : > { %v6597_v14 = vcombine.low %v8997_v53, %v9000_v56  ;;  %v6598_v15 = vcombine.high %v8997_v53, %v9000_v56  ;;  %v6599_v38 = vcombine.low %v9003_v57, %v9010_v62  ;;  %v6600_v16 = vcombine.high %v9003_v57, %v9010_v62  ;;  %v5322_v62 = vld [vmem:[%s8242_s18 + $0x1b0] sm:$0xff] }
 0xb32   : > { %4883 = vmatpush1.bf16.msra.mxu1 %v6513_v58  ;;  %4926 = vmatpush1.bf16.msra.mxu0 %v6515_v59 }
 0xb33   : > { %4884 = vmatprep.subr.bf16.mxu1 %v6510_v60  ;;  %4927 = vmatprep.subr.bf16.mxu0 %v6512_v20  ;;  %v6376_v60 = vld [vmem:[%s698_s21] ss:$0 sm:$0xff] }
 0xb36   : > { %4885 = vmatpush1.bf16.msra.mxu1 %v6509_v8  ;;  %4928 = vmatpush1.bf16.msra.mxu0 %v6511_v9  ;;  %v4004_v9 = vadd.f32 %v6376_v60, %v8917_v13 }
 0xb37   : > { %4886 = vmatprep.subr.bf16.mxu1 %v6506_v29  ;;  %4929 = vmatprep.subr.bf16.mxu0 %v6508_v25 }
 0xb3a   : > { %4887 = vmatpush1.bf16.msra.mxu1 %v6505_v40  ;;  %4930 = vmatpush1.bf16.msra.mxu0 %v6507_v26 }
 0xb3b   : > { %6784 = vmatprep.subr.bf16.mxu1 %v7265_v30  ;;  %6806 = vmatprep.subr.bf16.mxu0 %v7266_v31 }
 0xb3d   : > { %4905 = vmatmul.mubr.bf16.vlgmr.msra.gmra.mxu1 %v8789_v27  ;;  %4948 = vmatmul.mubr.bf16.vlgmr.msra.gmra.mxu0 %v8789_v27 }
 0xb3e   : > { %6785 = vmatpush3.bf16.msra.mxu1 %v7267_v32  ;;  %6807 = vmatpush3.bf16.msra.mxu0 %v7268_v49  ;;  %v4005_v32 = vadd.f32 %v6376_v60, %v8919_v55 }
 0xb3f   : > { %6786 = vmatprep.subr.bf16.mxu1 %v7269_v33  ;;  %6808 = vmatprep.subr.bf16.mxu0 %v7270_v34  ;;  %v4690_v34 = vld [vmem:[%s8244_s3 + $0x8] sm:$0xf] }
 0xb40   : > { %v4695_v13 = vrot.slane %v4690_v34, %v8300_v41 }
 0xb42   : > { %6787 = vmatpush3.bf16.msra.mxu1 %v7271_v63  ;;  %6809 = vmatpush3.bf16.msra.mxu0 %v7272_v18 }
 0xb43   : > { %6788 = vmatprep.subr.bf16.mxu1 %v7273_v47  ;;  %6810 = vmatprep.subr.bf16.mxu0 %v7274_v10  ;;  %v4699_v47 = vrot.slane %v4690_v34, %v8303_v42  ;;  %v4707_v10 = vrot.slane %v4690_v34, %v8826_v61 }
 0xb46   : > { %6789 = vmatpush3.bf16.msra.mxu1 %v7275_v21  ;;  %6811 = vmatpush3.bf16.msra.mxu0 %v7276_v2  ;;  %v4703_v21 = vrot.slane %v4690_v34, %v8485_v6  ;;  %v5328_v34 = vld [vmem:[%s8242_s18 + $0x270] sm:$0xff] }
 0xb47   : > { %6790 = vmatprep.subr.bf16.mxu1 %v7277_v54  ;;  %6812 = vmatprep.subr.bf16.mxu0 %v7278_v37 }
 0xb4a   : > { %6791 = vmatpush3.bf16.msra.mxu1 %v7279_v45  ;;  %6813 = vmatpush3.bf16.msra.mxu0 %v7280_v11 }
 0xb4b   : > { %6792 = vmatprep.subr.bf16.mxu1 %v7281_v22  ;;  %6814 = vmatprep.subr.bf16.mxu0 %v7282_v23 }
 0xb4e   : > { %6793 = vmatpush3.bf16.msra.mxu1 %v7283_v43  ;;  %6815 = vmatpush3.bf16.msra.mxu0 %v7284_v39 }
 0xb4f   : > { %6794 = vmatprep.subr.bf16.mxu1 %v7285_v0  ;;  %6816 = vmatprep.subr.bf16.mxu0 %v7286_v28 }
 0xb52   : > { %6795 = vmatpush3.bf16.msra.mxu1 %v7287_v17  ;;  %6817 = vmatpush3.bf16.msra.mxu0 %v7288_v19 }
 0xb53   : > { %6796 = vmatprep.subr.bf16.mxu1 %v7289_v46  ;;  %6818 = vmatprep.subr.bf16.mxu0 %v7290_v35 }
 0xb56   : > { %6797 = vmatpush3.bf16.msra.mxu1 %v7291_v48  ;;  %6819 = vmatpush3.bf16.msra.mxu0 %v7292_v44  ;;  %v5334_v48 = vld [vmem:[%s8242_s18 + $0x330] sm:$0xff] }
 0xb57   : > { %6798 = vmatprep.subr.bf16.mxu1 %v7293_v36  ;;  %6820 = vmatprep.subr.bf16.mxu0 %v7294_v50  ;;  %v5336_v44 = vld [vmem:[%s8242_s18 + $0x370] sm:$0xff] }
 0xb5a   : > { %6799 = vmatpush3.bf16.msra.mxu1 %v7295_v51  ;;  %6821 = vmatpush3.bf16.msra.mxu0 %v7296_v52 }
 0xb5b   : > { %5524 = vmatprep.subr.bf16.mxu1 %v6598_v15  ;;  %5567 = vmatprep.subr.bf16.mxu0 %v6600_v16  ;;  %v5335_v15 = vld [vmem:[%s8242_s18 + $0x338] sm:$0xff] }
 0xb5c   : > { %v5337_v16 = vld [vmem:[%s8242_s18 + $0x378] sm:$0xff] }
 0xbdd   : > { %v6756_v58 = vpop.f32.mrf.mxu1  ;;  %v6778_v59 = vpop.f32.mrf.mxu0 }
 0xbdf   : > { %v6757_v20 = vpop.f32.mrf.mxu1  ;;  %v6779_v1 = vpop.f32.mrf.mxu0 }
 0xbe0   : > { %v6758_v3 = vadd.f32 %v6757_v20, %v6756_v58  ;;  %v6780_v4 = vadd.f32 %v6779_v1, %v6778_v59 }
 0xbe1   : > { %v6759_v5 = vpop.f32.mrf.mxu1  ;;  %v6781_v8 = vpop.f32.mrf.mxu0 }
 0xbe2   : > { %v4650_v29 = vadd.f32 %v6780_v4, %v6758_v3  ;;  %v6594_v4 = vcombine.high %v5334_v48, %v5336_v44 }
 0xbe3   : > { %v6760_v25 = vpop.f32.mrf.mxu1  ;;  %v6782_v40 = vpop.f32.mrf.mxu0 }
 0xbe4   : > { %v9019_v26 = vadd.f32 %v4650_v29, %v4004_v9  ;;  %v6761_v30 = vadd.f32 %v6760_v25, %v6759_v5  ;;  %v6783_v31 = vadd.f32 %v6782_v40, %v6781_v8  ;;  %v6596_v5 = vcombine.high %v5335_v15, %v5337_v16  ;;  %v5330_v8 = vld [vmem:[%s8242_s18 + $0x2b0] sm:$0xff]  ;;  %v5331_v29 = vld [vmem:[%s8242_s18 + $0x2b8] sm:$0xff] }
 0xbe5   : > { %v5332_v9 = vld [vmem:[%s8242_s18 + $0x2f0] sm:$0xff]  ;;  %v5333_v25 = vld [vmem:[%s8242_s18 + $0x2f8] sm:$0xff]  ;;  %v6593_v40 = vcombine.low %v5334_v48, %v5336_v44 }
 0xbe6   : > { %v4653_v49 = vadd.f32 %v6783_v31, %v6761_v30  ;;  %v6595_v30 = vcombine.low %v5335_v15, %v5337_v16  ;;  %v6590_v31 = vcombine.high %v5330_v8, %v5332_v9  ;;  %v6589_v53 = vcombine.low %v5330_v8, %v5332_v9  ;;  %v5310_v44 = vld [vmem:[%s8242_s18 + $0x30] sm:$0xff] }
 0xbe7   : > { %v6591_v56 = vcombine.low %v5331_v29, %v5333_v25  ;;  %v7302_v8 = vld [vmem:[%s8246_s14 + $0x3f0] sm:$0xff]  }
 0xbe8   : > { %v9022_v33 = vadd.f32 %v4653_v49, %v4005_v32  ;;  %v6592_v32 = vcombine.high %v5331_v29, %v5333_v25  ;;  %v5326_v49 = vld [vmem:[%s8242_s18 + $0x230] sm:$0xff]  ;;  %v7306_v25 = vld [vmem:[%s8246_s14 + $0x3e8] sm:$0xff]  }
 0xbe9   : > { %v6586_v57 = vcombine.high %v5326_v49, %v5328_v34  ;;  %v7303_v9 = vld [vmem:[%s8246_s14 + $0x330] sm:$0xff]  }
 0xbea   : > { %v7304_v29 = vld [vmem:[%s8246_s14 + $0x3b0] sm:$0xff]  }
 0xbfd   : > { %v4906_v63 = vpop.f32.mrf.mxu1  ;;  %v4949_v18 = vpop.f32.mrf.mxu0 }
 0xbfe   : > { %v4907_v43 = vadd.f32 %v4906_v63, %v4695_v13  ;;  %v4950_v39 = vadd.f32 %v4949_v18, %v4703_v21  ;;  %v5327_v63 = vld [vmem:[%s8242_s18 + $0x238] sm:$0xff] }
 0xbff   : > { %v4908_v2 = vpop.f32.mrf.mxu1  ;;  %v4951_v54 = vpop.f32.mrf.mxu0  ;;  %v5329_v18 = vld [vmem:[%s8242_s18 + $0x278] sm:$0xff] }
 0xc00   : > { %v4909_v45 = vadd.f32 %v4908_v2, %v4699_v47  ;;  %v4952_v11 = vadd.f32 %v4951_v54, %v4707_v10  ;;  %v4958_v58 = vmax.f32 %v4907_v43, 0.0  ;;  %v4960_v59 = vmax.f32 %v4950_v39, 0.0  ;;  %v5318_v54 = vld [vmem:[%s8242_s18 + $0x130] sm:$0xff] }
 0xc01   : > { %v4910_v37 = vpop.f32.mrf.mxu1  ;;  %v4953_v55 = vpop.f32.mrf.mxu0  ;;  %v5314_v39 = vld [vmem:[%s8242_s18 + $0xb0] sm:$0xff] }
 0xc02   : > { %v4911_v22 = vadd.f32 %v4910_v37, %v4695_v13  ;;  %v4954_v23 = vadd.f32 %v4953_v55, %v4703_v21  ;;  %v4959_v36 = vmax.f32 %v4909_v45, 0.0  ;;  %v4961_v50 = vmax.f32 %v4952_v11, 0.0  ;;  %v5320_v37 = vld [vmem:[%s8242_s18 + $0x170] sm:$0xff]  ;;  %v5319_v55 = vld [vmem:[%s8242_s18 + $0x138] sm:$0xff] }
 0xc03   : > { %v4912_v0 = vpop.f32.mrf.mxu1  ;;  %v4955_v28 = vpop.f32.mrf.mxu0  ;;  %v6585_v13 = vcombine.low %v5326_v49, %v5328_v34  ;;  %v5321_v45 = vld [vmem:[%s8242_s18 + $0x178] sm:$0xff]  ;;  %v7311_v49 = vld [vmem:[%s8246_s14 + $0x320] sm:$0xff]  }
 0xc04   : > { %v4913_v17 = vadd.f32 %v4912_v0, %v4699_v47  ;;  %v4956_v19 = vadd.f32 %v4955_v28, %v4707_v10  ;;  %v4962_v46 = vmax.f32 %v4911_v22, 0.0  ;;  %v4964_v35 = vmax.f32 %v4954_v23, 0.0  ;;  %v5323_v47 = vld [vmem:[%s8242_s18 + $0x1b8] sm:$0xff]  ;;  %v5316_v0 = vld [vmem:[%s8242_s18 + $0xf0] sm:$0xff]  ;;  %v7312_v34 = vld [vmem:[%s8246_s14 + $0x3a0] sm:$0xff]  }
 0xc05   : > { %v5325_v10 = vld [vmem:[%s8242_s18 + $0x1f8] sm:$0xff]  ;;  %v6578_v23 = vcombine.high %v5318_v54, %v5320_v37  ;;  %v6580_v43 = vcombine.high %v5319_v55, %v5321_v45 }
 0xc06   : > { %v4963_v51 = vmax.f32 %v4913_v17, 0.0  ;;  %v4965_v52 = vmax.f32 %v4956_v19, 0.0  ;;  %v4966_v1 = vpack.c.bf16 %v4962_v46, %v4958_v58  ;;  %v4968_v3 = vpack.c.bf16 %v4964_v35, %v4960_v59  ;;  %v5315_v28 = vld [vmem:[%s8242_s18 + $0xb8] sm:$0xff] }
 0xc07   : > { %v6584_v2 = vcombine.high %v5323_v47, %v5325_v10  ;;  %v6583_v22 = vcombine.low %v5323_v47, %v5325_v10  ;;  %v5317_v17 = vld [vmem:[%s8242_s18 + $0xf8] sm:$0xff]  ;;  %v6577_v19 = vcombine.low %v5318_v54, %v5320_v37  ;;  %v6579_v46 = vcombine.low %v5319_v55, %v5321_v45  ;;  %v7321_v47 = vld [vmem:[%s8246_s14 + $0x348] sm:$0xff]   ;;  %v7327_v54 = vld [vmem:[%s8246_s14 + $0x300] sm:$0xff]  }
 0xc08   : > { %v4967_v60 = vpack.c.bf16 %v4963_v51, %v4959_v36  ;;  %v4969_v20 = vpack.c.bf16 %v4965_v52, %v4961_v50  ;;  %v6574_v35 = vcombine.high %v5314_v39, %v5316_v0  ;;  %v6576_v48 = vcombine.high %v5315_v28, %v5317_v17  ;;  %v5312_v36 = vld [vmem:[%s8242_s18 + $0x70] sm:$0xff]  ;;  %v5311_v50 = vld [vmem:[%s8242_s18 + $0x38] sm:$0xff]  ;;  %v7322_v10 = vld [vmem:[%s8246_s14 + $0x3c8] sm:$0xff]  }
 0xc09   : > { %v5313_v51 = vld [vmem:[%s8242_s18 + $0x78] sm:$0xff]  ;;  %v6573_v52 = vcombine.low %v5314_v39, %v5316_v0  ;;  %v6575_v15 = vcombine.low %v5315_v28, %v5317_v17  ;;  %v6570_v16 = vcombine.high %v5310_v44, %v5312_v36  ;;  %v6569_v59 = vcombine.low %v5310_v44, %v5312_v36  ;;  %v7328_v37 = vld [vmem:[%s8246_s14 + $0x380] sm:$0xff]  }
 0xc0a   : > { %5258 = vmatprep.mubr.bf16.mxu1 %v4967_v60  ;;  %5299 = vmatprep.mubr.bf16.mxu0 %v4969_v20  ;;  %v6572_v58 = vcombine.high %v5311_v50, %v5313_v51  ;;  %v6571_v60 = vcombine.low %v5311_v50, %v5313_v51  ;;  %v7297_v20 = vld [vmem:[%s8246_s14 + $0x378] sm:$0xff]  }
 0xc0b   : > { %5259 = vmatmul.mubr.bf16.vlgmr.msra.gmra.mxu1 %v4966_v1  ;;  %5300 = vmatmul.mubr.bf16.vlgmr.msra.gmra.mxu0 %v4968_v3  ;;  %v7298_v1 = vld [vmem:[%s8246_s14 + $0x3f8] sm:$0xff]  }
 0xc0c   : > { %5525 = vmatpush1.bf16.msra.mxu1 %v6597_v14  ;;  %5568 = vmatpush1.bf16.msra.mxu0 %v6599_v38  ;;  %v6588_v14 = vcombine.high %v5327_v63, %v5329_v18  ;;  %v5324_v38 = vld [vmem:[%s8242_s18 + $0x1f0] sm:$0xff]  ;;  %v7299_v3 = vld [vmem:[%s8246_s14 + $0x338] sm:$0xff]  }
 0xc0d   : > { %5526 = vmatprep.subr.bf16.mxu1 %v6594_v4  ;;  %5569 = vmatprep.subr.bf16.mxu0 %v6596_v5  ;;  %v6582_v21 = vcombine.high %v5322_v62, %v5324_v38  ;;  %v6581_v11 = vcombine.low %v5322_v62, %v5324_v38  ;;  %v7300_v4 = vld [vmem:[%s8246_s14 + $0x3b8] sm:$0xff]   ;;  %v7301_v5 = vld [vmem:[%s8246_s14 + $0x370] sm:$0xff]  }
 0xc0e   : > { %5556 = vmatprep.mubr.bf16.mxu1 %v7777_v12  ;;  %5599 = vmatprep.mubr.bf16.mxu0 %v7777_v12  ;;  %v6587_v12 = vcombine.low %v5327_v63, %v5329_v18  ;;  %v7313_v63 = vld [vmem:[%s8246_s14 + $0x358] sm:$0xff]   ;;  %v7319_v62 = vld [vmem:[%s8246_s14 + $0x310] sm:$0xff]  }
 0xc0f   : > { %v7314_v18 = vld [vmem:[%s8246_s14 + $0x3d8] sm:$0xff]   ;;  %v7320_v38 = vld [vmem:[%s8246_s14 + $0x390] sm:$0xff]  }
 0xc10   : > { %5527 = vmatpush1.bf16.msra.mxu1 %v6593_v40  ;;  %5570 = vmatpush1.bf16.msra.mxu0 %v6595_v30  ;;  %v7307_v40 = vld [vmem:[%s8246_s14 + $0x328] sm:$0xff]  }
 0xc11   : > { %5528 = vmatprep.subr.bf16.mxu1 %v6590_v31  ;;  %5571 = vmatprep.subr.bf16.mxu0 %v6592_v32  ;;  %v7308_v30 = vld [vmem:[%s8246_s14 + $0x3a8] sm:$0xff]   ;;  %v7309_v31 = vld [vmem:[%s8246_s14 + $0x360] sm:$0xff]  }
 0xc12   : > { %v7310_v32 = vld [vmem:[%s8246_s14 + $0x3e0] sm:$0xff]   ;;  %v5342_v50 = vld [vmem:[%s8244_s3 + $0xc] sm:$0xf] }
 0xc14   : > { %5529 = vmatpush1.bf16.msra.mxu1 %v6589_v53  ;;  %5572 = vmatpush1.bf16.msra.mxu0 %v6591_v56  ;;  %v7315_v53 = vld [vmem:[%s8246_s14 + $0x318] sm:$0xff]  }
 0xc15   : > { %5530 = vmatprep.subr.bf16.mxu1 %v6586_v57  ;;  %5573 = vmatprep.subr.bf16.mxu0 %v6588_v14  ;;  %v7316_v56 = vld [vmem:[%s8246_s14 + $0x398] sm:$0xff]   ;;  %v7317_v57 = vld [vmem:[%s8246_s14 + $0x350] sm:$0xff]  }
 0xc16   : > { %v7318_v14 = vld [vmem:[%s8246_s14 + $0x3d0] sm:$0xff]  }
 0xc18   : > { %5531 = vmatpush1.bf16.msra.mxu1 %v6585_v13  ;;  %5574 = vmatpush1.bf16.msra.mxu0 %v6587_v12  ;;  %v7323_v13 = vld [vmem:[%s8246_s14 + $0x308] sm:$0xff]  }
 0xc19   : > { %5532 = vmatprep.subr.bf16.mxu1 %v6582_v21  ;;  %5575 = vmatprep.subr.bf16.mxu0 %v6584_v2  ;;  %v7324_v12 = vld [vmem:[%s8246_s14 + $0x388] sm:$0xff]   ;;  %v7325_v21 = vld [vmem:[%s8246_s14 + $0x340] sm:$0xff]  }
 0xc1a   : > { %v7326_v2 = vld [vmem:[%s8246_s14 + $0x3c0] sm:$0xff]  }
 0xc1c   : > { %5533 = vmatpush1.bf16.msra.mxu1 %v6581_v11  ;;  %5576 = vmatpush1.bf16.msra.mxu0 %v6583_v22 }
 0xc1d   : > { %5534 = vmatprep.subr.bf16.mxu1 %v6578_v23  ;;  %5577 = vmatprep.subr.bf16.mxu0 %v6580_v43 }
 0xc20   : > { %5535 = vmatpush1.bf16.msra.mxu1 %v6577_v19  ;;  %5578 = vmatpush1.bf16.msra.mxu0 %v6579_v46 }
 0xc21   : > { %5536 = vmatprep.subr.bf16.mxu1 %v6574_v35  ;;  %5579 = vmatprep.subr.bf16.mxu0 %v6576_v48 }
 0xc24   : > { %5537 = vmatpush1.bf16.msra.mxu1 %v6573_v52  ;;  %5580 = vmatpush1.bf16.msra.mxu0 %v6575_v15  ;;  %v5351_v15 = vrot.slane %v5342_v50, %v8303_v42 }
 0xc25   : > { %5538 = vmatprep.subr.bf16.mxu1 %v6570_v16  ;;  %5581 = vmatprep.subr.bf16.mxu0 %v6572_v58  ;;  %v5359_v16 = vrot.slane %v5342_v50, %v8826_v61  ;;  %v5347_v58 = vrot.slane %v5342_v50, %v8300_v41 }
 0xc28   : > { %5539 = vmatpush1.bf16.msra.mxu1 %v6569_v59  ;;  %5582 = vmatpush1.bf16.msra.mxu0 %v6571_v60  ;;  %v5355_v59 = vrot.slane %v5342_v50, %v8485_v6 }
 0xc29   : > { %6828 = vmatprep.subr.bf16.mxu1 %v7297_v20  ;;  %6850 = vmatprep.subr.bf16.mxu0 %v7298_v1 }
 0xc2b   : > { %5557 = vmatmul.mubr.bf16.vlgmr.msra.gmra.mxu1 %v8789_v27  ;;  %5600 = vmatmul.mubr.bf16.vlgmr.msra.gmra.mxu0 %v8789_v27  ;;  %v7305_v27 = vld [vmem:[%s8246_s14 + $0x368] sm:$0xff]  }
 0xc2c   : > { %6829 = vmatpush3.bf16.msra.mxu1 %v7299_v3  ;;  %6851 = vmatpush3.bf16.msra.mxu0 %v7300_v4 }
 0xc2d   : > { %6830 = vmatprep.subr.bf16.mxu1 %v7301_v5  ;;  %6852 = vmatprep.subr.bf16.mxu0 %v7302_v8 }
 0xc30   : > { %6831 = vmatpush3.bf16.msra.mxu1 %v7303_v9  ;;  %6853 = vmatpush3.bf16.msra.mxu0 %v7304_v29 }
 0xc31   : > { %6832 = vmatprep.subr.bf16.mxu1 %v7305_v27  ;;  %6854 = vmatprep.subr.bf16.mxu0 %v7306_v25 }
 0xc34   : > { %6833 = vmatpush3.bf16.msra.mxu1 %v7307_v40  ;;  %6855 = vmatpush3.bf16.msra.mxu0 %v7308_v30 }
 0xc35   : > { %6834 = vmatprep.subr.bf16.mxu1 %v7309_v31  ;;  %6856 = vmatprep.subr.bf16.mxu0 %v7310_v32 }
 0xc38   : > { %6835 = vmatpush3.bf16.msra.mxu1 %v7311_v49  ;;  %6857 = vmatpush3.bf16.msra.mxu0 %v7312_v34 }
 0xc39   : > { %6836 = vmatprep.subr.bf16.mxu1 %v7313_v63  ;;  %6858 = vmatprep.subr.bf16.mxu0 %v7314_v18 }
 0xc3c   : > { %6837 = vmatpush3.bf16.msra.mxu1 %v7315_v53  ;;  %6859 = vmatpush3.bf16.msra.mxu0 %v7316_v56 }
 0xc3d   : > { %6838 = vmatprep.subr.bf16.mxu1 %v7317_v57  ;;  %6860 = vmatprep.subr.bf16.mxu0 %v7318_v14 }
 0xc40   : > { %6839 = vmatpush3.bf16.msra.mxu1 %v7319_v62  ;;  %6861 = vmatpush3.bf16.msra.mxu0 %v7320_v38 }
 0xc41   : > { %6840 = vmatprep.subr.bf16.mxu1 %v7321_v47  ;;  %6862 = vmatprep.subr.bf16.mxu0 %v7322_v10 }
 0xc44   : > { %6841 = vmatpush3.bf16.msra.mxu1 %v7323_v13  ;;  %6863 = vmatpush3.bf16.msra.mxu0 %v7324_v12 }
 0xc45   : > { %6842 = vmatprep.subr.bf16.mxu1 %v7325_v21  ;;  %6864 = vmatprep.subr.bf16.mxu0 %v7326_v2 }
 0xc48   : > { %6843 = vmatpush3.bf16.msra.mxu1 %v7327_v54  ;;  %6865 = vmatpush3.bf16.msra.mxu0 %v7328_v37 }
 0xccb   : > { %v6800_v55 = vpop.f32.mrf.mxu1  ;;  %v6822_v45 = vpop.f32.mrf.mxu0 }
 0xccd   : > { %v6801_v11 = vpop.f32.mrf.mxu1  ;;  %v6823_v22 = vpop.f32.mrf.mxu0 }
 0xcce   : > { %v6802_v23 = vadd.f32 %v6801_v11, %v6800_v55  ;;  %v6824_v43 = vadd.f32 %v6823_v22, %v6822_v45 }
 0xccf   : > { %v6803_v39 = vpop.f32.mrf.mxu1  ;;  %v6825_v0 = vpop.f32.mrf.mxu0 }
 0xcd0   : > { %v5302_v28 = vadd.f32 %v6824_v43, %v6802_v23 }
 0xcd1   : > { %v6804_v17 = vpop.f32.mrf.mxu1  ;;  %v6826_v19 = vpop.f32.mrf.mxu0 }
 0xcd2   : > { %v5308_v46 = vadd.f32 %v5302_v28, %v9019_v26  ;;  %v6805_v35 = vadd.f32 %v6804_v17, %v6803_v39  ;;  %v6827_v48 = vadd.f32 %v6826_v19, %v6825_v0 }
 0xcd4   : > { %v5305_v44 = vadd.f32 %v6827_v48, %v6805_v35 }
 0xcd6   : > { %v5309_v36 = vadd.f32 %v5305_v44, %v9022_v33 }
 0xceb   : > { %v5558_v51 = vpop.f32.mrf.mxu1  ;;  %v5601_v52 = vpop.f32.mrf.mxu0 }
 0xcec   : > { %v5559_v33 = vadd.f32 %v5558_v51, %v5347_v58  ;;  %v5602_v9 = vadd.f32 %v5601_v52, %v5355_v59 }
 0xced   : > { %v5560_v60 = vpop.f32.mrf.mxu1  ;;  %v5603_v20 = vpop.f32.mrf.mxu0 }
 0xcee   : > { %v5561_v3 = vadd.f32 %v5560_v60, %v5351_v15  ;;  %v5604_v4 = vadd.f32 %v5603_v20, %v5359_v16  ;;  %v5610_v34 = vmax.f32 %v5559_v33, 0.0  ;;  %v5612_v63 = vmax.f32 %v5602_v9, 0.0 }
 0xcef   : > { %v5562_v1 = vpop.f32.mrf.mxu1  ;;  %v5605_v26 = vpop.f32.mrf.mxu0 }
 0xcf0   : > { %v5563_v5 = vadd.f32 %v5562_v1, %v5347_v58  ;;  %v5606_v8 = vadd.f32 %v5605_v26, %v5355_v59  ;;  %v5611_v31 = vmax.f32 %v5561_v3, 0.0  ;;  %v5613_v41 = vmax.f32 %v5604_v4, 0.0 }
 0xcf1   : > { %v5564_v29 = vpop.f32.mrf.mxu1  ;;  %v5607_v27 = vpop.f32.mrf.mxu0 }
 0xcf2   : > { %v5565_v25 = vadd.f32 %v5564_v29, %v5351_v15  ;;  %v5608_v42 = vadd.f32 %v5607_v27, %v5359_v16  ;;  %v5614_v40 = vmax.f32 %v5563_v5, 0.0  ;;  %v5616_v30 = vmax.f32 %v5606_v8, 0.0 }
 0xcf4   : > { %v5615_v32 = vmax.f32 %v5565_v25, 0.0  ;;  %v5617_v49 = vmax.f32 %v5608_v42, 0.0  ;;  %v5618_v56 = vpack.c.bf16 %v5614_v40, %v5610_v34  ;;  %v5620_v57 = vpack.c.bf16 %v5616_v30, %v5612_v63 }
 0xcf6   : > { %v5619_v18 = vpack.c.bf16 %v5615_v32, %v5611_v31  ;;  %v5621_v53 = vpack.c.bf16 %v5617_v49, %v5613_v41 }
 0xcf8   : > { %5910 = vmatprep.mubr.bf16.mxu1 %v5619_v18  ;;  %5951 = vmatprep.mubr.bf16.mxu0 %v5621_v53 }
 0xcf9   : > { %5911 = vmatmul.mubr.bf16.vlgmr.msra.gmra.mxu1 %v5618_v56  ;;  %5952 = vmatmul.mubr.bf16.vlgmr.msra.gmra.mxu0 %v5620_v57 }
 0xdb9   : > { %v6844_v14 = vpop.f32.mrf.mxu1  ;;  %v6866_v62 = vpop.f32.mrf.mxu0 }
 0xdbb   : > { %v6845_v38 = vpop.f32.mrf.mxu1  ;;  %v6867_v47 = vpop.f32.mrf.mxu0 }
 0xdbc   : > { %v6846_v10 = vadd.f32 %v6845_v38, %v6844_v14  ;;  %v6868_v13 = vadd.f32 %v6867_v47, %v6866_v62 }
 0xdbd   : > { %v6847_v12 = vpop.f32.mrf.mxu1  ;;  %v6869_v21 = vpop.f32.mrf.mxu0 }
 0xdbe   : > { %v5954_v2 = vadd.f32 %v6868_v13, %v6846_v10 }
 0xdbf   : > { %v6848_v54 = vpop.f32.mrf.mxu1  ;;  %v6870_v37 = vpop.f32.mrf.mxu0 }
 0xdc0   : > { %v6849_v55 = vadd.f32 %v6848_v54, %v6847_v12  ;;  %v6871_v45 = vadd.f32 %v6870_v37, %v6869_v21  ;;  %v5960_v11 = vadd.f32 %v5954_v2, %v5308_v46 }
 0xdc2   : > { %v5957_v22 = vadd.f32 %v6871_v45, %v6849_v55  ;;  %v5962_v23 = vadd.f32 %v5960_v11, %v8781_v24 }
 0xdc4   : > { %5964 = vadd.xlane.f32.xlu0 %v5962_v23  ;;  %v5961_v43 = vadd.f32 %v5957_v22, %v5309_v36 }
 0xdc6   : > { %v5963_v39 = vadd.f32 %v5961_v43, %v8783_v7  ;;  %v7371_v7 = vld [vmem:[%s8249_s19] sm:$0xf] }
 0xdc7   : > { %v5989_v16 = vrot.slane %v7371_v7, %v8485_v6  ;;  %v5995_v59 = vrot.slane %v7371_v7, %v8826_v61 }
 0xdc8   : > { %5966 = vadd.xlane.f32.xlu1 %v5963_v39 }
 0xe4d   : > { %v5965_v0 = vpop.xlane.xlu0 %5964 }
 0xe4e   : > { %v5968_v28 = vmul.f32 0.0078125, %v5965_v0 }
 0xe50   : > { %v5970_v17 = vsub.f32 %v5962_v23, %v5968_v28 }
 0xe51   : > { %v5967_v19 = vpop.xlane.xlu1 %5966 }
 0xe52   : > { %v5969_v35 = vmul.f32 0.0078125, %v5967_v19  ;;  %v5972_v48 = vmul.f32 %v5970_v17, %v5970_v17 }
 0xe54   : > { %v5971_v44 = vsub.f32 %v5963_v39, %v5969_v35  ;;  %5974 = vadd.xlane.f32.xlu0 %v5972_v48 }
 0xe56   : > { %v5973_v50 = vmul.f32 %v5971_v44, %v5971_v44 }
 0xe58   : > { %5976 = vadd.xlane.f32.xlu1 %v5973_v50 }
 0xedd   : > { %v5975_v46 = vpop.xlane.xlu0 %5974 }
 0xede   : > { %v5978_v51 = vmul.f32 0.0078125, %v5975_v46 }
 0xee0   : > { %v5980_v52 = vadd.f32 1e-05, %v5978_v51 }
 0xee1   : > { %v5977_v24 = vpop.xlane.xlu1 %5976 }
 0xee2   : > { %7365 = vrsqrt.f32 %v5980_v52  ;;  %v5979_v36 = vmul.f32 0.0078125, %v5977_v24 }
 0xee4   : > { %v5981_v15 = vadd.f32 1e-05, %v5979_v36 }
 0xee6   : > { %7367 = vrsqrt.f32 %v5981_v15 }
 0xeef   : > { %v7366_v58 = vpop.eup %7365 }
 0xef0   : > { %v5984_v60 = vmul.f32 %v7366_v58, %v5970_v17 }
 0xef2   : > { %v5990_v20 = vmul.f32 %v5989_v16, %v5984_v60 }
 0xef3   : > { %v7368_v1 = vpop.eup %7367 }
 0xef4   : > { %v5996_v26 = vadd.f32 %v5995_v59, %v5990_v20  ;;  %v5985_v3 = vmul.f32 %v7368_v1, %v5971_v44 }
 0xef6   : > { %5998 = vst [vmem:[#allocation2] sm:$0xff] %v5996_v26  ;;  %v5991_v4 = vmul.f32 %v5989_v16, %v5985_v3  ;;  %6003 = sbr.rel (%p6633_p3) target bundleno = 4022 (0xfb6), region = 132 }
 0xef8   : > { %v5997_v5 = vadd.f32 %v5995_v59, %v5991_v4 }
 0xefa   : > { %5999 = vst [vmem:[#allocation2 + $0x8] sm:$0xff] %v5997_v5 }
 0xefb   : > { %v6634_v33 = vld [vmem:[#allocation17] ss:$0 sm:$0xff]  ;;  %vm6020_vm7 = vcmask 1047559   ;;  %vm6024_vm8 = vcmask 1040384   ;;  %v6635_v42 = vld [vmem:[#allocation3] ss:$0 sm:$0xff] }
 0xefc   : > { %vm6049_vm9 = vcmask 7175   ;;  %vm6051_vm10 = vcmask 0  }
 0xefd   : > { %v6004_v8 = vld [vmem:[#allocation2] sm:$0xff] }
 0xefe   : > { %v6013_v6 = vmul.f32 %v6634_v33, %v6004_v8 }
 0xf00   : > { %v6021_v61 = vsel %vm6020_vm7, %v6013_v6, 0.0 }
 0xf01   : > { %v6005_v9 = vld [vmem:[#allocation2 + $0x8] sm:$0xff]  ;;  %6022 = vadd.xlane.f32.xlu0 %v6021_v61 }
 0xf02   : > { %v6014_v29 = vmul.f32 %v6634_v33, %v6005_v9 }
 0xf04   : > { %v6017_v27 = vrot.slane %v6014_v29, 7 }
 0xf06   : > { %v6025_v25 = vsel %vm6024_vm8, %v6017_v27, 0.0 }
 0xf07   : > { %6026 = vadd.xlane.f32.xlu0 %v6025_v25 }
 0xf8a   : > { %v6023_v40 = vpop.xlane.xlu0 %6022 }
 0xf8b   : > { %v6035_v30 = vadd.f32 %v6635_v42, %v6023_v40 }
 0xf8d   : > { %v6037_v31 = vsub.f32 0.0, %v6035_v30 }
 0xf8f   : > { %v6039_v32 = vmul.f32 1.442695, %v6037_v31 }
 0xf90   : > { %v6027_v41 = vpop.xlane.xlu0 %6026 }
 0xf91   : > { %v6036_v49 = vadd.f32 %v6635_v42, %v6027_v41  ;;  %7372 = vpow2.f32 %v6039_v32 }
 0xf93   : > { %v6038_v34 = vsub.f32 0.0, %v6036_v49 }
 0xf95   : > { %v6041_v63 = vmul.f32 1.442695, %v6038_v34 }
 0xf97   : > { %7374 = vpow2.f32 %v6041_v63 }
 0xf9e   : > { %v7373_v18 = vpop.eup %7372 }
 0xf9f   : > { %v6043_v53 = vadd.f32 1.0, %v7373_v18 }
 0xfa1   : > { %7376 = vrcp.f32 %v6043_v53 }
 0xfa4   : > { %v7375_v56 = vpop.eup %7374 }
 0xfa5   : > { %v6044_v57 = vadd.f32 1.0, %v7375_v56 }
 0xfa7   : > { %7378 = vrcp.f32 %v6044_v57 }
 0xfae   : > { %v7377_v14 = vpop.eup %7376 }
 0xfaf   : > { %6050 = vst.msk [vmem:[%s9209_s28 - $0x7] sm:$0x80] %vm6049_vm9, %v7377_v14 }
 0xfb4   : > { %v7379_v62 = vpop.eup %7378 }
 0xfb5   : > { %6052 = vst.msk [vmem:[%s9209_s28 + $0x1] sm:$0x1] %vm6051_vm10, %v7379_v62 }
 0xfb6 PF: > { %s9210_s18 = sld [smem:[#allocation25_spill]] }
 0xfb7   : > { %s9211_s15 = sld [smem:[#allocation22_spill]] }
 0xfb8   : > { %s9212_s16 = sld [smem:[#allocation23_spill]] }
 0xfb9   : > { %s9213_s17 = sld [smem:[#allocation26_spill]] }
 0xfbc   : > { %p25_p10 = scmp.ge.s32.totalorder %s9210_s18, 4  }
 0xfbe   :  { %27 = sbr.rel (!%p25_p10) target bundleno = 9 (0x9), region = 219 }
 0xfc3   :  { %6064 = vsyncpa [#allocation5], 1 }
 0xfc4   :  { %6066 = vsyncpa [#allocation5 + $0x1], 1 }
 0xfc5   :  { %6067 = vsyncpa [#allocation7], 1 }

</bundles_post_ra>
